<compile_context>
chip_gen: v5e
topology: v5e:2x2
jax: 0.10.0
libtpu: 0.0.40
codegen_flags: <defaults>
</compile_context>

<pallas_src>
import functools

import jax
import jax.numpy as jnp
from jax.experimental import pallas as pl
from jax.experimental.pallas import tpu as pltpu


# Real module dims (from the PyTorch spec).
ADVNN_DIMS = [(2560, 20480), (20480, 20480), (20480, 1024), (1024, 3)]

# Scaled-down dims for the in-script smoke test (full-size weights are too
# slow to build/check in a quick smoke run; structure and code path identical).
DEMO_DIMS = [(256, 1024), (1024, 1024), (1024, 256), (256, 3)]

# Per weight buffer cap: tiles >= ~8 MiB already sit >86% of the DMA roofline;
# going much larger only inflates the cold first-tile fill of each layer.
_MAX_WEIGHT_TILE_BYTES = 16 << 20


# ---------------------------------------------------------------------------
# Hardware queries (with safe fallbacks)
# ---------------------------------------------------------------------------
def _vmem_capacity_bytes() -> int:
    try:
        return int(pltpu.get_tpu_info().vmem_capacity_bytes)
    except Exception:
        return 64 << 20  # conservative (v7x-sized) fallback


def _num_tensorcores_per_chip() -> int:
    """Best-effort TensorCore count (v7x: 2, v5e/v6e: 1)."""
    try:
        info = pltpu.get_tpu_info()
        for attr in ("num_tensorcores", "tensorcores_per_chip", "num_cores"):
            n = getattr(info, attr, None)
            if isinstance(n, int) and n in (1, 2):
                return n
        # 64 MiB per-TC VMEM => v7x (2 TCs); 128 MiB => v5e/v6e (1 TC).
        return 2 if int(info.vmem_capacity_bytes) <= (64 << 20) else 1
    except Exception:
        return 1


# ---------------------------------------------------------------------------
# VMEM-aware tile selection
# ---------------------------------------------------------------------------
def _candidate_tiles(dim: int):
    """Valid block sizes: divisors of dim that are multiples of 128, plus dim."""
    cands = {dim}
    t = 128
    while t < dim:
        if dim % t == 0:
            cands.add(t)
        t += 128
    return sorted(cands, reverse=True)


def _pick_tiles(K, N, w_bytes, weight_budget, num_tc, max_tk=None, max_tn=None):
    """Pick (tk, tn) weight-tile sizes.

    tn: full N on single-TC chips (contiguous DMA rows); on multi-TC chips
        (v7x) constrain (N // tn) to a multiple of num_tc so the "parallel"
        N axis splits evenly across TensorCores.
    tk: largest divisor of K (multiple of 128, or K itself) such that a
        double-buffered (tk, tn) weight tile fits the weight budget, with a
        per-buffer cap of _MAX_WEIGHT_TILE_BYTES.
    """
    per_buf = min(weight_budget // 2, _MAX_WEIGHT_TILE_BYTES)
    per_buf = max(per_buf, 128 * 128 * w_bytes)

    split_n = num_tc >= 2 and N >= 256 * num_tc
    n_cap = (N // num_tc) if split_n else N
    if max_tn is not None:
        n_cap = min(n_cap, max_tn)

    n_cands = _candidate_tiles(N)
    tn = None
    for t in n_cands:
        if t <= n_cap and (not split_n or (N // t) % num_tc == 0):
            tn = t
            break
    if tn is None:  # drop the even-split constraint if it cannot be met
        tn = next((t for t in n_cands if t <= n_cap), N)

    k_cap = max(128, per_buf // (tn * w_bytes))
    if max_tk is not None:
        k_cap = min(k_cap, max_tk)
    k_cands = _candidate_tiles(K)
    tk = next((t for t in k_cands if t <= k_cap), min(k_cands))
    return tk, tn


# ---------------------------------------------------------------------------
# Kernel: y = relu?((x @ Wq) * scale + b) with int8 weights, f32 accumulation
# in a VMEM scratch, scale + bias + ReLU fused on the last K step, bf16 output.
# Grid is (N blocks, K blocks) with the K reduction INNERMOST ("arbitrary");
# the accumulator is zeroed at k == 0 and finalized at k == last.  Do not
# reorder the grid axes.
# ---------------------------------------------------------------------------
def _linear_q_kernel(x_ref, w_ref, s_ref, b_ref, o_ref, acc_ref, *, tk: int,
                     relu: bool):
    k = pl.program_id(1)

    @pl.when(k == 0)
    def _():
        acc_ref[...] = jnp.zeros_like(acc_ref)

    start = k * tk
    if tk % 128 == 0:
        start = pl.multiple_of(start, 128)
    xk = x_ref[:, pl.ds(start, tk)]  # x is fully VMEM-resident; slice K-chunk

    # int8 values are exact in bf16; the per-output-channel scale is applied
    # once to the (M, tn) accumulator below, so the only per-tile VPU work is
    # this convert, which hides under the weight-tile DMA.
    w = w_ref[...].astype(jnp.bfloat16)
    acc_ref[...] += jnp.dot(xk, w, preferred_element_type=jnp.float32)

    @pl.when(k == pl.num_programs(1) - 1)
    def _():
        y = acc_ref[...] * s_ref[...] + b_ref[...]
        if relu:
            y = jnp.maximum(y, 0.0)
        o_ref[...] = y.astype(o_ref.dtype)


def pallas_linear_q(x, w_q, scale, b, *, relu: bool, out_dtype=jnp.bfloat16,
                    max_tk=None, max_tn=None):
    """y = relu?((x @ w_q) * scale + b).

    x: (M, K) float, w_q: (K, N) int8, scale: (1, N) f32 per-output-channel,
    b: (N,) f32.  Returns (M, N) in `out_dtype`.
    """
    M, K = x.shape
    Kw, N = w_q.shape
    assert K == Kw and scale.shape == (1, N) and b.shape == (N,)

    w_bytes = jnp.dtype(w_q.dtype).itemsize
    vmem_cap = _vmem_capacity_bytes()
    num_tc = _num_tensorcores_per_chip()
    vmem_limit = int(vmem_cap * 0.85)      # scoped limit, below physical
    weight_budget = int(vmem_cap * 0.75)   # non-weight residents are < 1 MiB here

    tk, tn = _pick_tiles(K, N, w_bytes, weight_budget, num_tc, max_tk, max_tn)
    assert 2 * tk * tn * w_bytes <= weight_budget, (
        f"double-buffered weight tiles ({tk}x{tn}x{w_bytes}B) exceed the VMEM "
        f"weight budget ({weight_budget}B)")

    x = x.astype(jnp.bfloat16)             # no-op when fed by a previous layer
    b2 = b.reshape(1, N).astype(jnp.float32)
    scale = scale.astype(jnp.float32)

    grid = (N // tn, K // tk)              # K (reduction) must stay innermost
    kernel = functools.partial(_linear_q_kernel, tk=tk, relu=relu)

    # TODO(synk): verify whether PARALLEL or CORE_PARALLEL shards the N axis
    # across v7x's two TensorCores and benchmark both.
    return pl.pallas_call(
        kernel,
        out_shape=jax.ShapeDtypeStruct((M, N), out_dtype),
        grid_spec=pltpu.PrefetchScalarGridSpec(
            num_scalar_prefetch=0,
            grid=grid,
            in_specs=[
                pl.BlockSpec((M, K), lambda j, k: (0, 0)),    # x: VMEM-resident
                pl.BlockSpec((tk, tn), lambda j, k: (k, j)),  # int8 weight stream
                pl.BlockSpec((1, tn), lambda j, k: (0, j)),   # per-channel scale
                pl.BlockSpec((1, tn), lambda j, k: (0, j)),   # bias
            ],
            out_specs=pl.BlockSpec((M, tn), lambda j, k: (0, j)),
            scratch_shapes=[pltpu.VMEM((M, tn), jnp.float32)],  # f32 accumulator
        ),
        compiler_params=pltpu.CompilerParams(
            dimension_semantics=("parallel", "arbitrary"),
            vmem_limit_bytes=vmem_limit,
        ),
    )(x, w_q, scale, b2)


# ---------------------------------------------------------------------------
# Parameters (mimics torch.nn.Linear default init: U(+-1/sqrt(fan_in))).
# The three big layers are stored int8 + per-output-channel f32 scales; the
# tiny final layer stays f32.  (In a real deployment the quantized weights
# would come straight from the checkpoint instead of an f32 master copy.)
# ---------------------------------------------------------------------------
def quantize_per_channel_int8(w):
    """Symmetric per-output-channel int8 quantization of (K, N) f32 weights."""
    amax = jnp.max(jnp.abs(w), axis=0, keepdims=True)         # (1, N)
    scale = jnp.maximum(amax, 1e-12) / 127.0
    w_q = jnp.clip(jnp.round(w / scale), -127.0, 127.0).astype(jnp.int8)
    return w_q, scale.astype(jnp.float32)


def init_params(key, dims):
    params = []
    for i, (fan_in, fan_out) in enumerate(dims):
        key, kw, kb = jax.random.split(key, 3)
        bound = 1.0 / (fan_in ** 0.5)
        w = jax.random.uniform(kw, (fan_in, fan_out), jnp.float32, -bound, bound)
        b = jax.random.uniform(kb, (fan_out,), jnp.float32, -bound, bound)
        if i < len(dims) - 1:
            w_q, scale = quantize_per_channel_int8(w)
            params.append((w_q, scale, b))
        else:
            params.append((w, b))
    return params


def advnn_forward(params, x, *, max_tk=None, max_tn=None):
    (w1, s1, b1), (w2, s2, b2), (w3, s3, b3), (w4, b4) = params
    x = pallas_linear_q(x, w1, s1, b1, relu=True, max_tk=max_tk, max_tn=max_tn)
    x = pallas_linear_q(x, w2, s2, b2, relu=True, max_tk=max_tk, max_tn=max_tn)
    x = pallas_linear_q(x, w3, s3, b3, relu=True, max_tk=max_tk, max_tn=max_tn)
    # Final Linear(1024->3): N=3 is far below one 128-lane vreg; plain XLA
    # beats a Pallas kernel made of masked partial stores.
    return x.astype(jnp.float32) @ w4 + b4


def advnn_reference(params, x):
    """Plain-JAX reference using the exact same quantized math as the kernels."""
    *hidden, (w4, b4) = params
    h = x.astype(jnp.bfloat16)
    for (w_q, scale, b) in hidden:
        acc = jnp.dot(h, w_q.astype(jnp.bfloat16),
                      preferred_element_type=jnp.float32)
        h = jnp.maximum(acc * scale + b, 0.0).astype(jnp.bfloat16)
    return h.astype(jnp.float32) @ w4 + b4


if __name__ == "__main__":
    key = jax.random.PRNGKey(0)
    kp, kx = jax.random.split(key)

    # Small, fast smoke test (same structure / code path as the real net).
    # Set dims = ADVNN_DIMS to run the full-size network on real hardware.
    dims = DEMO_DIMS
    params = init_params(kp, dims)

    batch = 2
    x = jax.random.normal(kx, (batch, dims[0][0]), jnp.float32)

    # Cap tiles for the demo so both grid axes get > 1 step (the auto-picker
    # would otherwise choose full-extent tiles at these small sizes).
    max_tk = 512 if dims is DEMO_DIMS else None
    max_tn = 512 if dims is DEMO_DIMS else None

    fwd = jax.jit(functools.partial(advnn_forward, max_tk=max_tk, max_tn=max_tn))
    out = jax.block_until_ready(fwd(params, x))

    ref = advnn_reference(params, x)
    assert out.shape == (batch, dims[-1][1])
    assert jnp.allclose(out, ref, atol=2e-2, rtol=2e-2), "mismatch vs reference"

    print("KERNEL_OK")
</pallas_src>

<mosaic_0001>
module attributes {stable_mosaic.version = 11 : i64} {
  func.func @_linear_q_kernel(%arg0: i32, %arg1: i32, %arg2: memref<2x1024xbf16, #tpu.memory_space<vmem>>, %arg3: memref<512x512xi8, #tpu.memory_space<vmem>>, %arg4: memref<1x512xf32, #tpu.memory_space<vmem>>, %arg5: memref<1x512xf32, #tpu.memory_space<vmem>>, %arg6: memref<2x512xbf16, #tpu.memory_space<vmem>>, %arg7: memref<2x512xf32, #tpu.memory_space<vmem>>) attributes {dimension_semantics = [#tpu.dimension_semantics<parallel>, #tpu.dimension_semantics<arbitrary>], iteration_bounds = array<i64: 2, 2>, scalar_prefetch = 0 : i64, scratch_operands = 1 : i64, tpu.core_type = #tpu.core_type<tc>, window_params = [{pipeline_mode = #tpu.pipeline_mode<synchronous>, transform_indices = @transform_0, window_bounds = array<i64: 2, 1024>}, {transform_indices = @transform_1, window_bounds = array<i64: 512, 512>}, {transform_indices = @transform_2, window_bounds = array<i64: 1, 512>}, {transform_indices = @transform_3, window_bounds = array<i64: 1, 512>}, {transform_indices = @transform_4, window_bounds = array<i64: 2, 512>}]} {
    %c0_i32 = arith.constant 0 : i32
    %0 = arith.cmpi eq, %arg1, %c0_i32 : i32
    %1 = arith.extui %0 : i1 to i32
    %c0_i32_0 = arith.constant 0 : i32
    %2 = arith.cmpi ne, %1, %c0_i32_0 : i32
    scf.if %2 {
      %cst_8 = arith.constant 0.000000e+00 : f32
      %16 = vector.broadcast %cst_8 : f32 to vector<2x512xf32>
      %c0_9 = arith.constant 0 : index
      %c0_10 = arith.constant 0 : index
      %17 = vector.load %arg7[%c0_9, %c0_10] : memref<2x512xf32, #tpu.memory_space<vmem>>, vector<2x512xf32>
      tpu.vector_store %arg7[%c0_9, %c0_10], %16 {strides = array<i32>} : memref<2x512xf32, #tpu.memory_space<vmem>>, vector<2x512xf32>,
    } else {
    }
    %c512_i32 = arith.constant 512 : i32
    %3 = arith.muli %arg1, %c512_i32 : i32
    %4 = tpu.assume_multiple %3, 128 : i32
    %c0 = arith.constant 0 : index
    %5 = arith.index_cast %4 : i32 to index
    %6 = vector.load %arg2[%c0, %5] : memref<2x1024xbf16, #tpu.memory_space<vmem>>, vector<2x512xbf16>
    %c0_1 = arith.constant 0 : index
    %c0_2 = arith.constant 0 : index
    %7 = vector.load %arg3[%c0_1, %c0_2] : memref<512x512xi8, #tpu.memory_space<vmem>>, vector<512x512xi8>
    %8 = arith.sitofp %7 : vector<512x512xi8> to vector<512x512xbf16>
    %c0_3 = arith.constant 0 : index
    %c0_4 = arith.constant 0 : index
    %9 = vector.load %arg7[%c0_3, %c0_4] : memref<2x512xf32, #tpu.memory_space<vmem>>, vector<2x512xf32>
    %cst = arith.constant dense<0.000000e+00> : vector<2x512xf32>
    %10 = tpu.matmul %6, %8, %cst {dimension_numbers = #tpu.dot_dimension_numbers<[1], [0], [0], [1], [0, 0, 1, 1], [], []>} : vector<2x512xbf16>, vector<512x512xbf16>, vector<2x512xf32> -> vector<2x512xf32>
    %11 = arith.addf %9, %10 : vector<2x512xf32>
    %c0_5 = arith.constant 0 : index
    %c0_6 = arith.constant 0 : index
    %12 = vector.load %arg7[%c0_5, %c0_6] : memref<2x512xf32, #tpu.memory_space<vmem>>, vector<2x512xf32>
    tpu.vector_store %arg7[%c0_5, %c0_6], %11 {strides = array<i32>} : memref<2x512xf32, #tpu.memory_space<vmem>>, vector<2x512xf32>,
    %c1_i32 = arith.constant 1 : i32
    %13 = arith.cmpi eq, %arg1, %c1_i32 : i32
    %14 = arith.extui %13 : i1 to i32
    %c0_i32_7 = arith.constant 0 : i32
    %15 = arith.cmpi ne, %14, %c0_i32_7 : i32
    scf.if %15 {
      %c0_8 = arith.constant 0 : index
      %c0_9 = arith.constant 0 : index
      %16 = vector.load %arg7[%c0_8, %c0_9] : memref<2x512xf32, #tpu.memory_space<vmem>>, vector<2x512xf32>
      %c0_10 = arith.constant 0 : index
      %c0_11 = arith.constant 0 : index
      %17 = vector.load %arg4[%c0_10, %c0_11] : memref<1x512xf32, #tpu.memory_space<vmem>>, vector<1x512xf32>
      %18 = vector.broadcast %17 : vector<1x512xf32> to vector<2x512xf32>
      %19 = arith.mulf %16, %18 : vector<2x512xf32>
      %c0_12 = arith.constant 0 : index
      %c0_13 = arith.constant 0 : index
      %20 = vector.load %arg5[%c0_12, %c0_13] : memref<1x512xf32, #tpu.memory_space<vmem>>, vector<1x512xf32>
      %21 = vector.broadcast %20 : vector<1x512xf32> to vector<2x512xf32>
      %22 = arith.addf %19, %21 : vector<2x512xf32>
      %cst_14 = arith.constant 0.000000e+00 : f32
      %23 = vector.broadcast %cst_14 : f32 to vector<2x512xf32>
      %24 = arith.maximumf %22, %23 : vector<2x512xf32>
      %25 = arith.truncf %24 : vector<2x512xf32> to vector<2x512xbf16>
      %c0_15 = arith.constant 0 : index
      %c0_16 = arith.constant 0 : index
      %26 = vector.load %arg6[%c0_15, %c0_16] : memref<2x512xbf16, #tpu.memory_space<vmem>>, vector<2x512xbf16>
      tpu.vector_store %arg6[%c0_15, %c0_16], %25 {strides = array<i32>} : memref<2x512xbf16, #tpu.memory_space<vmem>>, vector<2x512xbf16>,
    } else {
    }
    return
  }
  func.func @transform_0(%arg0: i32, %arg1: i32) -> (i32, i32) {
    %c0_i32 = arith.constant 0 : i32
    %c0_i32_0 = arith.constant 0 : i32
    %c0_i32_1 = arith.constant 0 : i32
    return %c0_i32, %c0_i32_0 : i32, i32
  }
  func.func @transform_1(%arg0: i32, %arg1: i32) -> (i32, i32) {
    %c0_i32 = arith.constant 0 : i32
    return %arg1, %arg0 : i32, i32
  }
  func.func @transform_2(%arg0: i32, %arg1: i32) -> (i32, i32) {
    %c0_i32 = arith.constant 0 : i32
    %c0_i32_0 = arith.constant 0 : i32
    return %c0_i32, %arg0 : i32, i32
  }
  func.func @transform_3(%arg0: i32, %arg1: i32) -> (i32, i32) {
    %c0_i32 = arith.constant 0 : i32
    %c0_i32_0 = arith.constant 0 : i32
    return %c0_i32, %arg0 : i32, i32
  }
  func.func @transform_4(%arg0: i32, %arg1: i32) -> (i32, i32) {
    %c0_i32 = arith.constant 0 : i32
    %c0_i32_0 = arith.constant 0 : i32
    return %c0_i32, %arg0 : i32, i32
  }
}

module attributes {stable_mosaic.version = 11 : i64} {
  func.func @_linear_q_kernel(%arg0: i32, %arg1: i32, %arg2: memref<2x1024xbf16, #tpu.memory_space<vmem>>, %arg3: memref<512x256xi8, #tpu.memory_space<vmem>>, %arg4: memref<1x256xf32, #tpu.memory_space<vmem>>, %arg5: memref<1x256xf32, #tpu.memory_space<vmem>>, %arg6: memref<2x256xbf16, #tpu.memory_space<vmem>>, %arg7: memref<2x256xf32, #tpu.memory_space<vmem>>) attributes {dimension_semantics = [#tpu.dimension_semantics<parallel>, #tpu.dimension_semantics<arbitrary>], iteration_bounds = array<i64: 1, 2>, scalar_prefetch = 0 : i64, scratch_operands = 1 : i64, tpu.core_type = #tpu.core_type<tc>, window_params = [{pipeline_mode = #tpu.pipeline_mode<synchronous>, transform_indices = @transform_0, window_bounds = array<i64: 2, 1024>}, {transform_indices = @transform_1, window_bounds = array<i64: 512, 256>}, {transform_indices = @transform_2, window_bounds = array<i64: 1, 256>}, {transform_indices = @transform_3, window_bounds = array<i64: 1, 256>}, {transform_indices = @transform_4, window_bounds = array<i64: 2, 256>}]} {
    %c0_i32 = arith.constant 0 : i32
    %0 = arith.cmpi eq, %arg1, %c0_i32 : i32
    %1 = arith.extui %0 : i1 to i32
    %c0_i32_0 = arith.constant 0 : i32
    %2 = arith.cmpi ne, %1, %c0_i32_0 : i32
    scf.if %2 {
      %cst_8 = arith.constant 0.000000e+00 : f32
      %16 = vector.broadcast %cst_8 : f32 to vector<2x256xf32>
      %c0_9 = arith.constant 0 : index
      %c0_10 = arith.constant 0 : index
      %17 = vector.load %arg7[%c0_9, %c0_10] : memref<2x256xf32, #tpu.memory_space<vmem>>, vector<2x256xf32>
      tpu.vector_store %arg7[%c0_9, %c0_10], %16 {strides = array<i32>} : memref<2x256xf32, #tpu.memory_space<vmem>>, vector<2x256xf32>,
    } else {
    }
    %c512_i32 = arith.constant 512 : i32
    %3 = arith.muli %arg1, %c512_i32 : i32
    %4 = tpu.assume_multiple %3, 128 : i32
    %c0 = arith.constant 0 : index
    %5 = arith.index_cast %4 : i32 to index
    %6 = vector.load %arg2[%c0, %5] : memref<2x1024xbf16, #tpu.memory_space<vmem>>, vector<2x512xbf16>
    %c0_1 = arith.constant 0 : index
    %c0_2 = arith.constant 0 : index
    %7 = vector.load %arg3[%c0_1, %c0_2] : memref<512x256xi8, #tpu.memory_space<vmem>>, vector<512x256xi8>
    %8 = arith.sitofp %7 : vector<512x256xi8> to vector<512x256xbf16>
    %c0_3 = arith.constant 0 : index
    %c0_4 = arith.constant 0 : index
    %9 = vector.load %arg7[%c0_3, %c0_4] : memref<2x256xf32, #tpu.memory_space<vmem>>, vector<2x256xf32>
    %cst = arith.constant dense<0.000000e+00> : vector<2x256xf32>
    %10 = tpu.matmul %6, %8, %cst {dimension_numbers = #tpu.dot_dimension_numbers<[1], [0], [0], [1], [0, 0, 1, 1], [], []>} : vector<2x512xbf16>, vector<512x256xbf16>, vector<2x256xf32> -> vector<2x256xf32>
    %11 = arith.addf %9, %10 : vector<2x256xf32>
    %c0_5 = arith.constant 0 : index
    %c0_6 = arith.constant 0 : index
    %12 = vector.load %arg7[%c0_5, %c0_6] : memref<2x256xf32, #tpu.memory_space<vmem>>, vector<2x256xf32>
    tpu.vector_store %arg7[%c0_5, %c0_6], %11 {strides = array<i32>} : memref<2x256xf32, #tpu.memory_space<vmem>>, vector<2x256xf32>,
    %c1_i32 = arith.constant 1 : i32
    %13 = arith.cmpi eq, %arg1, %c1_i32 : i32
    %14 = arith.extui %13 : i1 to i32
    %c0_i32_7 = arith.constant 0 : i32
    %15 = arith.cmpi ne, %14, %c0_i32_7 : i32
    scf.if %15 {
      %c0_8 = arith.constant 0 : index
      %c0_9 = arith.constant 0 : index
      %16 = vector.load %arg7[%c0_8, %c0_9] : memref<2x256xf32, #tpu.memory_space<vmem>>, vector<2x256xf32>
      %c0_10 = arith.constant 0 : index
      %c0_11 = arith.constant 0 : index
      %17 = vector.load %arg4[%c0_10, %c0_11] : memref<1x256xf32, #tpu.memory_space<vmem>>, vector<1x256xf32>
      %18 = vector.broadcast %17 : vector<1x256xf32> to vector<2x256xf32>
      %19 = arith.mulf %16, %18 : vector<2x256xf32>
      %c0_12 = arith.constant 0 : index
      %c0_13 = arith.constant 0 : index
      %20 = vector.load %arg5[%c0_12, %c0_13] : memref<1x256xf32, #tpu.memory_space<vmem>>, vector<1x256xf32>
      %21 = vector.broadcast %20 : vector<1x256xf32> to vector<2x256xf32>
      %22 = arith.addf %19, %21 : vector<2x256xf32>
      %cst_14 = arith.constant 0.000000e+00 : f32
      %23 = vector.broadcast %cst_14 : f32 to vector<2x256xf32>
      %24 = arith.maximumf %22, %23 : vector<2x256xf32>
      %25 = arith.truncf %24 : vector<2x256xf32> to vector<2x256xbf16>
      %c0_15 = arith.constant 0 : index
      %c0_16 = arith.constant 0 : index
      %26 = vector.load %arg6[%c0_15, %c0_16] : memref<2x256xbf16, #tpu.memory_space<vmem>>, vector<2x256xbf16>
      tpu.vector_store %arg6[%c0_15, %c0_16], %25 {strides = array<i32>} : memref<2x256xbf16, #tpu.memory_space<vmem>>, vector<2x256xbf16>,
    } else {
    }
    return
  }
  func.func @transform_0(%arg0: i32, %arg1: i32) -> (i32, i32) {
    %c0_i32 = arith.constant 0 : i32
    %c0_i32_0 = arith.constant 0 : i32
    %c0_i32_1 = arith.constant 0 : i32
    return %c0_i32, %c0_i32_0 : i32, i32
  }
  func.func @transform_1(%arg0: i32, %arg1: i32) -> (i32, i32) {
    %c0_i32 = arith.constant 0 : i32
    return %arg1, %arg0 : i32, i32
  }
  func.func @transform_2(%arg0: i32, %arg1: i32) -> (i32, i32) {
    %c0_i32 = arith.constant 0 : i32
    %c0_i32_0 = arith.constant 0 : i32
    return %c0_i32, %arg0 : i32, i32
  }
  func.func @transform_3(%arg0: i32, %arg1: i32) -> (i32, i32) {
    %c0_i32 = arith.constant 0 : i32
    %c0_i32_0 = arith.constant 0 : i32
    return %c0_i32, %arg0 : i32, i32
  }
  func.func @transform_4(%arg0: i32, %arg1: i32) -> (i32, i32) {
    %c0_i32 = arith.constant 0 : i32
    %c0_i32_0 = arith.constant 0 : i32
    return %c0_i32, %arg0 : i32, i32
  }
}

module attributes {stable_mosaic.version = 11 : i64} {
  func.func @_linear_q_kernel(%arg0: i32, %arg1: i32, %arg2: memref<2x256xbf16, #tpu.memory_space<vmem>>, %arg3: memref<256x512xi8, #tpu.memory_space<vmem>>, %arg4: memref<1x512xf32, #tpu.memory_space<vmem>>, %arg5: memref<1x512xf32, #tpu.memory_space<vmem>>, %arg6: memref<2x512xbf16, #tpu.memory_space<vmem>>, %arg7: memref<2x512xf32, #tpu.memory_space<vmem>>) attributes {dimension_semantics = [#tpu.dimension_semantics<parallel>, #tpu.dimension_semantics<arbitrary>], iteration_bounds = array<i64: 2, 1>, scalar_prefetch = 0 : i64, scratch_operands = 1 : i64, tpu.core_type = #tpu.core_type<tc>, window_params = [{pipeline_mode = #tpu.pipeline_mode<synchronous>, transform_indices = @transform_0, window_bounds = array<i64: 2, 256>}, {transform_indices = @transform_1, window_bounds = array<i64: 256, 512>}, {transform_indices = @transform_2, window_bounds = array<i64: 1, 512>}, {transform_indices = @transform_3, window_bounds = array<i64: 1, 512>}, {transform_indices = @transform_4, window_bounds = array<i64: 2, 512>}]} {
    %c0_i32 = arith.constant 0 : i32
    %0 = arith.cmpi eq, %arg1, %c0_i32 : i32
    %1 = arith.extui %0 : i1 to i32
    %c0_i32_0 = arith.constant 0 : i32
    %2 = arith.cmpi ne, %1, %c0_i32_0 : i32
    scf.if %2 {
      %cst_9 = arith.constant 0.000000e+00 : f32
      %16 = vector.broadcast %cst_9 : f32 to vector<2x512xf32>
      %c0_10 = arith.constant 0 : index
      %c0_11 = arith.constant 0 : index
      %17 = vector.load %arg7[%c0_10, %c0_11] : memref<2x512xf32, #tpu.memory_space<vmem>>, vector<2x512xf32>
      tpu.vector_store %arg7[%c0_10, %c0_11], %16 {strides = array<i32>} : memref<2x512xf32, #tpu.memory_space<vmem>>, vector<2x512xf32>,
    } else {
    }
    %c256_i32 = arith.constant 256 : i32
    %3 = arith.muli %arg1, %c256_i32 : i32
    %4 = tpu.assume_multiple %3, 128 : i32
    %c0 = arith.constant 0 : index
    %5 = arith.index_cast %4 : i32 to index
    %6 = vector.load %arg2[%c0, %5] : memref<2x256xbf16, #tpu.memory_space<vmem>>, vector<2x256xbf16>
    %c0_1 = arith.constant 0 : index
    %c0_2 = arith.constant 0 : index
    %7 = vector.load %arg3[%c0_1, %c0_2] : memref<256x512xi8, #tpu.memory_space<vmem>>, vector<256x512xi8>
    %8 = arith.sitofp %7 : vector<256x512xi8> to vector<256x512xbf16>
    %c0_3 = arith.constant 0 : index
    %c0_4 = arith.constant 0 : index
    %9 = vector.load %arg7[%c0_3, %c0_4] : memref<2x512xf32, #tpu.memory_space<vmem>>, vector<2x512xf32>
    %cst = arith.constant dense<0.000000e+00> : vector<2x512xf32>
    %10 = tpu.matmul %6, %8, %cst {dimension_numbers = #tpu.dot_dimension_numbers<[1], [0], [0], [1], [0, 0, 1, 1], [], []>} : vector<2x256xbf16>, vector<256x512xbf16>, vector<2x512xf32> -> vector<2x512xf32>
    %11 = arith.addf %9, %10 : vector<2x512xf32>
    %c0_5 = arith.constant 0 : index
    %c0_6 = arith.constant 0 : index
    %12 = vector.load %arg7[%c0_5, %c0_6] : memref<2x512xf32, #tpu.memory_space<vmem>>, vector<2x512xf32>
    tpu.vector_store %arg7[%c0_5, %c0_6], %11 {strides = array<i32>} : memref<2x512xf32, #tpu.memory_space<vmem>>, vector<2x512xf32>,
    %c0_i32_7 = arith.constant 0 : i32
    %13 = arith.cmpi eq, %arg1, %c0_i32_7 : i32
    %14 = arith.extui %13 : i1 to i32
    %c0_i32_8 = arith.constant 0 : i32
    %15 = arith.cmpi ne, %14, %c0_i32_8 : i32
    scf.if %15 {
      %c0_9 = arith.constant 0 : index
      %c0_10 = arith.constant 0 : index
      %16 = vector.load %arg7[%c0_9, %c0_10] : memref<2x512xf32, #tpu.memory_space<vmem>>, vector<2x512xf32>
      %c0_11 = arith.constant 0 : index
      %c0_12 = arith.constant 0 : index
      %17 = vector.load %arg4[%c0_11, %c0_12] : memref<1x512xf32, #tpu.memory_space<vmem>>, vector<1x512xf32>
      %18 = vector.broadcast %17 : vector<1x512xf32> to vector<2x512xf32>
      %19 = arith.mulf %16, %18 : vector<2x512xf32>
      %c0_13 = arith.constant 0 : index
      %c0_14 = arith.constant 0 : index
      %20 = vector.load %arg5[%c0_13, %c0_14] : memref<1x512xf32, #tpu.memory_space<vmem>>, vector<1x512xf32>
      %21 = vector.broadcast %20 : vector<1x512xf32> to vector<2x512xf32>
      %22 = arith.addf %19, %21 : vector<2x512xf32>
      %cst_15 = arith.constant 0.000000e+00 : f32
      %23 = vector.broadcast %cst_15 : f32 to vector<2x512xf32>
      %24 = arith.maximumf %22, %23 : vector<2x512xf32>
      %25 = arith.truncf %24 : vector<2x512xf32> to vector<2x512xbf16>
      %c0_16 = arith.constant 0 : index
      %c0_17 = arith.constant 0 : index
      %26 = vector.load %arg6[%c0_16, %c0_17] : memref<2x512xbf16, #tpu.memory_space<vmem>>, vector<2x512xbf16>
      tpu.vector_store %arg6[%c0_16, %c0_17], %25 {strides = array<i32>} : memref<2x512xbf16, #tpu.memory_space<vmem>>, vector<2x512xbf16>,
    } else {
    }
    return
  }
  func.func @transform_0(%arg0: i32, %arg1: i32) -> (i32, i32) {
    %c0_i32 = arith.constant 0 : i32
    %c0_i32_0 = arith.constant 0 : i32
    %c0_i32_1 = arith.constant 0 : i32
    return %c0_i32, %c0_i32_0 : i32, i32
  }
  func.func @transform_1(%arg0: i32, %arg1: i32) -> (i32, i32) {
    %c0_i32 = arith.constant 0 : i32
    return %arg1, %arg0 : i32, i32
  }
  func.func @transform_2(%arg0: i32, %arg1: i32) -> (i32, i32) {
    %c0_i32 = arith.constant 0 : i32
    %c0_i32_0 = arith.constant 0 : i32
    return %c0_i32, %arg0 : i32, i32
  }
  func.func @transform_3(%arg0: i32, %arg1: i32) -> (i32, i32) {
    %c0_i32 = arith.constant 0 : i32
    %c0_i32_0 = arith.constant 0 : i32
    return %c0_i32, %arg0 : i32, i32
  }
  func.func @transform_4(%arg0: i32, %arg1: i32) -> (i32, i32) {
    %c0_i32 = arith.constant 0 : i32
    %c0_i32_0 = arith.constant 0 : i32
    return %c0_i32, %arg0 : i32, i32
  }
}

</mosaic_0001>

<bundles_post_ra>
// kernel: advnn_forward.5
= control target key start
LH: loop header
LB: loop body
LE: loop exit
PB: predicated region body
PF: predicated region fallthrough
CT: control target
= control target key end

     0   :  { %9 = vsyncpa [#allocation4], 0  ;;  %s1235_s0 = inlined_call_operand.vmem [shape: bf16[2,1024], index: 0, kind: input, shape index: {}]   ;;  %s1236_s1 = inlined_call_operand.hbm [shape: s8[1024,256], index: 1, kind: input, shape index: {}]   ;;  %s1237_s2 = inlined_call_operand.vmem [shape: f32[1,256], index: 2, kind: input, shape index: {}]   ;;  %s1238_s3 = inlined_call_operand.vmem [shape: f32[1,256], index: 3, kind: input, shape index: {}]   ;;  %s1239_s4 = inlined_call_operand.vmem [shape: bf16[2,256], index: 4, kind: output, shape index: {}]  }
   0x1   :  { %11 = vsyncpa [#allocation4 + $0x1], 0  ;;  %s1081_s15 = smov 0   ;;  %s1083_s16 = smov 0  }
   0x2   :  { %s1085_s17 = smov 0   ;;  %s1087_s18 = smov 0  }
   0x3   :  { %s1089_s19 = smov 0   ;;  %s1091_s20 = smov 0  }
   0x4 LB: > { %s893_s21 = sadd.s32 4294967295, %s1051_s20   ;;  %s26_s22 = sadd.s32 1, %s1047_s19  ;;  %s1051_s20 = sphi %s1091_s20, %s17_s20   ;;  %s1047_s19 = sphi %s1089_s19, %s1246_s19   ;;  %s1043_s18 = sphi %s1087_s18, %s1245_s18   ;;  %s1039_s17 = sphi %s1085_s17, %s1244_s17   ;;  %s1035_s16 = sphi %s1083_s16, %s1243_s16   ;;  %s1031_s15 = sphi %s1081_s15, %s1242_s15  }
   0x5   : > { %p27_p0 = scmp.ge.s32.totalorder %s26_s22, 2  ;;  %s59_s23 = sadd.s32 1, %s1039_s17 }
   0x6   : > { %p66_p1 = scmp.ne.s32.totalorder %s1039_s17, %s1035_s16  ;;  %p67_p2 = scmp.eq.s32.totalorder %s1051_s20, 0 }
   0x7   : > { %s1248_s22 = smov (%p27_p0, %s26_s22), 0  ;;  %p72_p4 = scmp.ne.s32.totalorder %s1035_s16, %s1031_s15 }
   0x8   : > { %p1117_p3 = por %p67_p2, %p66_p1  ;;  %s54_s25 = ssub.s32 %s1047_s19, %s1248_s22 }
   0x9   : > { %p73_p5 = scmp.eq.s32.totalorder %s893_s21, 0  ;;  %p57_p6 = scmp.eq.s32.totalorder %s54_s25, 0 }
   0xa   : > { %p919_p8 = scmp.lt.s32.totalorder %s1051_s20, 2  ;;  %s193_s28 = sand.u32 1, %s1039_s17  }
   0xb   : > { %p1124_p7 = por %p73_p5, %p72_p4  ;;  %s912_s29 = sshll.u32 %s1047_s19, 8 }
   0xc   : > { %s1130_s27 = scalar_select %p57_p6, %s1039_s17, %s59_s23  }
   0xd   : > { %s898_s30 = sshll.u32 %s193_s28, 8  ;;  %s205_s7 = scalar_lea.hbm %s1236_s1, %s912_s29 }
   0xe   : > { %s206_s8 = sshll.u32 %s205_s7, 4  ;;  %s197_s9 = scalar_lea.vmem [#allocation3], %s898_s30  ;;  %s207_s8 = int_to_ptr.hbm [resolvable:$true] %s206_s8 }
   0xf   : > { %s208_s10 = sshll.u32 %s197_s9, 4  ;;  %p916_p9 = pnand %p919_p8, %p1117_p3  ;;  %s209_s10 = int_to_ptr.vmem [resolvable:$true] %s208_s10 }
  0x10   : > { %p902_p10 = scmp.ge.s32.totalorder %s1051_s20, 1  ;;  %p216_p11 = scmp.lt.s32.totalorder %s1051_s20, 3 }
  0x11   : > { %s194_s11 = scalar_lea.sflag [#allocation4], %s193_s28  ;;  %s1053_s12 = smov 256  }
  0x12   : > { %s1054_s13 = smov 16   ;;  %p217_p12 = pnand %p902_p10, %p216_p11 }
  0x13   : > { %918 = dma.hbm_to_vmem [thread:$0]  (!%p916_p9), %s207_s8, 4096, %s209_s10, %s194_s11, %s1053_s12, %s1053_s12, %s1054_s13  }
  0x14   : > { %220 = sbr.rel (%p217_p12) target bundleno = 290 (0x122), region = 36  ;;  %s222_s14 = sand.u32 (!%p217_p12), 1, %s1035_s16  }
  0x15   : > { %s903_s15 = sshll.u32 (!%p217_p12), %s222_s14, 8  ;;  %s223_s21 = scalar_lea.sflag (!%p217_p12), [#allocation4], %s222_s14 }
  0x16   : > { %s1142_s23 = scalar_lea.vmem (!%p217_p12), [#allocation3], %s903_s15 }
  0x19   : > { %1026 = dma.done.wait (%p1124_p7), %s223_s21, 4096  }
  0x1a   : > { %1028 = vsyncadd (%p1124_p7), %s223_s21, 4294963200  ;;  %p904_p13 = scmp.ne.s32.totalorder %s1043_s18, 0 }
  0x1c   : > { %279 = sbr.rel (%p904_p13) target bundleno = 35 (0x23), region = 44 }
  0x21   : > { %v1055_v0 = vmov 0.0  }
  0x22   : > { %280 = vst [vmem:[#allocation2] sm:$0xf] %v1055_v0 }
  0x23 PF: > { %v292_v1 = vld [vmem:[%s1142_s23 + $0x30] sm:$0xff]  ;;  %v290_v29 = vld [vmem:[%s1142_s23 + $0x20] sm:$0xff]  ;;  %s905_s24 = sshll.u32 %s1043_s18, 9  ;;  %vm756_vm0 = vcmask 1041408   ;;  %p906_p0 = scmp.ne.s32.totalorder %s1043_s18, 1 }
  0x24   : > { %v300_v2 = vld [vmem:[%s1142_s23 + $0x70] sm:$0xff]  ;;  %v346_v4 = vunpack.c.2.s8 %v292_v1  ;;  %v348_v5 = vunpack.c.3.s8 %v292_v1  ;;  %v342_v23 = vunpack.c.0.s8 %v292_v1  ;;  %v344_v24 = vunpack.c.1.s8 %v292_v1  ;;  %v298_v38 = vld [vmem:[%s1142_s23 + $0x60] sm:$0xff]  ;;  %s1158_s25 = sshra.s32 %s905_s24, 7 }
  0x25   : > { %v308_v3 = vld [vmem:[%s1142_s23 + $0xb0] sm:$0xff]  ;;  %v378_v6 = vunpack.c.2.s8 %v300_v2  ;;  %v380_v7 = vunpack.c.3.s8 %v300_v2  ;;  %v374_v27 = vunpack.c.0.s8 %v300_v2  ;;  %v376_v28 = vunpack.c.1.s8 %v300_v2  ;;  %v306_v43 = vld [vmem:[%s1142_s23 + $0xa0] sm:$0xff]  ;;  %s284_s29 = scalar_lea.vmem %s1235_s0, %s1158_s25 }
  0x26   : > { %v316_v8 = vld [vmem:[%s1142_s23 + $0xf0] sm:$0xff]  ;;  %v410_v9 = vunpack.c.2.s8 %v308_v3  ;;  %v412_v10 = vunpack.c.3.s8 %v308_v3  ;;  %v474_v13 = vcvt.s32.f32 %v346_v4  ;;  %v476_v14 = vcvt.s32.f32 %v348_v5  ;;  %v314_v48 = vld [vmem:[%s1142_s23 + $0xe0] sm:$0xff] }
  0x27   : > { %v442_v11 = vunpack.c.2.s8 %v316_v8  ;;  %v444_v12 = vunpack.c.3.s8 %v316_v8  ;;  %v506_v15 = vcvt.s32.f32 %v378_v6  ;;  %v508_v16 = vcvt.s32.f32 %v380_v7 }
  0x28   : > { %v538_v17 = vcvt.s32.f32 %v410_v9  ;;  %v540_v18 = vcvt.s32.f32 %v412_v10  ;;  %v588_v21 = vpack.c.bf16 %v476_v14, %v474_v13  ;;  %v470_v30 = vcvt.s32.f32 %v342_v23  ;;  %v288_v9 = vld [vmem:[%s1142_s23 + $0x10] sm:$0xff] }
  0x29   : > { %v570_v19 = vcvt.s32.f32 %v442_v11  ;;  %v572_v20 = vcvt.s32.f32 %v444_v12  ;;  %v604_v22 = vpack.c.bf16 %v508_v16, %v506_v15  ;;  %v472_v31 = vcvt.s32.f32 %v344_v24  ;;  %v285_v10 = vld [vmem:[%s284_s29] sm:$0xf] }
  0x2a   : > { %v620_v25 = vpack.c.bf16 %v540_v18, %v538_v17  ;;  %649 = vmatpush.bf16.msra.mxu0 %v588_v21  ;;  %v406_v32 = vunpack.c.0.s8 %v308_v3  ;;  %v408_v33 = vunpack.c.1.s8 %v308_v3  ;;  %v502_v34 = vcvt.s32.f32 %v374_v27  ;;  %640 = vst [vmem:[#allocation1] ss:$9 sm:$0xff] %v285_v10  ;;  %v304_v24 = vld [vmem:[%s1142_s23 + $0x90] sm:$0xff] }
  0x2b   : > { %v636_v26 = vpack.c.bf16 %v572_v20, %v570_v19  ;;  %662 = vmatpush.bf16.msra.mxu1 %v604_v22  ;;  %v504_v35 = vcvt.s32.f32 %v376_v28  ;;  %v438_v36 = vunpack.c.0.s8 %v316_v8  ;;  %v440_v37 = vunpack.c.1.s8 %v316_v8  ;;  %v296_v19 = vld [vmem:[%s1142_s23 + $0x50] sm:$0xff] }
  0x2c   : > { %675 = vmatpush.bf16.msra.mxu2 %v620_v25  ;;  %v586_v39 = vpack.c.bf16 %v472_v31, %v470_v30  ;;  %v534_v40 = vcvt.s32.f32 %v406_v32  ;;  %v536_v41 = vcvt.s32.f32 %v408_v33  ;;  %v338_v42 = vunpack.c.2.s8 %v290_v29 }
  0x2d   : > { %688 = vmatpush.bf16.msra.mxu3 %v636_v26  ;;  %v602_v44 = vpack.c.bf16 %v504_v35, %v502_v34  ;;  %v566_v45 = vcvt.s32.f32 %v438_v36  ;;  %v568_v46 = vcvt.s32.f32 %v440_v37  ;;  %v340_v47 = vunpack.c.3.s8 %v290_v29 }
  0x2e   : > { %650 = vmatpush.bf16.msra.mxu0 %v586_v39  ;;  %v618_v49 = vpack.c.bf16 %v536_v41, %v534_v40  ;;  %v466_v50 = vcvt.s32.f32 %v338_v42  ;;  %v370_v51 = vunpack.c.2.s8 %v298_v38  ;;  %v372_v52 = vunpack.c.3.s8 %v298_v38 }
  0x2f   : > { %663 = vmatpush.bf16.msra.mxu1 %v602_v44  ;;  %v634_v53 = vpack.c.bf16 %v568_v46, %v566_v45  ;;  %v468_v54 = vcvt.s32.f32 %v340_v47  ;;  %v402_v55 = vunpack.c.2.s8 %v306_v43  ;;  %v404_v56 = vunpack.c.3.s8 %v306_v43 }
  0x30   : > { %676 = vmatpush.bf16.msra.mxu2 %v618_v49  ;;  %v498_v57 = vcvt.s32.f32 %v370_v51  ;;  %v500_v58 = vcvt.s32.f32 %v372_v52  ;;  %v434_v59 = vunpack.c.2.s8 %v314_v48  ;;  %v436_v60 = vunpack.c.3.s8 %v314_v48 }
  0x31   : > { %689 = vmatpush.bf16.msra.mxu3 %v634_v53  ;;  %v584_v61 = vpack.c.bf16 %v468_v54, %v466_v50  ;;  %v530_v62 = vcvt.s32.f32 %v402_v55  ;;  %v532_v63 = vcvt.s32.f32 %v404_v56  ;;  %v334_v0 = vunpack.c.0.s8 %v290_v29  ;;  %v286_v54 = vld [vmem:[%s1142_s23] sm:$0xff] }
  0x32   : > { %v600_v1 = vpack.c.bf16 %v500_v58, %v498_v57  ;;  %v562_v2 = vcvt.s32.f32 %v434_v59  ;;  %v564_v3 = vcvt.s32.f32 %v436_v60  ;;  %v336_v4 = vunpack.c.1.s8 %v290_v29  ;;  %v312_v29 = vld [vmem:[%s1142_s23 + $0xd0] sm:$0xff] }
  0x33   : > { %651 = vmatpush.bf16.msra.mxu0 %v584_v61  ;;  %v616_v5 = vpack.c.bf16 %v532_v63, %v530_v62  ;;  %v462_v6 = vcvt.s32.f32 %v334_v0  ;;  %v366_v7 = vunpack.c.0.s8 %v298_v38  ;;  %v368_v8 = vunpack.c.1.s8 %v298_v38  ;;  %v294_v63 = vld [vmem:[%s1142_s23 + $0x40] sm:$0xff] }
  0x34   : > { %664 = vmatpush.bf16.msra.mxu1 %v600_v1  ;;  %v632_v11 = vpack.c.bf16 %v564_v3, %v562_v2  ;;  %v464_v12 = vcvt.s32.f32 %v336_v4  ;;  %v398_v13 = vunpack.c.0.s8 %v306_v43  ;;  %v400_v14 = vunpack.c.1.s8 %v306_v43  ;;  %v302_v4 = vld [vmem:[%s1142_s23 + $0x80] sm:$0xff] }
  0x35   : > { %677 = vmatpush.bf16.msra.mxu2 %v616_v5  ;;  %v494_v15 = vcvt.s32.f32 %v366_v7  ;;  %v496_v16 = vcvt.s32.f32 %v368_v8  ;;  %v430_v17 = vunpack.c.0.s8 %v314_v48  ;;  %v432_v18 = vunpack.c.1.s8 %v314_v48 }
  0x36   : > { %690 = vmatpush.bf16.msra.mxu3 %v632_v11  ;;  %v582_v20 = vpack.c.bf16 %v464_v12, %v462_v6  ;;  %v526_v21 = vcvt.s32.f32 %v398_v13  ;;  %v528_v22 = vcvt.s32.f32 %v400_v14  ;;  %v330_v23 = vunpack.c.2.s8 %v288_v9 }
  0x37   : > { %v598_v25 = vpack.c.bf16 %v496_v16, %v494_v15  ;;  %v558_v26 = vcvt.s32.f32 %v430_v17  ;;  %v560_v27 = vcvt.s32.f32 %v432_v18  ;;  %v332_v28 = vunpack.c.3.s8 %v288_v9 }
  0x38   : > { %652 = vmatpush.bf16.msra.mxu0 %v582_v20  ;;  %v614_v30 = vpack.c.bf16 %v528_v22, %v526_v21  ;;  %v458_v31 = vcvt.s32.f32 %v330_v23  ;;  %v362_v32 = vunpack.c.2.s8 %v296_v19  ;;  %v364_v33 = vunpack.c.3.s8 %v296_v19 }
  0x39   : > { %665 = vmatpush.bf16.msra.mxu1 %v598_v25  ;;  %v630_v34 = vpack.c.bf16 %v560_v27, %v558_v26  ;;  %v460_v35 = vcvt.s32.f32 %v332_v28  ;;  %v394_v36 = vunpack.c.2.s8 %v304_v24  ;;  %v396_v37 = vunpack.c.3.s8 %v304_v24 }
  0x3a   : > { %678 = vmatpush.bf16.msra.mxu2 %v614_v30  ;;  %v490_v38 = vcvt.s32.f32 %v362_v32  ;;  %v492_v39 = vcvt.s32.f32 %v364_v33  ;;  %v426_v40 = vunpack.c.2.s8 %v312_v29  ;;  %v428_v41 = vunpack.c.3.s8 %v312_v29 }
  0x3b   : > { %691 = vmatpush.bf16.msra.mxu3 %v630_v34  ;;  %v580_v42 = vpack.c.bf16 %v460_v35, %v458_v31  ;;  %v522_v43 = vcvt.s32.f32 %v394_v36  ;;  %v524_v44 = vcvt.s32.f32 %v396_v37  ;;  %v326_v45 = vunpack.c.0.s8 %v288_v9  ;;  %v293_v34 = vld [vmem:[%s1142_s23 + $0x38] sm:$0xff] }
  0x3c   : > { %v596_v46 = vpack.c.bf16 %v492_v39, %v490_v38  ;;  %v554_v47 = vcvt.s32.f32 %v426_v40  ;;  %v556_v48 = vcvt.s32.f32 %v428_v41  ;;  %v328_v49 = vunpack.c.1.s8 %v288_v9  ;;  %v310_v9 = vld [vmem:[%s1142_s23 + $0xc0] sm:$0xff] }
  0x3d   : > { %653 = vmatpush.bf16.msra.mxu0 %v580_v42  ;;  %v612_v50 = vpack.c.bf16 %v524_v44, %v522_v43  ;;  %v454_v51 = vcvt.s32.f32 %v326_v45  ;;  %v358_v52 = vunpack.c.0.s8 %v296_v19  ;;  %v360_v53 = vunpack.c.1.s8 %v296_v19  ;;  %v301_v43 = vld [vmem:[%s1142_s23 + $0x78] sm:$0xff] }
  0x3e   : > { %666 = vmatpush.bf16.msra.mxu1 %v596_v46  ;;  %v628_v55 = vpack.c.bf16 %v556_v48, %v554_v47  ;;  %v456_v56 = vcvt.s32.f32 %v328_v49  ;;  %v390_v57 = vunpack.c.0.s8 %v304_v24  ;;  %v392_v58 = vunpack.c.1.s8 %v304_v24  ;;  %v309_v48 = vld [vmem:[%s1142_s23 + $0xb8] sm:$0xff] }
  0x3f   : > { %679 = vmatpush.bf16.msra.mxu2 %v612_v50  ;;  %v486_v59 = vcvt.s32.f32 %v358_v52  ;;  %v488_v60 = vcvt.s32.f32 %v360_v53  ;;  %v422_v61 = vunpack.c.0.s8 %v312_v29  ;;  %v424_v62 = vunpack.c.1.s8 %v312_v29  ;;  %v317_v53 = vld [vmem:[%s1142_s23 + $0xf8] sm:$0xff] }
  0x40   : > { %692 = vmatpush.bf16.msra.mxu3 %v628_v55  ;;  %v578_v0 = vpack.c.bf16 %v456_v56, %v454_v51  ;;  %v518_v1 = vcvt.s32.f32 %v390_v57  ;;  %v520_v2 = vcvt.s32.f32 %v392_v58  ;;  %v322_v3 = vunpack.c.2.s8 %v286_v54  ;;  %v1176_v58 = vld [vmem:[#allocation1] sm:$0xff] }
  0x41   : > { %v594_v5 = vpack.c.bf16 %v488_v60, %v486_v59  ;;  %v550_v6 = vcvt.s32.f32 %v422_v61  ;;  %v552_v7 = vcvt.s32.f32 %v424_v62  ;;  %v324_v8 = vunpack.c.3.s8 %v286_v54 }
  0x42   : > { %654 = vmatpush.bf16.msra.mxu0 %v578_v0  ;;  %v610_v10 = vpack.c.bf16 %v520_v2, %v518_v1  ;;  %v450_v11 = vcvt.s32.f32 %v322_v3  ;;  %v354_v12 = vunpack.c.2.s8 %v294_v63  ;;  %v356_v13 = vunpack.c.3.s8 %v294_v63 }
  0x43   : > { %667 = vmatpush.bf16.msra.mxu1 %v594_v5  ;;  %v626_v14 = vpack.c.bf16 %v552_v7, %v550_v6  ;;  %v452_v15 = vcvt.s32.f32 %v324_v8  ;;  %v386_v16 = vunpack.c.2.s8 %v302_v4  ;;  %v388_v17 = vunpack.c.3.s8 %v302_v4 }
  0x44   : > { %680 = vmatpush.bf16.msra.mxu2 %v610_v10  ;;  %v482_v18 = vcvt.s32.f32 %v354_v12  ;;  %v484_v19 = vcvt.s32.f32 %v356_v13  ;;  %v418_v20 = vunpack.c.2.s8 %v310_v9  ;;  %v420_v21 = vunpack.c.3.s8 %v310_v9 }
  0x45   : > { %693 = vmatpush.bf16.msra.mxu3 %v626_v14  ;;  %v576_v22 = vpack.c.bf16 %v452_v15, %v450_v11  ;;  %v514_v23 = vcvt.s32.f32 %v386_v16  ;;  %v516_v24 = vcvt.s32.f32 %v388_v17  ;;  %v318_v25 = vunpack.c.0.s8 %v286_v54 }
  0x46   : > { %v592_v26 = vpack.c.bf16 %v484_v19, %v482_v18  ;;  %v546_v27 = vcvt.s32.f32 %v418_v20  ;;  %v548_v28 = vcvt.s32.f32 %v420_v21  ;;  %v320_v29 = vunpack.c.1.s8 %v286_v54  ;;  %v291_v18 = vld [vmem:[%s1142_s23 + $0x28] sm:$0xff] }
  0x47   : > { %655 = vmatpush.bf16.msra.mxu0 %v576_v22  ;;  %v608_v30 = vpack.c.bf16 %v516_v24, %v514_v23  ;;  %v446_v31 = vcvt.s32.f32 %v318_v25  ;;  %v350_v32 = vunpack.c.0.s8 %v294_v63  ;;  %v352_v33 = vunpack.c.1.s8 %v294_v63  ;;  %v1178_v63 = vld [vmem:[#allocation1 + $0x9] sm:$0xff] }
  0x48   : > { %668 = vmatpush.bf16.msra.mxu1 %v592_v26  ;;  %v624_v35 = vpack.c.bf16 %v548_v28, %v546_v27  ;;  %v448_v36 = vcvt.s32.f32 %v320_v29  ;;  %v382_v37 = vunpack.c.0.s8 %v302_v4  ;;  %v384_v38 = vunpack.c.1.s8 %v302_v4  ;;  %v1180_v4 = vld [vmem:[#allocation1 + $0x12] sm:$0xff] }
  0x49   : > { %681 = vmatpush.bf16.msra.mxu2 %v608_v30  ;;  %v478_v39 = vcvt.s32.f32 %v350_v32  ;;  %v480_v40 = vcvt.s32.f32 %v352_v33  ;;  %v414_v41 = vunpack.c.0.s8 %v310_v9  ;;  %v416_v42 = vunpack.c.1.s8 %v310_v9  ;;  %v1182_v9 = vld [vmem:[#allocation1 + $0x1b] sm:$0xff] }
  0x4a   : > { %694 = vmatpush.bf16.msra.mxu3 %v624_v35  ;;  %v574_v44 = vpack.c.bf16 %v448_v36, %v446_v31  ;;  %v510_v45 = vcvt.s32.f32 %v382_v37  ;;  %v512_v46 = vcvt.s32.f32 %v384_v38  ;;  %v347_v47 = vunpack.c.2.s8 %v293_v34  ;;  %v299_v27 = vld [vmem:[%s1142_s23 + $0x68] sm:$0xff] }
  0x4b   : > { %v590_v49 = vpack.c.bf16 %v480_v40, %v478_v39  ;;  %v542_v50 = vcvt.s32.f32 %v414_v41  ;;  %v544_v51 = vcvt.s32.f32 %v416_v42  ;;  %v349_v52 = vunpack.c.3.s8 %v293_v34  ;;  %v307_v32 = vld [vmem:[%s1142_s23 + $0xa8] sm:$0xff] }
  0x4c   : > { %656 = vmatpush.bf16.msra.mxu0 %v574_v44  ;;  %v606_v54 = vpack.c.bf16 %v512_v46, %v510_v45  ;;  %v475_v55 = vcvt.s32.f32 %v347_v47  ;;  %v379_v56 = vunpack.c.2.s8 %v301_v43  ;;  %v381_v57 = vunpack.c.3.s8 %v301_v43  ;;  %v315_v37 = vld [vmem:[%s1142_s23 + $0xe8] sm:$0xff] }
  0x4d   : > { %669 = vmatpush.bf16.msra.mxu1 %v590_v49  ;;  %v622_v59 = vpack.c.bf16 %v544_v51, %v542_v50  ;;  %v477_v60 = vcvt.s32.f32 %v349_v52  ;;  %v411_v61 = vunpack.c.2.s8 %v309_v48  ;;  %v413_v62 = vunpack.c.3.s8 %v309_v48 }
  0x4e   : > { %682 = vmatpush.bf16.msra.mxu2 %v606_v54  ;;  %v507_v0 = vcvt.s32.f32 %v379_v56  ;;  %v509_v1 = vcvt.s32.f32 %v381_v57  ;;  %v443_v2 = vunpack.c.2.s8 %v317_v53  ;;  %v445_v3 = vunpack.c.3.s8 %v317_v53 }
  0x4f   : > { %695 = vmatpush.bf16.msra.mxu3 %v622_v59  ;;  %v589_v5 = vpack.c.bf16 %v477_v60, %v475_v55  ;;  %v539_v6 = vcvt.s32.f32 %v411_v61  ;;  %v541_v7 = vcvt.s32.f32 %v413_v62  ;;  %v343_v8 = vunpack.c.0.s8 %v293_v34  ;;  %657 = vmatmul.bf16.vlgmr.msra.gmra.mxu0 %v1176_v58 }
  0x50   : > { %v605_v10 = vpack.c.bf16 %v509_v1, %v507_v0  ;;  %v571_v11 = vcvt.s32.f32 %v443_v2  ;;  %v573_v12 = vcvt.s32.f32 %v445_v3  ;;  %v345_v13 = vunpack.c.1.s8 %v293_v34  ;;  %670 = vmatmul.bf16.vlgmr.msra.gmra.mxu1 %v1178_v63  ;;  %v289_v0 = vld [vmem:[%s1142_s23 + $0x18] sm:$0xff] }
  0x51   : > { %701 = vmatpush.bf16.msrb.mxu0 %v589_v5  ;;  %v621_v14 = vpack.c.bf16 %v541_v7, %v539_v6  ;;  %v471_v15 = vcvt.s32.f32 %v343_v8  ;;  %v375_v16 = vunpack.c.0.s8 %v301_v43  ;;  %v377_v17 = vunpack.c.1.s8 %v301_v43  ;;  %683 = vmatmul.bf16.vlgmr.msra.gmra.mxu2 %v1180_v4 }
  0x52   : > { %714 = vmatpush.bf16.msrb.mxu1 %v605_v10  ;;  %v637_v19 = vpack.c.bf16 %v573_v12, %v571_v11  ;;  %v473_v20 = vcvt.s32.f32 %v345_v13  ;;  %v407_v21 = vunpack.c.0.s8 %v309_v48  ;;  %v409_v22 = vunpack.c.1.s8 %v309_v48  ;;  %696 = vmatmul.bf16.vlgmr.msra.gmra.mxu3 %v1182_v9  ;;  %v297_v11 = vld [vmem:[%s1142_s23 + $0x58] sm:$0xff] }
  0x53   : > { %727 = vmatpush.bf16.msrb.mxu2 %v621_v14  ;;  %v503_v23 = vcvt.s32.f32 %v375_v16  ;;  %v505_v24 = vcvt.s32.f32 %v377_v17  ;;  %v439_v25 = vunpack.c.0.s8 %v317_v53  ;;  %v441_v26 = vunpack.c.1.s8 %v317_v53  ;;  %v305_v16 = vld [vmem:[%s1142_s23 + $0x98] sm:$0xff] }
  0x54   : > { %740 = vmatpush.bf16.msrb.mxu3 %v637_v19  ;;  %v587_v28 = vpack.c.bf16 %v473_v20, %v471_v15  ;;  %v535_v29 = vcvt.s32.f32 %v407_v21  ;;  %v537_v30 = vcvt.s32.f32 %v409_v22  ;;  %v339_v31 = vunpack.c.2.s8 %v291_v18  ;;  %v313_v21 = vld [vmem:[%s1142_s23 + $0xd8] sm:$0xff] }
  0x55   : > { %v603_v33 = vpack.c.bf16 %v505_v24, %v503_v23  ;;  %v567_v34 = vcvt.s32.f32 %v439_v25  ;;  %v569_v35 = vcvt.s32.f32 %v441_v26  ;;  %v341_v36 = vunpack.c.3.s8 %v291_v18 }
  0x56   : > { %702 = vmatpush.bf16.msrb.mxu0 %v587_v28  ;;  %v619_v38 = vpack.c.bf16 %v537_v30, %v535_v29  ;;  %v467_v39 = vcvt.s32.f32 %v339_v31  ;;  %v371_v40 = vunpack.c.2.s8 %v299_v27  ;;  %v373_v41 = vunpack.c.3.s8 %v299_v27 }
  0x57   : > { %715 = vmatpush.bf16.msrb.mxu1 %v603_v33  ;;  %v635_v42 = vpack.c.bf16 %v569_v35, %v567_v34  ;;  %v469_v43 = vcvt.s32.f32 %v341_v36  ;;  %v403_v44 = vunpack.c.2.s8 %v307_v32  ;;  %v405_v45 = vunpack.c.3.s8 %v307_v32 }
  0x58   : > { %728 = vmatpush.bf16.msrb.mxu2 %v619_v38  ;;  %v499_v46 = vcvt.s32.f32 %v371_v40  ;;  %v501_v47 = vcvt.s32.f32 %v373_v41  ;;  %v435_v48 = vunpack.c.2.s8 %v315_v37  ;;  %v437_v49 = vunpack.c.3.s8 %v315_v37 }
  0x59   : > { %741 = vmatpush.bf16.msrb.mxu3 %v635_v42  ;;  %v585_v50 = vpack.c.bf16 %v469_v43, %v467_v39  ;;  %v531_v51 = vcvt.s32.f32 %v403_v44  ;;  %v533_v52 = vcvt.s32.f32 %v405_v45  ;;  %v335_v53 = vunpack.c.0.s8 %v291_v18 }
  0x5a   : > { %v601_v54 = vpack.c.bf16 %v501_v47, %v499_v46  ;;  %v563_v55 = vcvt.s32.f32 %v435_v48  ;;  %v565_v56 = vcvt.s32.f32 %v437_v49  ;;  %v337_v57 = vunpack.c.1.s8 %v291_v18  ;;  %v287_v46 = vld [vmem:[%s1142_s23 + $0x8] sm:$0xff] }
  0x5b   : > { %703 = vmatpush.bf16.msrb.mxu0 %v585_v50  ;;  %v617_v59 = vpack.c.bf16 %v533_v52, %v531_v51  ;;  %v463_v60 = vcvt.s32.f32 %v335_v53  ;;  %v367_v61 = vunpack.c.0.s8 %v299_v27  ;;  %v369_v62 = vunpack.c.1.s8 %v299_v27 }
  0x5c   : > { %716 = vmatpush.bf16.msrb.mxu1 %v601_v54  ;;  %v633_v1 = vpack.c.bf16 %v565_v56, %v563_v55  ;;  %v465_v2 = vcvt.s32.f32 %v337_v57  ;;  %v399_v3 = vunpack.c.0.s8 %v307_v32  ;;  %v401_v5 = vunpack.c.1.s8 %v307_v32  ;;  %v295_v55 = vld [vmem:[%s1142_s23 + $0x48] sm:$0xff] }
  0x5d   : > { %729 = vmatpush.bf16.msrb.mxu2 %v617_v59  ;;  %v495_v6 = vcvt.s32.f32 %v367_v61  ;;  %v497_v7 = vcvt.s32.f32 %v369_v62  ;;  %v431_v8 = vunpack.c.0.s8 %v315_v37  ;;  %v433_v10 = vunpack.c.1.s8 %v315_v37  ;;  %v303_v61 = vld [vmem:[%s1142_s23 + $0x88] sm:$0xff] }
  0x5e   : > { %742 = vmatpush.bf16.msrb.mxu3 %v633_v1  ;;  %v583_v12 = vpack.c.bf16 %v465_v2, %v463_v60  ;;  %v527_v13 = vcvt.s32.f32 %v399_v3  ;;  %v529_v14 = vcvt.s32.f32 %v401_v5  ;;  %v331_v15 = vunpack.c.2.s8 %v289_v0  ;;  %v311_v3 = vld [vmem:[%s1142_s23 + $0xc8] sm:$0xff] }
  0x5f   : > { %v599_v17 = vpack.c.bf16 %v497_v7, %v495_v6  ;;  %v559_v18 = vcvt.s32.f32 %v431_v8  ;;  %v561_v19 = vcvt.s32.f32 %v433_v10  ;;  %v333_v20 = vunpack.c.3.s8 %v289_v0 }
  0x60   : > { %704 = vmatpush.bf16.msrb.mxu0 %v583_v12  ;;  %v615_v22 = vpack.c.bf16 %v529_v14, %v527_v13  ;;  %v459_v23 = vcvt.s32.f32 %v331_v15  ;;  %v363_v24 = vunpack.c.2.s8 %v297_v11  ;;  %v365_v25 = vunpack.c.3.s8 %v297_v11 }
  0x61   : > { %717 = vmatpush.bf16.msrb.mxu1 %v599_v17  ;;  %v631_v26 = vpack.c.bf16 %v561_v19, %v559_v18  ;;  %v461_v27 = vcvt.s32.f32 %v333_v20  ;;  %v395_v28 = vunpack.c.2.s8 %v305_v16  ;;  %v397_v29 = vunpack.c.3.s8 %v305_v16 }
  0x62   : > { %730 = vmatpush.bf16.msrb.mxu2 %v615_v22  ;;  %v491_v30 = vcvt.s32.f32 %v363_v24  ;;  %v493_v31 = vcvt.s32.f32 %v365_v25  ;;  %v427_v32 = vunpack.c.2.s8 %v313_v21  ;;  %v429_v33 = vunpack.c.3.s8 %v313_v21 }
  0x63   : > { %743 = vmatpush.bf16.msrb.mxu3 %v631_v26  ;;  %v581_v34 = vpack.c.bf16 %v461_v27, %v459_v23  ;;  %v523_v35 = vcvt.s32.f32 %v395_v28  ;;  %v525_v36 = vcvt.s32.f32 %v397_v29  ;;  %v327_v37 = vunpack.c.0.s8 %v289_v0 }
  0x64   : > { %v597_v38 = vpack.c.bf16 %v493_v31, %v491_v30  ;;  %v555_v39 = vcvt.s32.f32 %v427_v32  ;;  %v557_v40 = vcvt.s32.f32 %v429_v33  ;;  %v329_v41 = vunpack.c.1.s8 %v289_v0 }
  0x65   : > { %705 = vmatpush.bf16.msrb.mxu0 %v581_v34  ;;  %v613_v42 = vpack.c.bf16 %v525_v36, %v523_v35  ;;  %v455_v43 = vcvt.s32.f32 %v327_v37  ;;  %v359_v44 = vunpack.c.0.s8 %v297_v11  ;;  %v361_v45 = vunpack.c.1.s8 %v297_v11 }
  0x66   : > { %718 = vmatpush.bf16.msrb.mxu1 %v597_v38  ;;  %v629_v47 = vpack.c.bf16 %v557_v40, %v555_v39  ;;  %v457_v48 = vcvt.s32.f32 %v329_v41  ;;  %v391_v49 = vunpack.c.0.s8 %v305_v16  ;;  %v393_v50 = vunpack.c.1.s8 %v305_v16 }
  0x67   : > { %731 = vmatpush.bf16.msrb.mxu2 %v613_v42  ;;  %v487_v51 = vcvt.s32.f32 %v359_v44  ;;  %v489_v52 = vcvt.s32.f32 %v361_v45  ;;  %v423_v53 = vunpack.c.0.s8 %v313_v21  ;;  %v425_v54 = vunpack.c.1.s8 %v313_v21 }
  0x68   : > { %744 = vmatpush.bf16.msrb.mxu3 %v629_v47  ;;  %v579_v56 = vpack.c.bf16 %v457_v48, %v455_v43  ;;  %v519_v57 = vcvt.s32.f32 %v391_v49  ;;  %v521_v59 = vcvt.s32.f32 %v393_v50  ;;  %v323_v60 = vunpack.c.2.s8 %v287_v46 }
  0x69   : > { %v595_v62 = vpack.c.bf16 %v489_v52, %v487_v51  ;;  %v551_v0 = vcvt.s32.f32 %v423_v53  ;;  %v553_v1 = vcvt.s32.f32 %v425_v54  ;;  %v325_v2 = vunpack.c.3.s8 %v287_v46 }
  0x6a   : > { %706 = vmatpush.bf16.msrb.mxu0 %v579_v56  ;;  %v611_v5 = vpack.c.bf16 %v521_v59, %v519_v57  ;;  %v451_v6 = vcvt.s32.f32 %v323_v60  ;;  %v355_v7 = vunpack.c.2.s8 %v295_v55  ;;  %v357_v8 = vunpack.c.3.s8 %v295_v55 }
  0x6b   : > { %719 = vmatpush.bf16.msrb.mxu1 %v595_v62  ;;  %v627_v10 = vpack.c.bf16 %v553_v1, %v551_v0  ;;  %v453_v11 = vcvt.s32.f32 %v325_v2  ;;  %v387_v12 = vunpack.c.2.s8 %v303_v61  ;;  %v389_v13 = vunpack.c.3.s8 %v303_v61  ;;  %v638_v0 = vld [vmem:[#allocation2] sm:$0xf] }
  0x6c   : > { %732 = vmatpush.bf16.msrb.mxu2 %v611_v5  ;;  %v483_v14 = vcvt.s32.f32 %v355_v7  ;;  %v485_v15 = vcvt.s32.f32 %v357_v8  ;;  %v419_v16 = vunpack.c.2.s8 %v311_v3  ;;  %v421_v17 = vunpack.c.3.s8 %v311_v3 }
  0x6d   : > { %745 = vmatpush.bf16.msrb.mxu3 %v627_v10  ;;  %v577_v18 = vpack.c.bf16 %v453_v11, %v451_v6  ;;  %v515_v19 = vcvt.s32.f32 %v387_v12  ;;  %v517_v20 = vcvt.s32.f32 %v389_v13  ;;  %v319_v21 = vunpack.c.0.s8 %v287_v46 }
  0x6e   : > { %v593_v22 = vpack.c.bf16 %v485_v15, %v483_v14  ;;  %v547_v23 = vcvt.s32.f32 %v419_v16  ;;  %v549_v24 = vcvt.s32.f32 %v421_v17  ;;  %v321_v25 = vunpack.c.1.s8 %v287_v46 }
  0x6f   : > { %707 = vmatpush.bf16.msrb.mxu0 %v577_v18  ;;  %v609_v26 = vpack.c.bf16 %v517_v20, %v515_v19  ;;  %v447_v27 = vcvt.s32.f32 %v319_v21  ;;  %v351_v28 = vunpack.c.0.s8 %v295_v55  ;;  %v353_v29 = vunpack.c.1.s8 %v295_v55 }
  0x70   : > { %720 = vmatpush.bf16.msrb.mxu1 %v593_v22  ;;  %v625_v30 = vpack.c.bf16 %v549_v24, %v547_v23  ;;  %v449_v31 = vcvt.s32.f32 %v321_v25  ;;  %v383_v32 = vunpack.c.0.s8 %v303_v61  ;;  %v385_v33 = vunpack.c.1.s8 %v303_v61 }
  0x71   : > { %733 = vmatpush.bf16.msrb.mxu2 %v609_v26  ;;  %v479_v34 = vcvt.s32.f32 %v351_v28  ;;  %v481_v35 = vcvt.s32.f32 %v353_v29  ;;  %v415_v36 = vunpack.c.0.s8 %v311_v3  ;;  %v417_v37 = vunpack.c.1.s8 %v311_v3 }
  0x72   : > { %746 = vmatpush.bf16.msrb.mxu3 %v625_v30  ;;  %v575_v38 = vpack.c.bf16 %v449_v31, %v447_v27  ;;  %v511_v39 = vcvt.s32.f32 %v383_v32  ;;  %v513_v40 = vcvt.s32.f32 %v385_v33 }
  0x73   : > { %v591_v41 = vpack.c.bf16 %v481_v35, %v479_v34  ;;  %v543_v42 = vcvt.s32.f32 %v415_v36  ;;  %v545_v43 = vcvt.s32.f32 %v417_v37 }
  0x74   : > { %708 = vmatpush.bf16.msrb.mxu0 %v575_v38  ;;  %v607_v44 = vpack.c.bf16 %v513_v40, %v511_v39 }
  0x75   : > { %721 = vmatpush.bf16.msrb.mxu1 %v591_v41  ;;  %v623_v45 = vpack.c.bf16 %v545_v43, %v543_v42 }
  0x76   : > { %734 = vmatpush.bf16.msrb.mxu2 %v607_v44 }
  0x77   : > { %747 = vmatpush.bf16.msrb.mxu3 %v623_v45  ;;  %709 = vmatmul.bf16.vlgmr.msrb.gmra.mxu0 %v1176_v58 }
  0x78   : > { %722 = vmatmul.bf16.vlgmr.msrb.gmra.mxu1 %v1178_v63 }
  0x79   : > { %735 = vmatmul.bf16.vlgmr.msrb.gmra.mxu2 %v1180_v4 }
  0x7a   : > { %748 = vmatmul.bf16.vlgmr.msrb.gmra.mxu3 %v1182_v9 }
  0xcc   : > { %v658_v46 = vpop.f32.mrf.mxu0 }
  0xcd   : > { %v671_v47 = vpop.f32.mrf.mxu1 }
  0xce   : > { %v672_v56 = vadd.f32 %v671_v47, %v658_v46 }
  0xd4   : > { %v684_v48 = vpop.f32.mrf.mxu2  ;;  %v660_v49 = vpop.f32.mrf.mxu0 }
  0xd5   : > { %v697_v50 = vpop.f32.mrf.mxu3  ;;  %v673_v51 = vpop.f32.mrf.mxu1  ;;  %v685_v60 = vadd.f32 %v684_v48, %v672_v56 }
  0xd7   : > { %v698_v9 = vadd.f32 %v697_v50, %v685_v60 }
  0xdc   : > { %v686_v52 = vpop.f32.mrf.mxu2 }
  0xdd   : > { %v699_v53 = vpop.f32.mrf.mxu3 }
  0xf4   : > { %v710_v54 = vpop.f32.mrf.mxu0 }
  0xf5   : > { %v723_v55 = vpop.f32.mrf.mxu1 }
  0xf6   : > { %v724_v57 = vadd.f32 %v723_v55, %v710_v54 }
  0xfc   : > { %v736_v59 = vpop.f32.mrf.mxu2  ;;  %v712_v58 = vpop.f32.mrf.mxu0 }
  0xfd   : > { %v737_v63 = vadd.f32 %v736_v59, %v724_v57  ;;  %v749_v61 = vpop.f32.mrf.mxu3  ;;  %v725_v4 = vpop.f32.mrf.mxu1 }
  0xff   : > { %v750_v62 = vadd.f32 %v749_v61, %v737_v63 }
 0x101   : > { %v755_v1 = vrot.slane %v750_v62, 6 }
 0x102   : > { %764 = sbr.rel (%p906_p0) target bundleno = 290 (0x122), region = 48 }
 0x103   : > { %v757_v2 = vsel %vm756_vm0, %v698_v9, %v755_v1 }
 0x104   : > { %v759_v3 = vadd.f32 %v757_v2, %v638_v0  ;;  %v738_v5 = vpop.f32.mrf.mxu2 }
 0x105   : > { %v751_v6 = vpop.f32.mrf.mxu3 }
 0x106   : > { %760 = vst [vmem:[#allocation2] sm:$0xf] %v759_v3 }
 0x107   : > { %v766_v7 = vld [vmem:[%s1237_s2] sm:$0x3]  ;;  %vm792_vm1 = vcmask 1040384  }
 0x108   : > { %v774_v8 = vld [vmem:[%s1238_s3] sm:$0x3]  ;;  %v768_v10 = vperm.slane %v766_v7, 0  ;;  %v769_v11 = vperm.slane %v766_v7, 1 }
 0x109   : > { %v776_v12 = vperm.slane %v774_v8, 0  ;;  %v777_v13 = vperm.slane %v774_v8, 1 }
 0x10a   : > { %v770_v15 = vrot.slane %v769_v11, 6 }
 0x10b   : > { %v778_v16 = vrot.slane %v777_v13, 6 }
 0x10c   : > { %v771_v17 = vsel %vm756_vm0, %v768_v10, %v770_v15 }
 0x10d   : > { %v765_v14 = vld [vmem:[#allocation2] sm:$0xf]  ;;  %v779_v18 = vsel %vm756_vm0, %v776_v12, %v778_v16 }
 0x10e   : > { %v773_v19 = vmul.f32 %v771_v17, %v765_v14 }
 0x110   : > { %v781_v20 = vadd.f32 %v779_v18, %v773_v19 }
 0x112   : > { %v782_v21 = vmax.f32 %v781_v20, 0.0 }
 0x114   : > { %784 = vst [vmem:[#allocation1] ss:$4 sm:$0xff] %v782_v21 }
 0x11b   : > { %v785_v22 = vld.sshfl [vmem:[#allocation1] sm:$0xff pattern:$0x73625140]  ;;  %v786_v23 = vld.sshfl [vmem:[#allocation1 + $0x8] sm:$0xff pattern:$0x73625140] }
 0x11c   : > { %v789_v24 = vpack.c.bf16 %v786_v23, %v785_v22 }
 0x11e   : > { %v791_v25 = vrot.slane %v789_v24, 3 }
 0x120   : > { %v795_v26 = vsel %vm792_vm1, %v789_v24, %v791_v25 }
 0x121   : > { %797 = vst [vmem:[%s1239_s4] sm:$0x3] %v795_v26 }
 0x122 PF: > { %s17_s20 = sadd.s32 1, %s1051_s20   ;;  %s1242_s15 = smov %s1035_s16 }
 0x123   : > { %p14_p1 = scmp.ge.s32.totalorder %s17_s20, 4   ;;  %s1243_s16 = smov %s1039_s17 }
 0x124   : > { %s1244_s17 = smov %s1130_s27  ;;  %s1245_s18 = smov %s1047_s19 }
 0x125   : > { %s1246_s19 = smov %s1248_s22  ;;  %16 = sbr.rel (!%p14_p1) target bundleno = 4 (0x4), region = 91 }
 0x12a   :  { %818 = vsyncpa [#allocation4], 1 }
 0x12b   :  { %820 = vsyncpa [#allocation4 + $0x1], 1 }

// kernel: advnn_forward.4
= control target key start
LH: loop header
LB: loop body
LE: loop exit
PB: predicated region body
PF: predicated region fallthrough
CT: control target
= control target key end

     0   :  { %s2129_s0 = inlined_call_operand.vmem [shape: bf16[2,1024], index: 0, kind: input, shape index: {}]   ;;  %s2130_s1 = inlined_call_operand.hbm [shape: s8[1024,1024], index: 1, kind: input, shape index: {}]   ;;  %s2131_s2 = inlined_call_operand.hbm [shape: f32[1,1024], index: 2, kind: input, shape index: {}]   ;;  %s2132_s3 = inlined_call_operand.hbm [shape: f32[1,1024], index: 3, kind: input, shape index: {}]   ;;  %s2133_s4 = inlined_call_operand.vmem [shape: bf16[2,1024], index: 4, kind: output, shape index: {}]  }
   0x1   :  { %2140 = sst [smem:[#allocation17_spill]] %s2129_s0 }
   0x2   :  { %2141 = sst [smem:[#allocation18_spill]] %s2130_s1 }
   0x3   :  { %2142 = sst [smem:[#allocation19_spill]] %s2131_s2 }
   0x4   :  { %9 = vsyncpa [#allocation4], 0 }
   0x5   :  { %11 = vsyncpa [#allocation4 + $0x1], 0 }
   0x6   :  { %12 = vsyncpa [#allocation6], 0 }
   0x7   :  { %14 = vsyncpa [#allocation6 + $0x1], 0  ;;  %s1798_s15 = smov 0   ;;  %s1800_s16 = smov 0  }
   0x8   :  { %s1802_s17 = smov 0   ;;  %s1804_s18 = smov 0  }
   0x9   :  { %s1806_s19 = smov 0   ;;  %s1808_s20 = smov 0  }
   0xa   :  { %s1810_s21 = smov 0   ;;  %s1812_s22 = smov 0  }
   0xb   :  { %s1814_s23 = smov 0   ;;  %s1816_s24 = smov 0  }
   0xc   :  { %s1818_s25 = smov 0  }
   0xd LB: > { %2143 = sst [smem:[#allocation10_spill]] %s1735_s17  ;;  %s2134_s26 = sadd.s32 4294967295, %s1767_s25   ;;  %s1767_s25 = sphi %s1818_s25, %s20_s25   ;;  %s1763_s24 = sphi %s1816_s24, %s2168_s24   ;;  %s1759_s23 = sphi %s1814_s23, %s2167_s23   ;;  %s1755_s22 = sphi %s1812_s22, %s2166_s22   ;;  %s1751_s21 = sphi %s1810_s21, %s2165_s21   ;;  %s1747_s20 = sphi %s1808_s20, %s2173_s20   ;;  %s1743_s19 = sphi %s1806_s19, %s2172_s19   ;;  %s1739_s18 = sphi %s1804_s18, %s2171_s18   ;;  %s1735_s17 = sphi %s1802_s17, %s2163_s17   ;;  %s1731_s16 = sphi %s1800_s16, %s2170_s16   ;;  %s1727_s15 = sphi %s1798_s15, %s2169_s15  }
   0xe   : > { %2144 = sst [smem:[#allocation11_spill]] %s1759_s23  ;;  %s29_s27 = sadd.s32 1, %s1759_s23 }
   0xf   : > { %2145 = sst [smem:[#allocation12_spill]] %s1763_s24  ;;  %p30_p0 = scmp.ge.s32.totalorder %s29_s27, 2 }
  0x10   : > { %s32_s28 = sadd.s32 1, %s1763_s24  ;;  %s62_s29 = sadd.s32 1, %s1747_s20 }
  0x11   : > { %p69_p1 = scmp.ne.s32.totalorder %s1747_s20, %s1743_s19  ;;  %s2175_s27 = smov (%p30_p0, %s29_s27), 0 }
  0x12   : > { %2146 = sst [smem:[#allocation13_spill]] %s2175_s27  ;;  %s2177_s28 = smov (!%p30_p0, %s32_s28), %s1763_s24 }
  0x13   : > { %s57_s30 = ssub.s32 %s1759_s23, %s2175_s27  ;;  %p70_p2 = scmp.eq.s32.totalorder %s1767_s25, 0 }
  0x14   : > { %p34_p3 = scmp.ge.s32.totalorder %s2177_s28, 2  ;;  %p75_p4 = scmp.ne.s32.totalorder %s1743_s19, %s1739_s18 }
  0x15   : > { %p1866_p5 = por %p70_p2, %p69_p1  ;;  %p1872_p6 = scmp.eq.s32.totalorder %s2134_s26, 0 }
  0x16   : > { %s2179_s28 = smov (%p34_p3, %s2177_s28), 0  ;;  %s88_s8 = sadd.s32 1, %s1735_s17 }
  0x17   : > { %2149 = sst [smem:[#allocation14_spill]] %s2179_s28  ;;  %p1880_p7 = por %p1872_p6, %p75_p4 }
  0x18   : > { %s58_s9 = ssub.s32 %s1763_s24, %s2179_s28  ;;  %p95_p8 = scmp.ne.s32.totalorder %s1735_s17, %s1731_s16 }
  0x19   : > { %s59_s10 = sor.u32 %s58_s9, %s57_s30  ;;  %p86_p9 = scmp.eq.s32.totalorder %s58_s9, 0 }
  0x1a   : > { %p60_p10 = scmp.eq.s32.totalorder %s59_s10, 0  ;;  %p1891_p11 = por %p95_p8, %p70_p2 }
  0x1b   : > { %s1896_s12 = scalar_select %p86_p9, %s1735_s17, %s88_s8  }
  0x1c   : > { %s1899_s13 = scalar_select %p60_p10, %s1747_s20, %s62_s29  }
  0x1d   : > { %2152 = sst [smem:[#allocation15_spill]] %s1896_s12  ;;  %p101_p12 = scmp.ne.s32.totalorder %s1731_s16, %s1727_s15 }
  0x1e   : > { %2153 = sst [smem:[#allocation16_spill]] %s1899_s13  ;;  %p1486_p13 = scmp.lt.s32.totalorder %s1767_s25, 4 }
  0x1f   : > { %s1905_s14 = sshll.u32 %s1763_s24, 2  ;;  %p1909_p0 = por %p101_p12, %p1872_p6 }
  0x20   : > { %s1469_s30 = sshll.u32 %s1759_s23, 7  ;;  %p1919_p1 = pnand %p1486_p13, %p1866_p5 }
  0x21   : > { %s190_s9 = sadd.s32 %s1469_s30, %s1905_s14  ;;  %s205_s6 = sand.u32 1, %s1767_s25  }
  0x22   : > { %s1454_s15 = sshll.u32 %s190_s9, 3  ;;  %s2156_s1 = sld [smem:[#allocation18_spill]] }
  0x23   : > { %s207_s27 = sand.u32 1, %s1735_s17   ;;  %s2157_s2 = sld [smem:[#allocation19_spill]] }
  0x24   : > { %s1455_s24 = sshll.u32 %s207_s27, 2  ;;  %p1936_p2 = pnand %p1486_p13, %p1891_p11 }
  0x25   : > { %s209_s12 = scalar_lea.vmem [#allocation5], %s1455_s24  ;;  %p1459_p3 = scmp.ge.s32.totalorder %s1767_s25, 1 }
  0x26   : > { %s217_s0 = sshll.u32 %s209_s12, 4  ;;  %p241_p4 = scmp.lt.s32.totalorder %s1767_s25, 5  ;;  %s218_s0 = int_to_ptr.vmem [resolvable:$true] %s217_s0 }
  0x27   : > { %s180_s27 = sand.u32 1, %s1747_s20   ;;  %s1769_s10 = smov 1024  }
  0x28   : > { %s192_s26 = scalar_lea.hbm %s2156_s1, %s1454_s15  ;;  %p1944_p5 = pnand %p1459_p3, %p241_p4 }
  0x29   : > { %s193_s28 = sshll.u32 %s192_s26, 4  ;;  %s213_s23 = scalar_lea.hbm %s2157_s2, %s1905_s14  ;;  %s194_s28 = int_to_ptr.hbm [resolvable:$true] %s193_s28 }
  0x2a   : > { %s215_s13 = sshll.u32 %s213_s23, 4  ;;  %s206_s26 = scalar_lea.sflag [#allocation6], %s205_s6  ;;  %s216_s13 = int_to_ptr.hbm [resolvable:$true] %s215_s13 }
  0x2b   : > { %1482 = dma.hbm_to_vmem [thread:$0]  (!%p1936_p2), %s216_s13, 64, %s218_s0, %s206_s26  }
  0x2c   : > { %s1450_s11 = sshll.u32 %s180_s27, 9  ;;  %s181_s8 = scalar_lea.sflag [#allocation4], %s180_s27 }
  0x2d   : > { %s184_s12 = scalar_lea.vmem [#allocation3], %s1450_s11  ;;  %s1770_s30 = smov 512  }
  0x2e   : > { %s195_s15 = sshll.u32 %s184_s12, 4  ;;  %s1771_s5 = smov 32   ;;  %s196_s15 = int_to_ptr.vmem [resolvable:$true] %s195_s15 }
  0x2f   : > { %1479 = dma.hbm_to_vmem [thread:$0]  (!%p1919_p1), %s194_s28, 8192, %s196_s15, %s181_s8, %s1769_s10, %s1770_s30, %s1771_s5  }
  0x30   : > { %s232_s0 = scalar_lea.hbm %s2132_s3, %s1905_s14  ;;  %s228_s13 = scalar_lea.vmem [#allocation7], %s1455_s24 }
  0x31   : > { %s236_s2 = sshll.u32 %s228_s13, 4  ;;  %s234_s17 = sshll.u32 %s232_s0, 4  ;;  %s237_s2 = int_to_ptr.vmem [resolvable:$true] %s236_s2  ;;  %s235_s17 = int_to_ptr.hbm [resolvable:$true] %s234_s17 }
  0x32   : > { %1485 = dma.hbm_to_vmem [thread:$0]  (!%p1936_p2), %s235_s17, 64, %s237_s2, %s206_s26  }
  0x33   : > { %245 = sbr.rel (%p1944_p5) target bundleno = 409 (0x199), region = 36  ;;  %s247_s27 = sand.u32 (!%p1944_p5), 1, %s1743_s19  }
  0x34   : > { %s1460_s11 = sshll.u32 (!%p1944_p5), %s247_s27, 9  ;;  %s248_s29 = scalar_lea.sflag (!%p1944_p5), [#allocation4], %s247_s27 }
  0x35   : > { %s1960_s28 = scalar_lea.vmem (!%p1944_p5), [#allocation3], %s1460_s11 }
  0x38   : > { %1718 = dma.done.wait (%p1880_p7), %s248_s29, 8192  }
  0x39   : > { %1720 = vsyncadd (%p1880_p7), %s248_s29, 4294959104  ;;  %s2160_s1 = sadd.s32 4294967295, %s1767_s25   ;;  %s259_s17 = sand.u32 1, %s1731_s16  }
  0x3a   : > { %s257_s2 = sand.u32 1, %s2160_s1   ;;  %s1969_s24 = sshll.u32 %s259_s17, 2 }
  0x3b   : > { %s258_s14 = scalar_lea.sflag [#allocation6], %s257_s2  ;;  %s261_s9 = scalar_lea.vmem [#allocation5], %s1969_s24 }
  0x3c   : > { %1722 = dma.done.wait (%p1909_p0), %s258_s14, 128  }
  0x3d   : > { %1724 = vsyncadd (%p1909_p0), %s258_s14, 4294967168  ;;  %s1463_s7 = sshll.u32 %s1755_s22, 2  ;;  %s271_s15 = scalar_lea.vmem [#allocation7], %s1969_s24 }
  0x3e   : > { %p311_p6 = scmp.lt.s32.totalorder %s1463_s7, 7  ;;  %p1464_p7 = scmp.ne.s32.totalorder %s1751_s21, 0 }
  0x40   : > { %s2181_s7 = smov (!%p311_p6, %s1463_s7), 7  ;;  %318 = sbr.rel (%p1464_p7) target bundleno = 71 (0x47), region = 52 }
  0x41   : > { %s313_s12 = scalar_lea.vmem %s2133_s4, %s2181_s7 }
  0x45   : > { %v1772_v0 = vmov 0.0  }
  0x46   : > { %319 = vst [vmem:[#allocation2] sm:$0xff] %v1772_v0 }
  0x47 PF: > { %v337_v1 = vld [vmem:[%s1960_s28 + $0x60] sm:$0xff]  ;;  %s1465_s22 = sshll.u32 %s1751_s21, 9  ;;  %s2161_s30 = sld [smem:[#allocation17_spill]]  ;;  %vm1255_vm0 = vcmask 1041408   ;;  %vm1257_vm1 = vcmask 1045508   ;;  %vm1259_vm2 = vcmask 1043456  }
  0x48   : > { %v353_v2 = vld [vmem:[%s1960_s28 + $0xe0] sm:$0xff]  ;;  %v445_v4 = vunpack.c.2.s8 %v337_v1  ;;  %v449_v5 = vunpack.c.3.s8 %v337_v1  ;;  %v437_v23 = vunpack.c.0.s8 %v337_v1  ;;  %v441_v24 = vunpack.c.1.s8 %v337_v1  ;;  %s1998_s18 = sshra.s32 %s1465_s22, 7  ;;  %p1466_p8 = scmp.ne.s32.totalorder %s1751_s21, 1 }
  0x49   : > { %v369_v3 = vld [vmem:[%s1960_s28 + $0x160] sm:$0xff]  ;;  %v509_v6 = vunpack.c.2.s8 %v353_v2  ;;  %v513_v7 = vunpack.c.3.s8 %v353_v2  ;;  %v501_v27 = vunpack.c.0.s8 %v353_v2  ;;  %v505_v28 = vunpack.c.1.s8 %v353_v2 }
  0x4a   : > { %v385_v8 = vld [vmem:[%s1960_s28 + $0x1e0] sm:$0xff]  ;;  %v573_v9 = vunpack.c.2.s8 %v369_v3  ;;  %v577_v10 = vunpack.c.3.s8 %v369_v3  ;;  %v701_v13 = vcvt.s32.f32 %v445_v4  ;;  %v705_v14 = vcvt.s32.f32 %v449_v5 }
  0x4b   : > { %v637_v11 = vunpack.c.2.s8 %v385_v8  ;;  %v641_v12 = vunpack.c.3.s8 %v385_v8  ;;  %v765_v15 = vcvt.s32.f32 %v509_v6  ;;  %v769_v16 = vcvt.s32.f32 %v513_v7  ;;  %v333_v29 = vld [vmem:[%s1960_s28 + $0x40] sm:$0xff] }
  0x4c   : > { %v829_v17 = vcvt.s32.f32 %v573_v9  ;;  %v833_v18 = vcvt.s32.f32 %v577_v10  ;;  %v929_v21 = vpack.c.bf16 %v705_v14, %v701_v13  ;;  %v693_v30 = vcvt.s32.f32 %v437_v23  ;;  %v349_v38 = vld [vmem:[%s1960_s28 + $0xc0] sm:$0xff] }
  0x4d   : > { %v893_v19 = vcvt.s32.f32 %v637_v11  ;;  %v897_v20 = vcvt.s32.f32 %v641_v12  ;;  %v961_v22 = vpack.c.bf16 %v769_v16, %v765_v15  ;;  %v697_v31 = vcvt.s32.f32 %v441_v24  ;;  %v365_v43 = vld [vmem:[%s1960_s28 + $0x140] sm:$0xff]  ;;  %s323_s5 = scalar_lea.vmem %s2161_s30, %s1998_s18 }
  0x4e   : > { %v993_v25 = vpack.c.bf16 %v833_v18, %v829_v17  ;;  %1040 = vmatpush.bf16.msra.mxu0 %v929_v21  ;;  %v565_v32 = vunpack.c.0.s8 %v369_v3  ;;  %v569_v33 = vunpack.c.1.s8 %v369_v3  ;;  %v757_v34 = vcvt.s32.f32 %v501_v27  ;;  %v381_v48 = vld [vmem:[%s1960_s28 + $0x1c0] sm:$0xff] }
  0x4f   : > { %v1025_v26 = vpack.c.bf16 %v897_v20, %v893_v19  ;;  %1053 = vmatpush.bf16.msra.mxu1 %v961_v22  ;;  %v761_v35 = vcvt.s32.f32 %v505_v28  ;;  %v629_v36 = vunpack.c.0.s8 %v385_v8  ;;  %v633_v37 = vunpack.c.1.s8 %v385_v8  ;;  %v329_v9 = vld [vmem:[%s1960_s28 + $0x20] sm:$0xff] }
  0x50   : > { %1066 = vmatpush.bf16.msra.mxu2 %v993_v25  ;;  %v925_v39 = vpack.c.bf16 %v697_v31, %v693_v30  ;;  %v821_v40 = vcvt.s32.f32 %v565_v32  ;;  %v825_v41 = vcvt.s32.f32 %v569_v33  ;;  %v429_v42 = vunpack.c.2.s8 %v333_v29  ;;  %v345_v18 = vld [vmem:[%s1960_s28 + $0xa0] sm:$0xff] }
  0x51   : > { %1079 = vmatpush.bf16.msra.mxu3 %v1025_v26  ;;  %v957_v44 = vpack.c.bf16 %v761_v35, %v757_v34  ;;  %v885_v45 = vcvt.s32.f32 %v629_v36  ;;  %v889_v46 = vcvt.s32.f32 %v633_v37  ;;  %v433_v47 = vunpack.c.3.s8 %v333_v29  ;;  %v361_v23 = vld [vmem:[%s1960_s28 + $0x120] sm:$0xff] }
  0x52   : > { %1041 = vmatpush.bf16.msra.mxu0 %v925_v39  ;;  %v989_v49 = vpack.c.bf16 %v825_v41, %v821_v40  ;;  %v685_v50 = vcvt.s32.f32 %v429_v42  ;;  %v493_v51 = vunpack.c.2.s8 %v349_v38  ;;  %v497_v52 = vunpack.c.3.s8 %v349_v38  ;;  %v377_v28 = vld [vmem:[%s1960_s28 + $0x1a0] sm:$0xff] }
  0x53   : > { %1054 = vmatpush.bf16.msra.mxu1 %v957_v44  ;;  %v1021_v53 = vpack.c.bf16 %v889_v46, %v885_v45  ;;  %v689_v54 = vcvt.s32.f32 %v433_v47  ;;  %v557_v55 = vunpack.c.2.s8 %v365_v43  ;;  %v561_v56 = vunpack.c.3.s8 %v365_v43 }
  0x54   : > { %1067 = vmatpush.bf16.msra.mxu2 %v989_v49  ;;  %v749_v57 = vcvt.s32.f32 %v493_v51  ;;  %v753_v58 = vcvt.s32.f32 %v497_v52  ;;  %v621_v59 = vunpack.c.2.s8 %v381_v48  ;;  %v625_v60 = vunpack.c.3.s8 %v381_v48 }
  0x55   : > { %1080 = vmatpush.bf16.msra.mxu3 %v1021_v53  ;;  %v921_v61 = vpack.c.bf16 %v689_v54, %v685_v50  ;;  %v813_v62 = vcvt.s32.f32 %v557_v55  ;;  %v817_v63 = vcvt.s32.f32 %v561_v56  ;;  %v421_v0 = vunpack.c.0.s8 %v333_v29  ;;  %v325_v53 = vld [vmem:[%s1960_s28] sm:$0xff]  ;;  %v324_v54 = vld [vmem:[%s323_s5] sm:$0xf] }
  0x56   : > { %v953_v1 = vpack.c.bf16 %v753_v58, %v749_v57  ;;  %v877_v2 = vcvt.s32.f32 %v621_v59  ;;  %v881_v3 = vcvt.s32.f32 %v625_v60  ;;  %v425_v4 = vunpack.c.1.s8 %v333_v29  ;;  %1031 = vst [vmem:[#allocation1] ss:$9 sm:$0xff] %v324_v54 }
  0x57   : > { %1042 = vmatpush.bf16.msra.mxu0 %v921_v61  ;;  %v985_v5 = vpack.c.bf16 %v817_v63, %v813_v62  ;;  %v677_v6 = vcvt.s32.f32 %v421_v0  ;;  %v485_v7 = vunpack.c.0.s8 %v349_v38  ;;  %v489_v8 = vunpack.c.1.s8 %v349_v38  ;;  %v341_v63 = vld [vmem:[%s1960_s28 + $0x80] sm:$0xff] }
  0x58   : > { %1055 = vmatpush.bf16.msra.mxu1 %v953_v1  ;;  %v1017_v10 = vpack.c.bf16 %v881_v3, %v877_v2  ;;  %v681_v11 = vcvt.s32.f32 %v425_v4  ;;  %v549_v12 = vunpack.c.0.s8 %v365_v43  ;;  %v553_v13 = vunpack.c.1.s8 %v365_v43  ;;  %v357_v4 = vld [vmem:[%s1960_s28 + $0x100] sm:$0xff] }
  0x59   : > { %1068 = vmatpush.bf16.msra.mxu2 %v985_v5  ;;  %v741_v14 = vcvt.s32.f32 %v485_v7  ;;  %v745_v15 = vcvt.s32.f32 %v489_v8  ;;  %v613_v16 = vunpack.c.0.s8 %v381_v48  ;;  %v617_v17 = vunpack.c.1.s8 %v381_v48 }
  0x5a   : > { %1081 = vmatpush.bf16.msra.mxu3 %v1017_v10  ;;  %v917_v19 = vpack.c.bf16 %v681_v11, %v677_v6  ;;  %v805_v20 = vcvt.s32.f32 %v549_v12  ;;  %v809_v21 = vcvt.s32.f32 %v553_v13  ;;  %v413_v22 = vunpack.c.2.s8 %v329_v9 }
  0x5b   : > { %v949_v24 = vpack.c.bf16 %v745_v15, %v741_v14  ;;  %v869_v25 = vcvt.s32.f32 %v613_v16  ;;  %v873_v26 = vcvt.s32.f32 %v617_v17  ;;  %v417_v27 = vunpack.c.3.s8 %v329_v9 }
  0x5c   : > { %1043 = vmatpush.bf16.msra.mxu0 %v917_v19  ;;  %v981_v29 = vpack.c.bf16 %v809_v21, %v805_v20  ;;  %v669_v30 = vcvt.s32.f32 %v413_v22  ;;  %v477_v31 = vunpack.c.2.s8 %v345_v18  ;;  %v481_v32 = vunpack.c.3.s8 %v345_v18 }
  0x5d   : > { %1056 = vmatpush.bf16.msra.mxu1 %v949_v24  ;;  %v1013_v33 = vpack.c.bf16 %v873_v26, %v869_v25  ;;  %v673_v34 = vcvt.s32.f32 %v417_v27  ;;  %v541_v35 = vunpack.c.2.s8 %v361_v23  ;;  %v545_v36 = vunpack.c.3.s8 %v361_v23 }
  0x5e   : > { %1069 = vmatpush.bf16.msra.mxu2 %v981_v29  ;;  %v733_v37 = vcvt.s32.f32 %v477_v31  ;;  %v737_v38 = vcvt.s32.f32 %v481_v32  ;;  %v605_v39 = vunpack.c.2.s8 %v377_v28  ;;  %v609_v40 = vunpack.c.3.s8 %v377_v28 }
  0x5f   : > { %1082 = vmatpush.bf16.msra.mxu3 %v1013_v33  ;;  %v913_v41 = vpack.c.bf16 %v673_v34, %v669_v30  ;;  %v797_v42 = vcvt.s32.f32 %v541_v35  ;;  %v801_v43 = vcvt.s32.f32 %v545_v36  ;;  %v405_v44 = vunpack.c.0.s8 %v329_v9  ;;  %v338_v34 = vld [vmem:[%s1960_s28 + $0x68] sm:$0xff] }
  0x60   : > { %v945_v45 = vpack.c.bf16 %v737_v38, %v733_v37  ;;  %v861_v46 = vcvt.s32.f32 %v605_v39  ;;  %v865_v47 = vcvt.s32.f32 %v609_v40  ;;  %v409_v48 = vunpack.c.1.s8 %v329_v9  ;;  %v373_v9 = vld [vmem:[%s1960_s28 + $0x180] sm:$0xff] }
  0x61   : > { %1044 = vmatpush.bf16.msra.mxu0 %v913_v41  ;;  %v977_v49 = vpack.c.bf16 %v801_v43, %v797_v42  ;;  %v661_v50 = vcvt.s32.f32 %v405_v44  ;;  %v469_v51 = vunpack.c.0.s8 %v345_v18  ;;  %v473_v52 = vunpack.c.1.s8 %v345_v18  ;;  %v354_v43 = vld [vmem:[%s1960_s28 + $0xe8] sm:$0xff] }
  0x62   : > { %1057 = vmatpush.bf16.msra.mxu1 %v945_v45  ;;  %v1009_v55 = vpack.c.bf16 %v865_v47, %v861_v46  ;;  %v665_v56 = vcvt.s32.f32 %v409_v48  ;;  %v533_v57 = vunpack.c.0.s8 %v361_v23  ;;  %v537_v58 = vunpack.c.1.s8 %v361_v23  ;;  %v370_v48 = vld [vmem:[%s1960_s28 + $0x168] sm:$0xff] }
  0x63   : > { %1070 = vmatpush.bf16.msra.mxu2 %v977_v49  ;;  %v725_v59 = vcvt.s32.f32 %v469_v51  ;;  %v729_v60 = vcvt.s32.f32 %v473_v52  ;;  %v597_v61 = vunpack.c.0.s8 %v377_v28  ;;  %v601_v62 = vunpack.c.1.s8 %v377_v28 }
  0x64   : > { %1083 = vmatpush.bf16.msra.mxu3 %v1009_v55  ;;  %v909_v0 = vpack.c.bf16 %v665_v56, %v661_v50  ;;  %v789_v1 = vcvt.s32.f32 %v533_v57  ;;  %v793_v2 = vcvt.s32.f32 %v537_v58  ;;  %v397_v3 = vunpack.c.2.s8 %v325_v53  ;;  %v2012_v58 = vld [vmem:[#allocation1] sm:$0xff] }
  0x65   : > { %v941_v5 = vpack.c.bf16 %v729_v60, %v725_v59  ;;  %v853_v6 = vcvt.s32.f32 %v597_v61  ;;  %v857_v7 = vcvt.s32.f32 %v601_v62  ;;  %v401_v8 = vunpack.c.3.s8 %v325_v53 }
  0x66   : > { %1045 = vmatpush.bf16.msra.mxu0 %v909_v0  ;;  %v973_v10 = vpack.c.bf16 %v793_v2, %v789_v1  ;;  %v653_v11 = vcvt.s32.f32 %v397_v3  ;;  %v461_v12 = vunpack.c.2.s8 %v341_v63  ;;  %v465_v13 = vunpack.c.3.s8 %v341_v63 }
  0x67   : > { %1058 = vmatpush.bf16.msra.mxu1 %v941_v5  ;;  %v1005_v14 = vpack.c.bf16 %v857_v7, %v853_v6  ;;  %v657_v15 = vcvt.s32.f32 %v401_v8  ;;  %v525_v16 = vunpack.c.2.s8 %v357_v4  ;;  %v529_v17 = vunpack.c.3.s8 %v357_v4 }
  0x68   : > { %1071 = vmatpush.bf16.msra.mxu2 %v973_v10  ;;  %v717_v18 = vcvt.s32.f32 %v461_v12  ;;  %v721_v19 = vcvt.s32.f32 %v465_v13  ;;  %v589_v20 = vunpack.c.2.s8 %v373_v9  ;;  %v593_v21 = vunpack.c.3.s8 %v373_v9 }
  0x69   : > { %1084 = vmatpush.bf16.msra.mxu3 %v1005_v14  ;;  %v905_v22 = vpack.c.bf16 %v657_v15, %v653_v11  ;;  %v781_v23 = vcvt.s32.f32 %v525_v16  ;;  %v785_v24 = vcvt.s32.f32 %v529_v17  ;;  %v389_v25 = vunpack.c.0.s8 %v325_v53 }
  0x6a   : > { %v937_v26 = vpack.c.bf16 %v721_v19, %v717_v18  ;;  %v845_v27 = vcvt.s32.f32 %v589_v20  ;;  %v849_v28 = vcvt.s32.f32 %v593_v21  ;;  %v393_v29 = vunpack.c.1.s8 %v325_v53  ;;  %v386_v53 = vld [vmem:[%s1960_s28 + $0x1e8] sm:$0xff] }
  0x6b   : > { %1046 = vmatpush.bf16.msra.mxu0 %v905_v22  ;;  %v969_v30 = vpack.c.bf16 %v785_v24, %v781_v23  ;;  %v645_v31 = vcvt.s32.f32 %v389_v25  ;;  %v453_v32 = vunpack.c.0.s8 %v341_v63  ;;  %v457_v33 = vunpack.c.1.s8 %v341_v63  ;;  %v2014_v63 = vld [vmem:[#allocation1 + $0x9] sm:$0xff]  ;;  %v334_v18 = vld [vmem:[%s1960_s28 + $0x48] sm:$0xff] }
  0x6c   : > { %1059 = vmatpush.bf16.msra.mxu1 %v937_v26  ;;  %v1001_v35 = vpack.c.bf16 %v849_v28, %v845_v27  ;;  %v649_v36 = vcvt.s32.f32 %v393_v29  ;;  %v517_v37 = vunpack.c.0.s8 %v357_v4  ;;  %v521_v38 = vunpack.c.1.s8 %v357_v4  ;;  %v2016_v4 = vld [vmem:[#allocation1 + $0x12] sm:$0xff] }
  0x6d   : > { %1072 = vmatpush.bf16.msra.mxu2 %v969_v30  ;;  %v709_v39 = vcvt.s32.f32 %v453_v32  ;;  %v713_v40 = vcvt.s32.f32 %v457_v33  ;;  %v581_v41 = vunpack.c.0.s8 %v373_v9  ;;  %v585_v42 = vunpack.c.1.s8 %v373_v9  ;;  %v2018_v9 = vld [vmem:[#allocation1 + $0x1b] sm:$0xff] }
  0x6e   : > { %1085 = vmatpush.bf16.msra.mxu3 %v1001_v35  ;;  %v901_v44 = vpack.c.bf16 %v649_v36, %v645_v31  ;;  %v773_v45 = vcvt.s32.f32 %v517_v37  ;;  %v777_v46 = vcvt.s32.f32 %v521_v38  ;;  %v446_v47 = vunpack.c.2.s8 %v338_v34  ;;  %v350_v27 = vld [vmem:[%s1960_s28 + $0xc8] sm:$0xff] }
  0x6f   : > { %v933_v49 = vpack.c.bf16 %v713_v40, %v709_v39  ;;  %v837_v50 = vcvt.s32.f32 %v581_v41  ;;  %v841_v51 = vcvt.s32.f32 %v585_v42  ;;  %v450_v52 = vunpack.c.3.s8 %v338_v34  ;;  %v366_v32 = vld [vmem:[%s1960_s28 + $0x148] sm:$0xff] }
  0x70   : > { %1047 = vmatpush.bf16.msra.mxu0 %v901_v44  ;;  %v965_v54 = vpack.c.bf16 %v777_v46, %v773_v45  ;;  %v702_v55 = vcvt.s32.f32 %v446_v47  ;;  %v510_v56 = vunpack.c.2.s8 %v354_v43  ;;  %v514_v57 = vunpack.c.3.s8 %v354_v43  ;;  %v382_v37 = vld [vmem:[%s1960_s28 + $0x1c8] sm:$0xff] }
  0x71   : > { %1060 = vmatpush.bf16.msra.mxu1 %v933_v49  ;;  %v997_v59 = vpack.c.bf16 %v841_v51, %v837_v50  ;;  %v706_v60 = vcvt.s32.f32 %v450_v52  ;;  %v574_v61 = vunpack.c.2.s8 %v370_v48  ;;  %v578_v62 = vunpack.c.3.s8 %v370_v48 }
  0x72   : > { %1073 = vmatpush.bf16.msra.mxu2 %v965_v54  ;;  %v766_v0 = vcvt.s32.f32 %v510_v56  ;;  %v770_v1 = vcvt.s32.f32 %v514_v57  ;;  %v638_v2 = vunpack.c.2.s8 %v386_v53  ;;  %v642_v3 = vunpack.c.3.s8 %v386_v53 }
  0x73   : > { %1086 = vmatpush.bf16.msra.mxu3 %v997_v59  ;;  %v930_v5 = vpack.c.bf16 %v706_v60, %v702_v55  ;;  %v830_v6 = vcvt.s32.f32 %v574_v61  ;;  %v834_v7 = vcvt.s32.f32 %v578_v62  ;;  %v438_v8 = vunpack.c.0.s8 %v338_v34  ;;  %1048 = vmatmul.bf16.vlgmr.msra.gmra.mxu0 %v2012_v58 }
  0x74   : > { %v962_v10 = vpack.c.bf16 %v770_v1, %v766_v0  ;;  %v894_v11 = vcvt.s32.f32 %v638_v2  ;;  %v898_v12 = vcvt.s32.f32 %v642_v3  ;;  %v442_v13 = vunpack.c.1.s8 %v338_v34  ;;  %1061 = vmatmul.bf16.vlgmr.msra.gmra.mxu1 %v2014_v63  ;;  %v330_v0 = vld [vmem:[%s1960_s28 + $0x28] sm:$0xff] }
  0x75   : > { %1092 = vmatpush.bf16.msrb.mxu0 %v930_v5  ;;  %v994_v14 = vpack.c.bf16 %v834_v7, %v830_v6  ;;  %v694_v15 = vcvt.s32.f32 %v438_v8  ;;  %v502_v16 = vunpack.c.0.s8 %v354_v43  ;;  %v506_v17 = vunpack.c.1.s8 %v354_v43  ;;  %1074 = vmatmul.bf16.vlgmr.msra.gmra.mxu2 %v2016_v4 }
  0x76   : > { %1105 = vmatpush.bf16.msrb.mxu1 %v962_v10  ;;  %v1026_v19 = vpack.c.bf16 %v898_v12, %v894_v11  ;;  %v698_v20 = vcvt.s32.f32 %v442_v13  ;;  %v566_v21 = vunpack.c.0.s8 %v370_v48  ;;  %v570_v22 = vunpack.c.1.s8 %v370_v48  ;;  %1087 = vmatmul.bf16.vlgmr.msra.gmra.mxu3 %v2018_v9  ;;  %v346_v11 = vld [vmem:[%s1960_s28 + $0xa8] sm:$0xff] }
  0x77   : > { %1118 = vmatpush.bf16.msrb.mxu2 %v994_v14  ;;  %v758_v23 = vcvt.s32.f32 %v502_v16  ;;  %v762_v24 = vcvt.s32.f32 %v506_v17  ;;  %v630_v25 = vunpack.c.0.s8 %v386_v53  ;;  %v634_v26 = vunpack.c.1.s8 %v386_v53  ;;  %v362_v16 = vld [vmem:[%s1960_s28 + $0x128] sm:$0xff] }
  0x78   : > { %1131 = vmatpush.bf16.msrb.mxu3 %v1026_v19  ;;  %v926_v28 = vpack.c.bf16 %v698_v20, %v694_v15  ;;  %v822_v29 = vcvt.s32.f32 %v566_v21  ;;  %v826_v30 = vcvt.s32.f32 %v570_v22  ;;  %v430_v31 = vunpack.c.2.s8 %v334_v18  ;;  %v378_v21 = vld [vmem:[%s1960_s28 + $0x1a8] sm:$0xff] }
  0x79   : > { %v958_v33 = vpack.c.bf16 %v762_v24, %v758_v23  ;;  %v886_v34 = vcvt.s32.f32 %v630_v25  ;;  %v890_v35 = vcvt.s32.f32 %v634_v26  ;;  %v434_v36 = vunpack.c.3.s8 %v334_v18 }
  0x7a   : > { %1093 = vmatpush.bf16.msrb.mxu0 %v926_v28  ;;  %v990_v38 = vpack.c.bf16 %v826_v30, %v822_v29  ;;  %v686_v39 = vcvt.s32.f32 %v430_v31  ;;  %v494_v40 = vunpack.c.2.s8 %v350_v27  ;;  %v498_v41 = vunpack.c.3.s8 %v350_v27 }
  0x7b   : > { %1106 = vmatpush.bf16.msrb.mxu1 %v958_v33  ;;  %v1022_v42 = vpack.c.bf16 %v890_v35, %v886_v34  ;;  %v690_v43 = vcvt.s32.f32 %v434_v36  ;;  %v558_v44 = vunpack.c.2.s8 %v366_v32  ;;  %v562_v45 = vunpack.c.3.s8 %v366_v32 }
  0x7c   : > { %1119 = vmatpush.bf16.msrb.mxu2 %v990_v38  ;;  %v750_v46 = vcvt.s32.f32 %v494_v40  ;;  %v754_v47 = vcvt.s32.f32 %v498_v41  ;;  %v622_v48 = vunpack.c.2.s8 %v382_v37  ;;  %v626_v49 = vunpack.c.3.s8 %v382_v37 }
  0x7d   : > { %1132 = vmatpush.bf16.msrb.mxu3 %v1022_v42  ;;  %v922_v50 = vpack.c.bf16 %v690_v43, %v686_v39  ;;  %v814_v51 = vcvt.s32.f32 %v558_v44  ;;  %v818_v52 = vcvt.s32.f32 %v562_v45  ;;  %v422_v53 = vunpack.c.0.s8 %v334_v18 }
  0x7e   : > { %v954_v54 = vpack.c.bf16 %v754_v47, %v750_v46  ;;  %v878_v55 = vcvt.s32.f32 %v622_v48  ;;  %v882_v56 = vcvt.s32.f32 %v626_v49  ;;  %v426_v57 = vunpack.c.1.s8 %v334_v18  ;;  %v326_v46 = vld [vmem:[%s1960_s28 + $0x8] sm:$0xff] }
  0x7f   : > { %1094 = vmatpush.bf16.msrb.mxu0 %v922_v50  ;;  %v986_v59 = vpack.c.bf16 %v818_v52, %v814_v51  ;;  %v678_v60 = vcvt.s32.f32 %v422_v53  ;;  %v486_v61 = vunpack.c.0.s8 %v350_v27  ;;  %v490_v62 = vunpack.c.1.s8 %v350_v27 }
  0x80   : > { %1107 = vmatpush.bf16.msrb.mxu1 %v954_v54  ;;  %v1018_v1 = vpack.c.bf16 %v882_v56, %v878_v55  ;;  %v682_v2 = vcvt.s32.f32 %v426_v57  ;;  %v550_v3 = vunpack.c.0.s8 %v366_v32  ;;  %v554_v5 = vunpack.c.1.s8 %v366_v32  ;;  %v342_v55 = vld [vmem:[%s1960_s28 + $0x88] sm:$0xff] }
  0x81   : > { %1120 = vmatpush.bf16.msrb.mxu2 %v986_v59  ;;  %v742_v6 = vcvt.s32.f32 %v486_v61  ;;  %v746_v7 = vcvt.s32.f32 %v490_v62  ;;  %v614_v8 = vunpack.c.0.s8 %v382_v37  ;;  %v618_v10 = vunpack.c.1.s8 %v382_v37  ;;  %v358_v61 = vld [vmem:[%s1960_s28 + $0x108] sm:$0xff] }
  0x82   : > { %1133 = vmatpush.bf16.msrb.mxu3 %v1018_v1  ;;  %v918_v12 = vpack.c.bf16 %v682_v2, %v678_v60  ;;  %v806_v13 = vcvt.s32.f32 %v550_v3  ;;  %v810_v14 = vcvt.s32.f32 %v554_v5  ;;  %v414_v15 = vunpack.c.2.s8 %v330_v0  ;;  %v374_v3 = vld [vmem:[%s1960_s28 + $0x188] sm:$0xff] }
  0x83   : > { %v950_v17 = vpack.c.bf16 %v746_v7, %v742_v6  ;;  %v870_v18 = vcvt.s32.f32 %v614_v8  ;;  %v874_v19 = vcvt.s32.f32 %v618_v10  ;;  %v418_v20 = vunpack.c.3.s8 %v330_v0 }
  0x84   : > { %1095 = vmatpush.bf16.msrb.mxu0 %v918_v12  ;;  %v982_v22 = vpack.c.bf16 %v810_v14, %v806_v13  ;;  %v670_v23 = vcvt.s32.f32 %v414_v15  ;;  %v478_v24 = vunpack.c.2.s8 %v346_v11  ;;  %v482_v25 = vunpack.c.3.s8 %v346_v11 }
  0x85   : > { %1108 = vmatpush.bf16.msrb.mxu1 %v950_v17  ;;  %v1014_v26 = vpack.c.bf16 %v874_v19, %v870_v18  ;;  %v674_v27 = vcvt.s32.f32 %v418_v20  ;;  %v542_v28 = vunpack.c.2.s8 %v362_v16  ;;  %v546_v29 = vunpack.c.3.s8 %v362_v16 }
  0x86   : > { %1121 = vmatpush.bf16.msrb.mxu2 %v982_v22  ;;  %v734_v30 = vcvt.s32.f32 %v478_v24  ;;  %v738_v31 = vcvt.s32.f32 %v482_v25  ;;  %v606_v32 = vunpack.c.2.s8 %v378_v21  ;;  %v610_v33 = vunpack.c.3.s8 %v378_v21 }
  0x87   : > { %1134 = vmatpush.bf16.msrb.mxu3 %v1014_v26  ;;  %v914_v34 = vpack.c.bf16 %v674_v27, %v670_v23  ;;  %v798_v35 = vcvt.s32.f32 %v542_v28  ;;  %v802_v36 = vcvt.s32.f32 %v546_v29  ;;  %v406_v37 = vunpack.c.0.s8 %v330_v0 }
  0x88   : > { %v946_v38 = vpack.c.bf16 %v738_v31, %v734_v30  ;;  %v862_v39 = vcvt.s32.f32 %v606_v32  ;;  %v866_v40 = vcvt.s32.f32 %v610_v33  ;;  %v410_v41 = vunpack.c.1.s8 %v330_v0  ;;  %v339_v30 = vld [vmem:[%s1960_s28 + $0x70] sm:$0xff] }
  0x89   : > { %1096 = vmatpush.bf16.msrb.mxu0 %v914_v34  ;;  %v978_v42 = vpack.c.bf16 %v802_v36, %v798_v35  ;;  %v662_v43 = vcvt.s32.f32 %v406_v37  ;;  %v470_v44 = vunpack.c.0.s8 %v346_v11  ;;  %v474_v45 = vunpack.c.1.s8 %v346_v11 }
  0x8a   : > { %1109 = vmatpush.bf16.msrb.mxu1 %v946_v38  ;;  %v1010_v47 = vpack.c.bf16 %v866_v40, %v862_v39  ;;  %v666_v48 = vcvt.s32.f32 %v410_v41  ;;  %v534_v49 = vunpack.c.0.s8 %v362_v16  ;;  %v538_v50 = vunpack.c.1.s8 %v362_v16  ;;  %v355_v39 = vld [vmem:[%s1960_s28 + $0xf0] sm:$0xff] }
  0x8b   : > { %1122 = vmatpush.bf16.msrb.mxu2 %v978_v42  ;;  %v726_v51 = vcvt.s32.f32 %v470_v44  ;;  %v730_v52 = vcvt.s32.f32 %v474_v45  ;;  %v598_v53 = vunpack.c.0.s8 %v378_v21  ;;  %v602_v54 = vunpack.c.1.s8 %v378_v21  ;;  %v371_v44 = vld [vmem:[%s1960_s28 + $0x170] sm:$0xff] }
  0x8c   : > { %1135 = vmatpush.bf16.msrb.mxu3 %v1010_v47  ;;  %v910_v56 = vpack.c.bf16 %v666_v48, %v662_v43  ;;  %v790_v57 = vcvt.s32.f32 %v534_v49  ;;  %v794_v59 = vcvt.s32.f32 %v538_v50  ;;  %v398_v60 = vunpack.c.2.s8 %v326_v46  ;;  %v387_v49 = vld [vmem:[%s1960_s28 + $0x1f0] sm:$0xff] }
  0x8d   : > { %v942_v62 = vpack.c.bf16 %v730_v52, %v726_v51  ;;  %v854_v0 = vcvt.s32.f32 %v598_v53  ;;  %v858_v1 = vcvt.s32.f32 %v602_v54  ;;  %v402_v2 = vunpack.c.3.s8 %v326_v46 }
  0x8e   : > { %1097 = vmatpush.bf16.msrb.mxu0 %v910_v56  ;;  %v974_v5 = vpack.c.bf16 %v794_v59, %v790_v57  ;;  %v654_v6 = vcvt.s32.f32 %v398_v60  ;;  %v462_v7 = vunpack.c.2.s8 %v342_v55  ;;  %v466_v8 = vunpack.c.3.s8 %v342_v55 }
  0x8f   : > { %1110 = vmatpush.bf16.msrb.mxu1 %v942_v62  ;;  %v1006_v10 = vpack.c.bf16 %v858_v1, %v854_v0  ;;  %v658_v11 = vcvt.s32.f32 %v402_v2  ;;  %v526_v12 = vunpack.c.2.s8 %v358_v61  ;;  %v530_v13 = vunpack.c.3.s8 %v358_v61 }
  0x90   : > { %1123 = vmatpush.bf16.msrb.mxu2 %v974_v5  ;;  %v718_v14 = vcvt.s32.f32 %v462_v7  ;;  %v722_v15 = vcvt.s32.f32 %v466_v8  ;;  %v590_v16 = vunpack.c.2.s8 %v374_v3  ;;  %v594_v17 = vunpack.c.3.s8 %v374_v3 }
  0x91   : > { %1136 = vmatpush.bf16.msrb.mxu3 %v1006_v10  ;;  %v906_v18 = vpack.c.bf16 %v658_v11, %v654_v6  ;;  %v782_v19 = vcvt.s32.f32 %v526_v12  ;;  %v786_v20 = vcvt.s32.f32 %v530_v13  ;;  %v390_v21 = vunpack.c.0.s8 %v326_v46 }
  0x92   : > { %v938_v22 = vpack.c.bf16 %v722_v15, %v718_v14  ;;  %v846_v23 = vcvt.s32.f32 %v590_v16  ;;  %v850_v24 = vcvt.s32.f32 %v594_v17  ;;  %v394_v25 = vunpack.c.1.s8 %v326_v46  ;;  %v335_v14 = vld [vmem:[%s1960_s28 + $0x50] sm:$0xff] }
  0x93   : > { %1098 = vmatpush.bf16.msrb.mxu0 %v906_v18  ;;  %v970_v26 = vpack.c.bf16 %v786_v20, %v782_v19  ;;  %v646_v27 = vcvt.s32.f32 %v390_v21  ;;  %v454_v28 = vunpack.c.0.s8 %v342_v55  ;;  %v458_v29 = vunpack.c.1.s8 %v342_v55 }
  0x94   : > { %1111 = vmatpush.bf16.msrb.mxu1 %v938_v22  ;;  %v1002_v31 = vpack.c.bf16 %v850_v24, %v846_v23  ;;  %v650_v32 = vcvt.s32.f32 %v394_v25  ;;  %v518_v33 = vunpack.c.0.s8 %v358_v61  ;;  %v522_v34 = vunpack.c.1.s8 %v358_v61  ;;  %v351_v23 = vld [vmem:[%s1960_s28 + $0xd0] sm:$0xff] }
  0x95   : > { %1124 = vmatpush.bf16.msrb.mxu2 %v970_v26  ;;  %v710_v35 = vcvt.s32.f32 %v454_v28  ;;  %v714_v36 = vcvt.s32.f32 %v458_v29  ;;  %v582_v37 = vunpack.c.0.s8 %v374_v3  ;;  %v586_v38 = vunpack.c.1.s8 %v374_v3  ;;  %v367_v28 = vld [vmem:[%s1960_s28 + $0x150] sm:$0xff] }
  0x96   : > { %1137 = vmatpush.bf16.msrb.mxu3 %v1002_v31  ;;  %v902_v40 = vpack.c.bf16 %v650_v32, %v646_v27  ;;  %v774_v41 = vcvt.s32.f32 %v518_v33  ;;  %v778_v42 = vcvt.s32.f32 %v522_v34  ;;  %v447_v43 = vunpack.c.2.s8 %v339_v30  ;;  %v383_v33 = vld [vmem:[%s1960_s28 + $0x1d0] sm:$0xff] }
  0x97   : > { %v934_v45 = vpack.c.bf16 %v714_v36, %v710_v35  ;;  %v838_v46 = vcvt.s32.f32 %v582_v37  ;;  %v842_v47 = vcvt.s32.f32 %v586_v38  ;;  %v451_v48 = vunpack.c.3.s8 %v339_v30 }
  0x98   : > { %1099 = vmatpush.bf16.msrb.mxu0 %v902_v40  ;;  %v966_v50 = vpack.c.bf16 %v778_v42, %v774_v41  ;;  %v703_v51 = vcvt.s32.f32 %v447_v43  ;;  %v511_v52 = vunpack.c.2.s8 %v355_v39  ;;  %v515_v53 = vunpack.c.3.s8 %v355_v39 }
  0x99   : > { %1112 = vmatpush.bf16.msrb.mxu1 %v934_v45  ;;  %v998_v54 = vpack.c.bf16 %v842_v47, %v838_v46  ;;  %v707_v55 = vcvt.s32.f32 %v451_v48  ;;  %v575_v56 = vunpack.c.2.s8 %v371_v44  ;;  %v579_v57 = vunpack.c.3.s8 %v371_v44 }
  0x9a   : > { %1125 = vmatpush.bf16.msrb.mxu2 %v966_v50  ;;  %v767_v59 = vcvt.s32.f32 %v511_v52  ;;  %v771_v60 = vcvt.s32.f32 %v515_v53  ;;  %v639_v61 = vunpack.c.2.s8 %v387_v49  ;;  %v643_v62 = vunpack.c.3.s8 %v387_v49 }
  0x9b   : > { %1138 = vmatpush.bf16.msrb.mxu3 %v998_v54  ;;  %v931_v0 = vpack.c.bf16 %v707_v55, %v703_v51  ;;  %v831_v1 = vcvt.s32.f32 %v575_v56  ;;  %v835_v2 = vcvt.s32.f32 %v579_v57  ;;  %v439_v3 = vunpack.c.0.s8 %v339_v30  ;;  %1100 = vmatmul.bf16.vlgmr.msrb.gmra.mxu0 %v2012_v58 }
  0x9c   : > { %v963_v5 = vpack.c.bf16 %v771_v60, %v767_v59  ;;  %v895_v6 = vcvt.s32.f32 %v639_v61  ;;  %v899_v7 = vcvt.s32.f32 %v643_v62  ;;  %v443_v8 = vunpack.c.1.s8 %v339_v30  ;;  %1113 = vmatmul.bf16.vlgmr.msrb.gmra.mxu1 %v2014_v63  ;;  %v331_v59 = vld [vmem:[%s1960_s28 + $0x30] sm:$0xff] }
  0x9d   : > { %1144 = vmatpush.bf16.msra.mxu0 %v931_v0  ;;  %v995_v10 = vpack.c.bf16 %v835_v2, %v831_v1  ;;  %1126 = vmatmul.bf16.vlgmr.msrb.gmra.mxu2 %v2016_v4  ;;  %v695_v11 = vcvt.s32.f32 %v439_v3  ;;  %v503_v12 = vunpack.c.0.s8 %v355_v39  ;;  %v507_v13 = vunpack.c.1.s8 %v355_v39 }
  0x9e   : > { %1157 = vmatpush.bf16.msra.mxu1 %v963_v5  ;;  %v1027_v15 = vpack.c.bf16 %v899_v7, %v895_v6  ;;  %1139 = vmatmul.bf16.vlgmr.msrb.gmra.mxu3 %v2018_v9  ;;  %v699_v16 = vcvt.s32.f32 %v443_v8  ;;  %v567_v17 = vunpack.c.0.s8 %v371_v44  ;;  %v571_v18 = vunpack.c.1.s8 %v371_v44  ;;  %v347_v6 = vld [vmem:[%s1960_s28 + $0xb0] sm:$0xff] }
  0x9f   : > { %1170 = vmatpush.bf16.msra.mxu2 %v995_v10  ;;  %v759_v19 = vcvt.s32.f32 %v503_v12  ;;  %v763_v20 = vcvt.s32.f32 %v507_v13  ;;  %v631_v21 = vunpack.c.0.s8 %v387_v49  ;;  %v635_v22 = vunpack.c.1.s8 %v387_v49  ;;  %v363_v12 = vld [vmem:[%s1960_s28 + $0x130] sm:$0xff] }
  0xa0   : > { %1183 = vmatpush.bf16.msra.mxu3 %v1027_v15  ;;  %v927_v24 = vpack.c.bf16 %v699_v16, %v695_v11  ;;  %v823_v25 = vcvt.s32.f32 %v567_v17  ;;  %v827_v26 = vcvt.s32.f32 %v571_v18  ;;  %v431_v27 = vunpack.c.2.s8 %v335_v14  ;;  %v379_v17 = vld [vmem:[%s1960_s28 + $0x1b0] sm:$0xff] }
  0xa1   : > { %v959_v29 = vpack.c.bf16 %v763_v20, %v759_v19  ;;  %v887_v30 = vcvt.s32.f32 %v631_v21  ;;  %v891_v31 = vcvt.s32.f32 %v635_v22  ;;  %v435_v32 = vunpack.c.3.s8 %v335_v14 }
  0xa2   : > { %1145 = vmatpush.bf16.msra.mxu0 %v927_v24  ;;  %v991_v34 = vpack.c.bf16 %v827_v26, %v823_v25  ;;  %v687_v35 = vcvt.s32.f32 %v431_v27  ;;  %v495_v36 = vunpack.c.2.s8 %v351_v23  ;;  %v499_v37 = vunpack.c.3.s8 %v351_v23 }
  0xa3   : > { %1158 = vmatpush.bf16.msra.mxu1 %v959_v29  ;;  %v1023_v38 = vpack.c.bf16 %v891_v31, %v887_v30  ;;  %v691_v39 = vcvt.s32.f32 %v435_v32  ;;  %v559_v40 = vunpack.c.2.s8 %v367_v28  ;;  %v563_v41 = vunpack.c.3.s8 %v367_v28 }
  0xa4   : > { %1171 = vmatpush.bf16.msra.mxu2 %v991_v34  ;;  %v751_v42 = vcvt.s32.f32 %v495_v36  ;;  %v755_v43 = vcvt.s32.f32 %v499_v37  ;;  %v623_v44 = vunpack.c.2.s8 %v383_v33  ;;  %v627_v45 = vunpack.c.3.s8 %v383_v33 }
  0xa5   : > { %1184 = vmatpush.bf16.msra.mxu3 %v1023_v38  ;;  %v923_v46 = vpack.c.bf16 %v691_v39, %v687_v35  ;;  %v815_v47 = vcvt.s32.f32 %v559_v40  ;;  %v819_v48 = vcvt.s32.f32 %v563_v41  ;;  %v423_v49 = vunpack.c.0.s8 %v335_v14 }
  0xa6   : > { %v955_v50 = vpack.c.bf16 %v755_v43, %v751_v42  ;;  %v879_v51 = vcvt.s32.f32 %v623_v44  ;;  %v883_v52 = vcvt.s32.f32 %v627_v45  ;;  %v427_v53 = vunpack.c.1.s8 %v335_v14  ;;  %v327_v42 = vld [vmem:[%s1960_s28 + $0x10] sm:$0xff] }
  0xa7   : > { %1146 = vmatpush.bf16.msra.mxu0 %v923_v46  ;;  %v987_v54 = vpack.c.bf16 %v819_v48, %v815_v47  ;;  %v679_v55 = vcvt.s32.f32 %v423_v49  ;;  %v487_v56 = vunpack.c.0.s8 %v351_v23  ;;  %v491_v57 = vunpack.c.1.s8 %v351_v23 }
  0xa8   : > { %1159 = vmatpush.bf16.msra.mxu1 %v955_v50  ;;  %v1019_v60 = vpack.c.bf16 %v883_v52, %v879_v51  ;;  %v683_v61 = vcvt.s32.f32 %v427_v53  ;;  %v551_v62 = vunpack.c.0.s8 %v367_v28  ;;  %v555_v0 = vunpack.c.1.s8 %v367_v28  ;;  %v343_v51 = vld [vmem:[%s1960_s28 + $0x90] sm:$0xff] }
  0xa9   : > { %1172 = vmatpush.bf16.msra.mxu2 %v987_v54  ;;  %v743_v1 = vcvt.s32.f32 %v487_v56  ;;  %v747_v2 = vcvt.s32.f32 %v491_v57  ;;  %v615_v3 = vunpack.c.0.s8 %v383_v33  ;;  %v619_v5 = vunpack.c.1.s8 %v383_v33  ;;  %v359_v56 = vld [vmem:[%s1960_s28 + $0x110] sm:$0xff] }
  0xaa   : > { %1185 = vmatpush.bf16.msra.mxu3 %v1019_v60  ;;  %v919_v7 = vpack.c.bf16 %v683_v61, %v679_v55  ;;  %v807_v8 = vcvt.s32.f32 %v551_v62  ;;  %v811_v10 = vcvt.s32.f32 %v555_v0  ;;  %v415_v11 = vunpack.c.2.s8 %v331_v59  ;;  %v375_v62 = vld [vmem:[%s1960_s28 + $0x190] sm:$0xff] }
  0xab   : > { %v951_v13 = vpack.c.bf16 %v747_v2, %v743_v1  ;;  %v871_v14 = vcvt.s32.f32 %v615_v3  ;;  %v875_v15 = vcvt.s32.f32 %v619_v5  ;;  %v419_v16 = vunpack.c.3.s8 %v331_v59 }
  0xac   : > { %1147 = vmatpush.bf16.msra.mxu0 %v919_v7  ;;  %v983_v18 = vpack.c.bf16 %v811_v10, %v807_v8  ;;  %v671_v19 = vcvt.s32.f32 %v415_v11  ;;  %v479_v20 = vunpack.c.2.s8 %v347_v6  ;;  %v483_v21 = vunpack.c.3.s8 %v347_v6 }
  0xad   : > { %1160 = vmatpush.bf16.msra.mxu1 %v951_v13  ;;  %v1015_v22 = vpack.c.bf16 %v875_v15, %v871_v14  ;;  %v675_v23 = vcvt.s32.f32 %v419_v16  ;;  %v543_v24 = vunpack.c.2.s8 %v363_v12  ;;  %v547_v25 = vunpack.c.3.s8 %v363_v12 }
  0xae   : > { %1173 = vmatpush.bf16.msra.mxu2 %v983_v18  ;;  %v735_v26 = vcvt.s32.f32 %v479_v20  ;;  %v739_v27 = vcvt.s32.f32 %v483_v21  ;;  %v607_v28 = vunpack.c.2.s8 %v379_v17  ;;  %v611_v29 = vunpack.c.3.s8 %v379_v17 }
  0xaf   : > { %1186 = vmatpush.bf16.msra.mxu3 %v1015_v22  ;;  %v915_v30 = vpack.c.bf16 %v675_v23, %v671_v19  ;;  %v799_v31 = vcvt.s32.f32 %v543_v24  ;;  %v803_v32 = vcvt.s32.f32 %v547_v25  ;;  %v407_v33 = vunpack.c.0.s8 %v331_v59 }
  0xb0   : > { %v947_v34 = vpack.c.bf16 %v739_v27, %v735_v26  ;;  %v863_v35 = vcvt.s32.f32 %v607_v28  ;;  %v867_v36 = vcvt.s32.f32 %v611_v29  ;;  %v411_v37 = vunpack.c.1.s8 %v331_v59  ;;  %v340_v26 = vld [vmem:[%s1960_s28 + $0x78] sm:$0xff] }
  0xb1   : > { %1148 = vmatpush.bf16.msra.mxu0 %v915_v30  ;;  %v979_v38 = vpack.c.bf16 %v803_v32, %v799_v31  ;;  %v663_v39 = vcvt.s32.f32 %v407_v33  ;;  %v471_v40 = vunpack.c.0.s8 %v347_v6  ;;  %v475_v41 = vunpack.c.1.s8 %v347_v6 }
  0xb2   : > { %1161 = vmatpush.bf16.msra.mxu1 %v947_v34  ;;  %v1011_v43 = vpack.c.bf16 %v867_v36, %v863_v35  ;;  %v667_v44 = vcvt.s32.f32 %v411_v37  ;;  %v535_v45 = vunpack.c.0.s8 %v363_v12  ;;  %v539_v46 = vunpack.c.1.s8 %v363_v12  ;;  %v356_v35 = vld [vmem:[%s1960_s28 + $0xf8] sm:$0xff] }
  0xb3   : > { %1174 = vmatpush.bf16.msra.mxu2 %v979_v38  ;;  %v727_v47 = vcvt.s32.f32 %v471_v40  ;;  %v731_v48 = vcvt.s32.f32 %v475_v41  ;;  %v599_v49 = vunpack.c.0.s8 %v379_v17  ;;  %v603_v50 = vunpack.c.1.s8 %v379_v17  ;;  %v372_v40 = vld [vmem:[%s1960_s28 + $0x178] sm:$0xff] }
  0xb4   : > { %1187 = vmatpush.bf16.msra.mxu3 %v1011_v43  ;;  %v911_v52 = vpack.c.bf16 %v667_v44, %v663_v39  ;;  %v791_v53 = vcvt.s32.f32 %v535_v45  ;;  %v795_v54 = vcvt.s32.f32 %v539_v46  ;;  %v399_v55 = vunpack.c.2.s8 %v327_v42  ;;  %v388_v45 = vld [vmem:[%s1960_s28 + $0x1f8] sm:$0xff] }
  0xb5   : > { %v943_v57 = vpack.c.bf16 %v731_v48, %v727_v47  ;;  %v855_v59 = vcvt.s32.f32 %v599_v49  ;;  %v859_v60 = vcvt.s32.f32 %v603_v50  ;;  %v403_v61 = vunpack.c.3.s8 %v327_v42 }
  0xb6   : > { %1149 = vmatpush.bf16.msra.mxu0 %v911_v52  ;;  %v975_v0 = vpack.c.bf16 %v795_v54, %v791_v53  ;;  %v655_v1 = vcvt.s32.f32 %v399_v55  ;;  %v463_v2 = vunpack.c.2.s8 %v343_v51  ;;  %v467_v3 = vunpack.c.3.s8 %v343_v51 }
  0xb7   : > { %1162 = vmatpush.bf16.msra.mxu1 %v943_v57  ;;  %v1007_v5 = vpack.c.bf16 %v859_v60, %v855_v59  ;;  %v659_v6 = vcvt.s32.f32 %v403_v61  ;;  %v527_v7 = vunpack.c.2.s8 %v359_v56  ;;  %v531_v8 = vunpack.c.3.s8 %v359_v56 }
  0xb8   : > { %1175 = vmatpush.bf16.msra.mxu2 %v975_v0  ;;  %v719_v10 = vcvt.s32.f32 %v463_v2  ;;  %v723_v11 = vcvt.s32.f32 %v467_v3  ;;  %v591_v12 = vunpack.c.2.s8 %v375_v62  ;;  %v595_v13 = vunpack.c.3.s8 %v375_v62 }
  0xb9   : > { %1188 = vmatpush.bf16.msra.mxu3 %v1007_v5  ;;  %v907_v14 = vpack.c.bf16 %v659_v6, %v655_v1  ;;  %v783_v15 = vcvt.s32.f32 %v527_v7  ;;  %v787_v16 = vcvt.s32.f32 %v531_v8  ;;  %v391_v17 = vunpack.c.0.s8 %v327_v42 }
  0xba   : > { %v939_v18 = vpack.c.bf16 %v723_v11, %v719_v10  ;;  %v847_v19 = vcvt.s32.f32 %v591_v12  ;;  %v851_v20 = vcvt.s32.f32 %v595_v13  ;;  %v395_v21 = vunpack.c.1.s8 %v327_v42  ;;  %v336_v10 = vld [vmem:[%s1960_s28 + $0x58] sm:$0xff] }
  0xbb   : > { %1150 = vmatpush.bf16.msra.mxu0 %v907_v14  ;;  %v971_v22 = vpack.c.bf16 %v787_v16, %v783_v15  ;;  %v647_v23 = vcvt.s32.f32 %v391_v17  ;;  %v455_v24 = vunpack.c.0.s8 %v343_v51  ;;  %v459_v25 = vunpack.c.1.s8 %v343_v51  ;;  %v352_v17 = vld [vmem:[%s1960_s28 + $0xd8] sm:$0xff] }
  0xbc   : > { %1163 = vmatpush.bf16.msra.mxu1 %v939_v18  ;;  %v1003_v27 = vpack.c.bf16 %v851_v20, %v847_v19  ;;  %v651_v28 = vcvt.s32.f32 %v395_v21  ;;  %v519_v29 = vunpack.c.0.s8 %v359_v56  ;;  %v523_v30 = vunpack.c.1.s8 %v359_v56  ;;  %v368_v21 = vld [vmem:[%s1960_s28 + $0x158] sm:$0xff] }
  0xbd   : > { %1176 = vmatpush.bf16.msra.mxu2 %v971_v22  ;;  %v711_v31 = vcvt.s32.f32 %v455_v24  ;;  %v715_v32 = vcvt.s32.f32 %v459_v25  ;;  %v583_v33 = vunpack.c.0.s8 %v375_v62  ;;  %v587_v34 = vunpack.c.1.s8 %v375_v62 }
  0xbe   : > { %1189 = vmatpush.bf16.msra.mxu3 %v1003_v27  ;;  %v903_v36 = vpack.c.bf16 %v651_v28, %v647_v23  ;;  %v775_v37 = vcvt.s32.f32 %v519_v29  ;;  %v779_v38 = vcvt.s32.f32 %v523_v30  ;;  %v448_v39 = vunpack.c.2.s8 %v340_v26 }
  0xbf   : > { %v935_v41 = vpack.c.bf16 %v715_v32, %v711_v31  ;;  %v839_v42 = vcvt.s32.f32 %v583_v33  ;;  %v843_v43 = vcvt.s32.f32 %v587_v34  ;;  %v452_v44 = vunpack.c.3.s8 %v340_v26 }
  0xc0   : > { %1151 = vmatpush.bf16.msra.mxu0 %v903_v36  ;;  %v967_v46 = vpack.c.bf16 %v779_v38, %v775_v37  ;;  %v704_v47 = vcvt.s32.f32 %v448_v39  ;;  %v512_v48 = vunpack.c.2.s8 %v356_v35  ;;  %v516_v49 = vunpack.c.3.s8 %v356_v35 }
  0xc1   : > { %1164 = vmatpush.bf16.msra.mxu1 %v935_v41  ;;  %v999_v50 = vpack.c.bf16 %v843_v43, %v839_v42  ;;  %v708_v51 = vcvt.s32.f32 %v452_v44  ;;  %v576_v52 = vunpack.c.2.s8 %v372_v40  ;;  %v580_v53 = vunpack.c.3.s8 %v372_v40 }
  0xc2   : > { %1177 = vmatpush.bf16.msra.mxu2 %v967_v46  ;;  %v768_v54 = vcvt.s32.f32 %v512_v48  ;;  %v772_v55 = vcvt.s32.f32 %v516_v49  ;;  %v640_v56 = vunpack.c.2.s8 %v388_v45  ;;  %v644_v57 = vunpack.c.3.s8 %v388_v45 }
  0xc3   : > { %1190 = vmatpush.bf16.msra.mxu3 %v999_v50  ;;  %v932_v59 = vpack.c.bf16 %v708_v51, %v704_v47  ;;  %v832_v60 = vcvt.s32.f32 %v576_v52  ;;  %v836_v61 = vcvt.s32.f32 %v580_v53  ;;  %v440_v62 = vunpack.c.0.s8 %v340_v26  ;;  %1152 = vmatmul.bf16.vlgmr.msra.gmra.mxu0 %v2012_v58  ;;  %v332_v50 = vld [vmem:[%s1960_s28 + $0x38] sm:$0xff] }
  0xc4   : > { %v964_v0 = vpack.c.bf16 %v772_v55, %v768_v54  ;;  %v896_v1 = vcvt.s32.f32 %v640_v56  ;;  %v900_v2 = vcvt.s32.f32 %v644_v57  ;;  %v444_v3 = vunpack.c.1.s8 %v340_v26  ;;  %1165 = vmatmul.bf16.vlgmr.msra.gmra.mxu1 %v2014_v63  ;;  %v384_v26 = vld [vmem:[%s1960_s28 + $0x1d8] sm:$0xff] }
  0xc5   : > { %1196 = vmatpush.bf16.msrb.mxu0 %v932_v59  ;;  %v996_v5 = vpack.c.bf16 %v836_v61, %v832_v60  ;;  %v696_v6 = vcvt.s32.f32 %v440_v62  ;;  %v504_v7 = vunpack.c.0.s8 %v356_v35  ;;  %v508_v8 = vunpack.c.1.s8 %v356_v35  ;;  %1178 = vmatmul.bf16.vlgmr.msra.gmra.mxu2 %v2016_v4  ;;  %v348_v60 = vld [vmem:[%s1960_s28 + $0xb8] sm:$0xff] }
  0xc6   : > { %1209 = vmatpush.bf16.msrb.mxu1 %v964_v0  ;;  %v1028_v11 = vpack.c.bf16 %v900_v2, %v896_v1  ;;  %v700_v12 = vcvt.s32.f32 %v444_v3  ;;  %v568_v58 = vunpack.c.0.s8 %v372_v40  ;;  %v572_v13 = vunpack.c.1.s8 %v372_v40  ;;  %1191 = vmatmul.bf16.vlgmr.msra.gmra.mxu3 %v2018_v9  ;;  %v364_v2 = vld [vmem:[%s1960_s28 + $0x138] sm:$0xff] }
  0xc7   : > { %1222 = vmatpush.bf16.msrb.mxu2 %v996_v5  ;;  %v760_v63 = vcvt.s32.f32 %v504_v7  ;;  %v764_v14 = vcvt.s32.f32 %v508_v8  ;;  %v632_v15 = vunpack.c.0.s8 %v388_v45  ;;  %v636_v16 = vunpack.c.1.s8 %v388_v45  ;;  %v380_v8 = vld [vmem:[%s1960_s28 + $0x1b8] sm:$0xff] }
  0xc8   : > { %1235 = vmatpush.bf16.msrb.mxu3 %v1028_v11  ;;  %v928_v18 = vpack.c.bf16 %v700_v12, %v696_v6  ;;  %v824_v19 = vcvt.s32.f32 %v568_v58  ;;  %v828_v4 = vcvt.s32.f32 %v572_v13  ;;  %v432_v20 = vunpack.c.2.s8 %v336_v10 }
  0xc9   : > { %v960_v22 = vpack.c.bf16 %v764_v14, %v760_v63  ;;  %v888_v23 = vcvt.s32.f32 %v632_v15  ;;  %v892_v24 = vcvt.s32.f32 %v636_v16  ;;  %v436_v25 = vunpack.c.3.s8 %v336_v10 }
  0xca   : > { %1197 = vmatpush.bf16.msrb.mxu0 %v928_v18  ;;  %v992_v9 = vpack.c.bf16 %v828_v4, %v824_v19  ;;  %v688_v27 = vcvt.s32.f32 %v432_v20  ;;  %v496_v28 = vunpack.c.2.s8 %v352_v17  ;;  %v500_v29 = vunpack.c.3.s8 %v352_v17 }
  0xcb   : > { %1210 = vmatpush.bf16.msrb.mxu1 %v960_v22  ;;  %v1024_v30 = vpack.c.bf16 %v892_v24, %v888_v23  ;;  %v692_v31 = vcvt.s32.f32 %v436_v25  ;;  %v560_v32 = vunpack.c.2.s8 %v368_v21  ;;  %v564_v33 = vunpack.c.3.s8 %v368_v21 }
  0xcc   : > { %1223 = vmatpush.bf16.msrb.mxu2 %v992_v9  ;;  %v752_v34 = vcvt.s32.f32 %v496_v28  ;;  %v756_v35 = vcvt.s32.f32 %v500_v29  ;;  %v624_v36 = vunpack.c.2.s8 %v384_v26  ;;  %v628_v37 = vunpack.c.3.s8 %v384_v26 }
  0xcd   : > { %1236 = vmatpush.bf16.msrb.mxu3 %v1024_v30  ;;  %v924_v38 = vpack.c.bf16 %v692_v31, %v688_v27  ;;  %v816_v39 = vcvt.s32.f32 %v560_v32  ;;  %v820_v40 = vcvt.s32.f32 %v564_v33  ;;  %v424_v41 = vunpack.c.0.s8 %v336_v10  ;;  %v328_v30 = vld [vmem:[%s1960_s28 + $0x18] sm:$0xff] }
  0xce   : > { %v956_v42 = vpack.c.bf16 %v756_v35, %v752_v34  ;;  %v880_v43 = vcvt.s32.f32 %v624_v36  ;;  %v884_v44 = vcvt.s32.f32 %v628_v37  ;;  %v428_v45 = vunpack.c.1.s8 %v336_v10 }
  0xcf   : > { %1198 = vmatpush.bf16.msrb.mxu0 %v924_v38  ;;  %v988_v46 = vpack.c.bf16 %v820_v40, %v816_v39  ;;  %v680_v47 = vcvt.s32.f32 %v424_v41  ;;  %v488_v48 = vunpack.c.0.s8 %v352_v17  ;;  %v492_v49 = vunpack.c.1.s8 %v352_v17  ;;  %v344_v39 = vld [vmem:[%s1960_s28 + $0x98] sm:$0xff] }
  0xd0   : > { %1211 = vmatpush.bf16.msrb.mxu1 %v956_v42  ;;  %v1020_v51 = vpack.c.bf16 %v884_v44, %v880_v43  ;;  %v684_v52 = vcvt.s32.f32 %v428_v45  ;;  %v552_v53 = vunpack.c.0.s8 %v368_v21  ;;  %v556_v54 = vunpack.c.1.s8 %v368_v21  ;;  %v360_v44 = vld [vmem:[%s1960_s28 + $0x118] sm:$0xff] }
  0xd1   : > { %1224 = vmatpush.bf16.msrb.mxu2 %v988_v46  ;;  %v744_v55 = vcvt.s32.f32 %v488_v48  ;;  %v748_v56 = vcvt.s32.f32 %v492_v49  ;;  %v616_v57 = vunpack.c.0.s8 %v384_v26  ;;  %v620_v59 = vunpack.c.1.s8 %v384_v26  ;;  %v376_v49 = vld [vmem:[%s1960_s28 + $0x198] sm:$0xff] }
  0xd2   : > { %1237 = vmatpush.bf16.msrb.mxu3 %v1020_v51  ;;  %v920_v61 = vpack.c.bf16 %v684_v52, %v680_v47  ;;  %v808_v62 = vcvt.s32.f32 %v552_v53  ;;  %v812_v0 = vcvt.s32.f32 %v556_v54  ;;  %v416_v1 = vunpack.c.2.s8 %v332_v50 }
  0xd3   : > { %v952_v3 = vpack.c.bf16 %v748_v56, %v744_v55  ;;  %v872_v5 = vcvt.s32.f32 %v616_v57  ;;  %v876_v6 = vcvt.s32.f32 %v620_v59  ;;  %v420_v7 = vunpack.c.3.s8 %v332_v50 }
  0xd4   : > { %1199 = vmatpush.bf16.msrb.mxu0 %v920_v61  ;;  %v984_v10 = vpack.c.bf16 %v812_v0, %v808_v62  ;;  %v672_v11 = vcvt.s32.f32 %v416_v1  ;;  %v480_v12 = vunpack.c.2.s8 %v348_v60  ;;  %v484_v58 = vunpack.c.3.s8 %v348_v60 }
  0xd5   : > { %1212 = vmatpush.bf16.msrb.mxu1 %v952_v3  ;;  %v1016_v13 = vpack.c.bf16 %v876_v6, %v872_v5  ;;  %v676_v63 = vcvt.s32.f32 %v420_v7  ;;  %v544_v14 = vunpack.c.2.s8 %v364_v2  ;;  %v548_v15 = vunpack.c.3.s8 %v364_v2 }
  0xd6   : > { %1225 = vmatpush.bf16.msrb.mxu2 %v984_v10  ;;  %v736_v16 = vcvt.s32.f32 %v480_v12  ;;  %v740_v17 = vcvt.s32.f32 %v484_v58  ;;  %v608_v18 = vunpack.c.2.s8 %v380_v8  ;;  %v612_v19 = vunpack.c.3.s8 %v380_v8 }
  0xd7   : > { %1238 = vmatpush.bf16.msrb.mxu3 %v1016_v13  ;;  %v916_v4 = vpack.c.bf16 %v676_v63, %v672_v11  ;;  %v800_v20 = vcvt.s32.f32 %v544_v14  ;;  %v804_v21 = vcvt.s32.f32 %v548_v15  ;;  %v408_v22 = vunpack.c.0.s8 %v332_v50 }
  0xd8   : > { %v948_v23 = vpack.c.bf16 %v740_v17, %v736_v16  ;;  %v864_v24 = vcvt.s32.f32 %v608_v18  ;;  %v868_v25 = vcvt.s32.f32 %v612_v19  ;;  %v412_v26 = vunpack.c.1.s8 %v332_v50 }
  0xd9   : > { %1200 = vmatpush.bf16.msrb.mxu0 %v916_v4  ;;  %v980_v9 = vpack.c.bf16 %v804_v21, %v800_v20  ;;  %v664_v27 = vcvt.s32.f32 %v408_v22  ;;  %v472_v28 = vunpack.c.0.s8 %v348_v60  ;;  %v476_v29 = vunpack.c.1.s8 %v348_v60 }
  0xda   : > { %1213 = vmatpush.bf16.msrb.mxu1 %v948_v23  ;;  %v1012_v31 = vpack.c.bf16 %v868_v25, %v864_v24  ;;  %v668_v32 = vcvt.s32.f32 %v412_v26  ;;  %v536_v33 = vunpack.c.0.s8 %v364_v2  ;;  %v540_v34 = vunpack.c.1.s8 %v364_v2 }
  0xdb   : > { %1226 = vmatpush.bf16.msrb.mxu2 %v980_v9  ;;  %v728_v35 = vcvt.s32.f32 %v472_v28  ;;  %v732_v36 = vcvt.s32.f32 %v476_v29  ;;  %v600_v37 = vunpack.c.0.s8 %v380_v8  ;;  %v604_v38 = vunpack.c.1.s8 %v380_v8  ;;  %v1579_v9 = vld [vmem:[#allocation1] sm:$0xff]  ;;  %v1581_v28 = vld [vmem:[#allocation1 + $0x12] sm:$0xff] }
  0xdc   : > { %1239 = vmatpush.bf16.msrb.mxu3 %v1012_v31  ;;  %v912_v40 = vpack.c.bf16 %v668_v32, %v664_v27  ;;  %v792_v41 = vcvt.s32.f32 %v536_v33  ;;  %v796_v42 = vcvt.s32.f32 %v540_v34  ;;  %v400_v43 = vunpack.c.2.s8 %v328_v30  ;;  %v1580_v27 = vld [vmem:[#allocation1 + $0x9] sm:$0xff]  ;;  %v1582_v29 = vld [vmem:[#allocation1 + $0x1b] sm:$0xff] }
  0xdd   : > { %v944_v45 = vpack.c.bf16 %v732_v36, %v728_v35  ;;  %v856_v46 = vcvt.s32.f32 %v600_v37  ;;  %v860_v47 = vcvt.s32.f32 %v604_v38  ;;  %v404_v48 = vunpack.c.3.s8 %v328_v30 }
  0xde   : > { %1201 = vmatpush.bf16.msrb.mxu0 %v912_v40  ;;  %v976_v50 = vpack.c.bf16 %v796_v42, %v792_v41  ;;  %v656_v51 = vcvt.s32.f32 %v400_v43  ;;  %v464_v52 = vunpack.c.2.s8 %v344_v39  ;;  %v468_v53 = vunpack.c.3.s8 %v344_v39 }
  0xdf   : > { %1214 = vmatpush.bf16.msrb.mxu1 %v944_v45  ;;  %v1008_v54 = vpack.c.bf16 %v860_v47, %v856_v46  ;;  %v660_v55 = vcvt.s32.f32 %v404_v48  ;;  %v528_v56 = vunpack.c.2.s8 %v360_v44  ;;  %v532_v57 = vunpack.c.3.s8 %v360_v44 }
  0xe0   : > { %1227 = vmatpush.bf16.msrb.mxu2 %v976_v50  ;;  %v720_v59 = vcvt.s32.f32 %v464_v52  ;;  %v724_v60 = vcvt.s32.f32 %v468_v53  ;;  %v592_v61 = vunpack.c.2.s8 %v376_v49  ;;  %v596_v62 = vunpack.c.3.s8 %v376_v49 }
  0xe1   : > { %1240 = vmatpush.bf16.msrb.mxu3 %v1008_v54  ;;  %v908_v0 = vpack.c.bf16 %v660_v55, %v656_v51  ;;  %v784_v1 = vcvt.s32.f32 %v528_v56  ;;  %v788_v2 = vcvt.s32.f32 %v532_v57  ;;  %v392_v3 = vunpack.c.0.s8 %v328_v30 }
  0xe2   : > { %v940_v5 = vpack.c.bf16 %v724_v60, %v720_v59  ;;  %v848_v6 = vcvt.s32.f32 %v592_v61  ;;  %v852_v7 = vcvt.s32.f32 %v596_v62  ;;  %v396_v8 = vunpack.c.1.s8 %v328_v30 }
  0xe3   : > { %1202 = vmatpush.bf16.msrb.mxu0 %v908_v0  ;;  %v972_v10 = vpack.c.bf16 %v788_v2, %v784_v1  ;;  %v648_v11 = vcvt.s32.f32 %v392_v3  ;;  %v456_v12 = vunpack.c.0.s8 %v344_v39  ;;  %v460_v58 = vunpack.c.1.s8 %v344_v39 }
  0xe4   : > { %1215 = vmatpush.bf16.msrb.mxu1 %v940_v5  ;;  %v1004_v13 = vpack.c.bf16 %v852_v7, %v848_v6  ;;  %v652_v63 = vcvt.s32.f32 %v396_v8  ;;  %v520_v14 = vunpack.c.0.s8 %v360_v44  ;;  %v524_v15 = vunpack.c.1.s8 %v360_v44 }
  0xe5   : > { %1228 = vmatpush.bf16.msrb.mxu2 %v972_v10  ;;  %v712_v16 = vcvt.s32.f32 %v456_v12  ;;  %v716_v17 = vcvt.s32.f32 %v460_v58  ;;  %v584_v18 = vunpack.c.0.s8 %v376_v49  ;;  %v588_v19 = vunpack.c.1.s8 %v376_v49 }
  0xe6   : > { %1241 = vmatpush.bf16.msrb.mxu3 %v1004_v13  ;;  %v904_v4 = vpack.c.bf16 %v652_v63, %v648_v11  ;;  %v776_v20 = vcvt.s32.f32 %v520_v14  ;;  %v780_v21 = vcvt.s32.f32 %v524_v15  ;;  %v1029_v14 = vld [vmem:[#allocation2] sm:$0xff] }
  0xe7   : > { %v936_v22 = vpack.c.bf16 %v716_v17, %v712_v16  ;;  %v840_v23 = vcvt.s32.f32 %v584_v18  ;;  %v844_v24 = vcvt.s32.f32 %v588_v19 }
  0xe8   : > { %1203 = vmatpush.bf16.msrb.mxu0 %v904_v4  ;;  %v968_v25 = vpack.c.bf16 %v780_v21, %v776_v20 }
  0xe9   : > { %1216 = vmatpush.bf16.msrb.mxu1 %v936_v22  ;;  %v1000_v26 = vpack.c.bf16 %v844_v24, %v840_v23 }
  0xea   : > { %1229 = vmatpush.bf16.msrb.mxu2 %v968_v25 }
  0xeb   : > { %1242 = vmatpush.bf16.msrb.mxu3 %v1000_v26  ;;  %1204 = vmatmul.bf16.vlgmr.msrb.gmra.mxu0 %v1579_v9 }
  0xec   : > { %1217 = vmatmul.bf16.vlgmr.msrb.gmra.mxu1 %v1580_v27 }
  0xed   : > { %1230 = vmatmul.bf16.vlgmr.msrb.gmra.mxu2 %v1581_v28 }
  0xee   : > { %1243 = vmatmul.bf16.vlgmr.msrb.gmra.mxu3 %v1582_v29 }
  0xf0   : > { %v1049_v30 = vpop.f32.mrf.mxu0 }
  0xf1   : > { %v1062_v31 = vpop.f32.mrf.mxu1 }
  0xf2   : > { %v1063_v32 = vadd.f32 %v1062_v31, %v1049_v30 }
  0xf8   : > { %v1075_v33 = vpop.f32.mrf.mxu2  ;;  %v1051_v34 = vpop.f32.mrf.mxu0 }
  0xf9   : > { %v1076_v35 = vadd.f32 %v1075_v33, %v1063_v32  ;;  %v1088_v36 = vpop.f32.mrf.mxu3  ;;  %v1064_v37 = vpop.f32.mrf.mxu1 }
  0xfb   : > { %v1089_v38 = vadd.f32 %v1088_v36, %v1076_v35 }
 0x100   : > { %v1077_v39 = vpop.f32.mrf.mxu2 }
 0x101   : > { %v1090_v40 = vpop.f32.mrf.mxu3 }
 0x118   : > { %v1101_v41 = vpop.f32.mrf.mxu0 }
 0x119   : > { %v1114_v42 = vpop.f32.mrf.mxu1 }
 0x11a   : > { %v1115_v43 = vadd.f32 %v1114_v42, %v1101_v41 }
 0x120   : > { %v1127_v44 = vpop.f32.mrf.mxu2  ;;  %v1103_v45 = vpop.f32.mrf.mxu0 }
 0x121   : > { %v1128_v46 = vadd.f32 %v1127_v44, %v1115_v43  ;;  %v1140_v47 = vpop.f32.mrf.mxu3  ;;  %v1116_v48 = vpop.f32.mrf.mxu1 }
 0x123   : > { %v1141_v49 = vadd.f32 %v1140_v47, %v1128_v46 }
 0x125   : > { %v1252_v50 = vrot.slane %v1141_v49, 6 }
 0x127   : > { %v1256_v51 = vsel %vm1255_vm0, %v1089_v38, %v1252_v50 }
 0x128   : > { %v1129_v52 = vpop.f32.mrf.mxu2 }
 0x129   : > { %v1142_v53 = vpop.f32.mrf.mxu3 }
 0x140   : > { %v1153_v54 = vpop.f32.mrf.mxu0 }
 0x141   : > { %v1166_v55 = vpop.f32.mrf.mxu1 }
 0x142   : > { %v1167_v1 = vadd.f32 %v1166_v55, %v1153_v54 }
 0x148   : > { %v1179_v56 = vpop.f32.mrf.mxu2  ;;  %v1155_v57 = vpop.f32.mrf.mxu0 }
 0x149   : > { %v1192_v59 = vpop.f32.mrf.mxu3  ;;  %v1168_v60 = vpop.f32.mrf.mxu1  ;;  %v1180_v3 = vadd.f32 %v1179_v56, %v1167_v1 }
 0x14b   : > { %v1193_v8 = vadd.f32 %v1192_v59, %v1180_v3 }
 0x14d   : > { %v1253_v13 = vrot.slane %v1193_v8, 4 }
 0x150   : > { %v1181_v61 = vpop.f32.mrf.mxu2 }
 0x151   : > { %v1194_v62 = vpop.f32.mrf.mxu3 }
 0x168   : > { %v1205_v0 = vpop.f32.mrf.mxu0 }
 0x169   : > { %v1218_v2 = vpop.f32.mrf.mxu1 }
 0x16a   : > { %v1219_v5 = vadd.f32 %v1218_v2, %v1205_v0 }
 0x170   : > { %v1231_v6 = vpop.f32.mrf.mxu2  ;;  %v1207_v7 = vpop.f32.mrf.mxu0 }
 0x171   : > { %v1232_v10 = vadd.f32 %v1231_v6, %v1219_v5  ;;  %v1244_v11 = vpop.f32.mrf.mxu3  ;;  %v1220_v12 = vpop.f32.mrf.mxu1 }
 0x173   : > { %v1245_v58 = vadd.f32 %v1244_v11, %v1232_v10 }
 0x175   : > { %v1254_v63 = vrot.slane %v1245_v58, 2 }
 0x177   : > { %v1258_v15 = vsel %vm1257_vm1, %v1253_v13, %v1254_v63  ;;  %1267 = sbr.rel (%p1466_p8) target bundleno = 409 (0x199), region = 56 }
 0x178   : > { %v1260_v16 = vsel %vm1259_vm2, %v1256_v51, %v1258_v15  ;;  %v1233_v17 = vpop.f32.mrf.mxu2 }
 0x179   : > { %v1262_v18 = vadd.f32 %v1260_v16, %v1029_v14  ;;  %v1246_v19 = vpop.f32.mrf.mxu3 }
 0x17b   : > { %1263 = vst [vmem:[#allocation2] sm:$0xff] %v1262_v18 }
 0x17c   : > { %v1269_v4 = vld [vmem:[%s261_s9] sm:$0xf]  ;;  %v1283_v20 = vld [vmem:[%s271_s15] sm:$0xf]  ;;  %vm1315_vm3 = vcmask 1040384   ;;  %vm1319_vm4 = vcmask 1042434  }
 0x17d   : > { %v1271_v21 = vperm.slane %v1269_v4, 0  ;;  %v1272_v22 = vperm.slane %v1269_v4, 1  ;;  %v1273_v23 = vperm.slane %v1269_v4, 2  ;;  %v1274_v24 = vperm.slane %v1269_v4, 3 }
 0x17e   : > { %v1285_v25 = vperm.slane %v1283_v20, 0  ;;  %v1286_v26 = vperm.slane %v1283_v20, 1  ;;  %v1287_v9 = vperm.slane %v1283_v20, 2  ;;  %v1288_v27 = vperm.slane %v1283_v20, 3 }
 0x17f   : > { %v1275_v28 = vrot.slane %v1272_v22, 6  ;;  %v1276_v29 = vrot.slane %v1273_v23, 4  ;;  %v1277_v30 = vrot.slane %v1274_v24, 2 }
 0x180   : > { %v1289_v32 = vrot.slane %v1286_v26, 6  ;;  %v1290_v33 = vrot.slane %v1287_v9, 4  ;;  %v1291_v34 = vrot.slane %v1288_v27, 2 }
 0x181   : > { %v1278_v35 = vsel %vm1255_vm0, %v1271_v21, %v1275_v28  ;;  %v1279_v36 = vsel %vm1257_vm1, %v1276_v29, %v1277_v30 }
 0x182   : > { %v1268_v31 = vld [vmem:[#allocation2] sm:$0xff]  ;;  %v1280_v37 = vsel %vm1259_vm2, %v1278_v35, %v1279_v36  ;;  %v1292_v38 = vsel %vm1255_vm0, %v1285_v25, %v1289_v32  ;;  %v1293_v39 = vsel %vm1257_vm1, %v1290_v33, %v1291_v34 }
 0x183   : > { %v1282_v40 = vmul.f32 %v1280_v37, %v1268_v31  ;;  %v1294_v41 = vsel %vm1259_vm2, %v1292_v38, %v1293_v39 }
 0x185   : > { %v1296_v42 = vadd.f32 %v1294_v41, %v1282_v40 }
 0x187   : > { %v1297_v43 = vmax.f32 %v1296_v42, 0.0 }
 0x189   : > { %1299 = vst [vmem:[#allocation1] ss:$4 sm:$0xff] %v1297_v43 }
 0x190   : > { %v1300_v44 = vld.sshfl [vmem:[#allocation1] sm:$0xff pattern:$0x73625140]  ;;  %v1301_v45 = vld.sshfl [vmem:[#allocation1 + $0x8] sm:$0xff pattern:$0x73625140] }
 0x191   : > { %v1302_v46 = vld.sshfl [vmem:[#allocation1 + $0x10] sm:$0xff pattern:$0x73625140]  ;;  %v1303_v47 = vld.sshfl [vmem:[#allocation1 + $0x18] sm:$0xff pattern:$0x73625140]  ;;  %v1308_v48 = vpack.c.bf16 %v1301_v45, %v1300_v44 }
 0x192   : > { %v1309_v49 = vpack.c.bf16 %v1303_v47, %v1302_v46 }
 0x193   : > { %v1312_v50 = vrot.slane %v1308_v48, 3 }
 0x194   : > { %v1313_v51 = vrot.slane %v1309_v49, 6  ;;  %v1314_v52 = vrot.slane %v1309_v49, 1 }
 0x195   : > { %v1318_v53 = vsel %vm1315_vm3, %v1308_v48, %v1312_v50 }
 0x196   : > { %v1322_v54 = vsel %vm1319_vm4, %v1313_v51, %v1314_v52 }
 0x197   : > { %v1323_v55 = vsel %vm1255_vm0, %v1318_v53, %v1322_v54 }
 0x198   : > { %1325 = vst [vmem:[%s313_s12] sm:$0xf] %v1323_v55 }
 0x199 PF: > { %s20_s25 = sadd.s32 1, %s1767_s25   ;;  %s2162_s0 = sld [smem:[#allocation10_spill]] }
 0x19a   : > { %p17_p9 = scmp.ge.s32.totalorder %s20_s25, 6   ;;  %s2163_s17 = sld [smem:[#allocation15_spill]] }
 0x19b   : > { %s2164_s13 = sld [smem:[#allocation16_spill]]  ;;  %s2169_s15 = smov %s1731_s16 }
 0x19c   : > { %s2165_s21 = sld [smem:[#allocation11_spill]]  ;;  %s2171_s18 = smov %s1743_s19 }
 0x19d   : > { %s2166_s22 = sld [smem:[#allocation12_spill]]  ;;  %s2172_s19 = smov %s1747_s20 }
 0x19e   : > { %s2167_s23 = sld [smem:[#allocation13_spill]]  ;;  %19 = sbr.rel (!%p17_p9) target bundleno = 13 (0xd), region = 109 }
 0x19f   : > { %s2168_s24 = sld [smem:[#allocation14_spill]]  ;;  %s2170_s16 = smov %s2162_s0 }
 0x1a1   : > { %s2173_s20 = smov %s2164_s13 }
 0x1a3   :  { %1346 = vsyncpa [#allocation4], 1 }
 0x1a4   :  { %1348 = vsyncpa [#allocation4 + $0x1], 1 }
 0x1a5   :  { %1349 = vsyncpa [#allocation6], 1 }
 0x1a6   :  { %1351 = vsyncpa [#allocation6 + $0x1], 1 }

// kernel: advnn_forward.3
= control target key start
LH: loop header
LB: loop body
LE: loop exit
PB: predicated region body
PF: predicated region fallthrough
CT: control target
= control target key end

     0   :  { %9 = vsyncpa [#allocation4], 0  ;;  %s1352_s0 = inlined_call_operand.vmem [shape: bf16[2,256], index: 0, kind: input, shape index: {}]   ;;  %s1353_s1 = inlined_call_operand.hbm [shape: s8[256,1024], index: 1, kind: input, shape index: {}]   ;;  %s1354_s2 = inlined_call_operand.vmem [shape: f32[1,1024], index: 2, kind: input, shape index: {}]   ;;  %s1355_s3 = inlined_call_operand.hbm [shape: f32[1,1024], index: 3, kind: input, shape index: {}]   ;;  %s1356_s4 = inlined_call_operand.vmem [shape: bf16[2,1024], index: 4, kind: output, shape index: {}]  }
   0x1   :  { %11 = vsyncpa [#allocation4 + $0x1], 0 }
   0x2   :  { %12 = vsyncpa [#allocation6], 0 }
   0x3   :  { %14 = vsyncpa [#allocation6 + $0x1], 0  ;;  %s1177_s15 = smov 0   ;;  %s1179_s16 = smov 0  }
   0x4   :  { %s1181_s17 = smov 0   ;;  %s1183_s18 = smov 0  }
   0x5   :  { %s1185_s19 = smov 0   ;;  %s1187_s20 = smov 0  }
   0x6 LB: > { %s953_s21 = sadd.s32 4294967295, %s1147_s20   ;;  %s32_s22 = sadd.s32 1, %s1143_s19  ;;  %s1147_s20 = sphi %s1187_s20, %s20_s20   ;;  %s1143_s19 = sphi %s1185_s19, %s1364_s19   ;;  %s1139_s18 = sphi %s1183_s18, %s1363_s18   ;;  %s1135_s17 = sphi %s1181_s17, %s1362_s17   ;;  %s1131_s16 = sphi %s1179_s16, %s1361_s16   ;;  %s1127_s15 = sphi %s1177_s15, %s1360_s15  }
   0x7   : > { %p34_p0 = scmp.ge.s32.totalorder %s32_s22, 2  ;;  %s62_s23 = sadd.s32 1, %s1135_s17 }
   0x8   : > { %p69_p1 = scmp.ne.s32.totalorder %s1135_s17, %s1131_s16  ;;  %p70_p2 = scmp.eq.s32.totalorder %s1147_s20, 0 }
   0x9   : > { %s1366_s22 = smov (%p34_p0, %s32_s22), 0  ;;  %p75_p4 = scmp.ne.s32.totalorder %s1131_s16, %s1127_s15 }
   0xa   : > { %p1213_p3 = por %p70_p2, %p69_p1  ;;  %s58_s25 = ssub.s32 %s1143_s19, %s1366_s22 }
   0xb   : > { %p76_p5 = scmp.eq.s32.totalorder %s953_s21, 0  ;;  %p60_p6 = scmp.eq.s32.totalorder %s58_s25, 0 }
   0xc   : > { %p981_p8 = scmp.lt.s32.totalorder %s1147_s20, 2  ;;  %s1229_s28 = sand.u32 1, %s1135_s17  }
   0xd   : > { %p1220_p7 = por %p76_p5, %p75_p4  ;;  %s969_s29 = sshll.u32 %s1143_s19, 5 }
   0xe   : > { %s1226_s27 = scalar_select %p60_p6, %s1135_s17, %s62_s23  }
   0xf   : > { %s957_s30 = sshll.u32 %s1229_s28, 8  ;;  %s192_s7 = scalar_lea.hbm %s1353_s1, %s969_s29 }
  0x10   : > { %s193_s8 = sshll.u32 %s192_s7, 4  ;;  %s184_s9 = scalar_lea.vmem [#allocation3], %s957_s30  ;;  %s194_s8 = int_to_ptr.hbm [resolvable:$true] %s193_s8 }
  0x11   : > { %s195_s10 = sshll.u32 %s184_s9, 4  ;;  %p1238_p9 = pnand %p981_p8, %p1213_p3  ;;  %s196_s10 = int_to_ptr.vmem [resolvable:$true] %s195_s10 }
  0x12   : > { %p962_p10 = scmp.ge.s32.totalorder %s1147_s20, 1  ;;  %s181_s12 = scalar_lea.sflag [#allocation4], %s1229_s28 }
  0x13   : > { %s1149_s13 = smov 1024   ;;  %s1150_s14 = smov 512  }
  0x14   : > { %s1151_s15 = smov 32   ;;  %p230_p11 = scmp.lt.s32.totalorder %s1147_s20, 3 }
  0x15   : > { %977 = dma.hbm_to_vmem [thread:$0]  (!%p1238_p9), %s194_s8, 4096, %s196_s10, %s181_s12, %s1149_s13, %s1150_s14, %s1151_s15  }
  0x16   : > { %s960_s21 = sshll.u32 %s1229_s28, 2  ;;  %s961_s23 = sshll.u32 %s1143_s19, 2 }
  0x17   : > { %p231_p12 = pnand %p962_p10, %p230_p11  ;;  %s221_s29 = scalar_lea.hbm %s1355_s3, %s961_s23 }
  0x18   : > { %s217_s30 = scalar_lea.vmem [#allocation5], %s960_s21  ;;  %s223_s6 = sshll.u32 %s221_s29, 4  ;;  %s224_s6 = int_to_ptr.hbm [resolvable:$true] %s223_s6 }
  0x19   : > { %s225_s5 = sshll.u32 %s217_s30, 4  ;;  %s214_s7 = scalar_lea.sflag [#allocation6], %s1229_s28  ;;  %s226_s5 = int_to_ptr.vmem [resolvable:$true] %s225_s5 }
  0x1a   : > { %980 = dma.hbm_to_vmem [thread:$0]  (!%p1238_p9), %s224_s6, 64, %s226_s5, %s214_s7  }
  0x1b   : > { %234 = sbr.rel (%p231_p12) target bundleno = 283 (0x11b), region = 36  ;;  %s236_s8 = sand.u32 (!%p231_p12), 1, %s1131_s16  }
  0x1c   : > { %s963_s9 = sshll.u32 (!%p231_p12), %s236_s8, 8  ;;  %s237_s10 = scalar_lea.sflag (!%p231_p12), [#allocation4], %s236_s8 }
  0x1d   : > { %s1256_s12 = scalar_lea.vmem (!%p231_p12), [#allocation3], %s963_s9 }
  0x20   : > { %1118 = dma.done.wait (%p1220_p7), %s237_s10, 4096  }
  0x21   : > { %1120 = vsyncadd (%p1220_p7), %s237_s10, 4294963200  ;;  %s964_s13 = sshll.u32 %s236_s8, 2  ;;  %s247_s14 = scalar_lea.sflag [#allocation6], %s236_s8 }
  0x22   : > { %s1262_s15 = scalar_lea.vmem [#allocation5], %s964_s13 }
  0x23   : > { %1122 = dma.done.wait (%p1220_p7), %s247_s14, 64  }
  0x24   : > { %1124 = vsyncadd (%p1220_p7), %s247_s14, 4294967232  ;;  %v319_v0 = vld [vmem:[%s1256_s12 + $0x60] sm:$0xff]  ;;  %v320_v2 = vld [vmem:[%s1256_s12 + $0x68] sm:$0xff]  ;;  %s965_s11 = sshll.u32 %s1139_s18, 2  ;;  %vm779_vm0 = vcmask 1045508   ;;  %vm777_vm1 = vcmask 1041408  }
  0x25   : > { %v335_v1 = vld [vmem:[%s1256_s12 + $0xe0] sm:$0xff]  ;;  %v395_v3 = vunpack.c.2.s8 %v319_v0  ;;  %v399_v4 = vunpack.c.3.s8 %v319_v0  ;;  %v336_v7 = vld [vmem:[%s1256_s12 + $0xe8] sm:$0xff]  ;;  %v396_v8 = vunpack.c.2.s8 %v320_v2  ;;  %v400_v9 = vunpack.c.3.s8 %v320_v2  ;;  %p287_p13 = scmp.lt.s32.totalorder %s965_s11, 7 }
  0x26   : > { %v459_v5 = vunpack.c.2.s8 %v335_v1  ;;  %v463_v6 = vunpack.c.3.s8 %v335_v1  ;;  %v460_v10 = vunpack.c.2.s8 %v336_v7  ;;  %v464_v11 = vunpack.c.3.s8 %v336_v7  ;;  %v315_v28 = vld [vmem:[%s1256_s12 + $0x40] sm:$0xff]  ;;  %v316_v42 = vld [vmem:[%s1256_s12 + $0x48] sm:$0xff] }
  0x27   : > { %v523_v12 = vcvt.s32.f32 %v395_v3  ;;  %v527_v13 = vcvt.s32.f32 %v399_v4  ;;  %v524_v16 = vcvt.s32.f32 %v396_v8  ;;  %v528_v17 = vcvt.s32.f32 %v400_v9  ;;  %v331_v37 = vld [vmem:[%s1256_s12 + $0xc0] sm:$0xff]  ;;  %v332_v47 = vld [vmem:[%s1256_s12 + $0xc8] sm:$0xff]  ;;  %v306_v9 = vld [vmem:[%s1352_s0] sm:$0x3]  ;;  %s1368_s11 = smov (!%p287_p13, %s965_s11), 7 }
  0x28   : > { %v587_v14 = vcvt.s32.f32 %v459_v5  ;;  %v591_v15 = vcvt.s32.f32 %v463_v6  ;;  %v588_v18 = vcvt.s32.f32 %v460_v10  ;;  %v592_v19 = vcvt.s32.f32 %v464_v11  ;;  %v311_v8 = vld [vmem:[%s1256_s12 + $0x20] sm:$0xff]  ;;  %661 = vst [vmem:[#allocation1] ss:$9 sm:$0xff] %v306_v9  ;;  %s289_s25 = scalar_lea.vmem %s1354_s2, %s1368_s11  ;;  %s295_s29 = scalar_lea.vmem %s1356_s4, %s1368_s11 }
  0x29   : > { %v623_v20 = vpack.c.bf16 %v527_v13, %v523_v12  ;;  %v387_v22 = vunpack.c.0.s8 %v319_v0  ;;  %v391_v23 = vunpack.c.1.s8 %v319_v0  ;;  %v624_v24 = vpack.c.bf16 %v528_v17, %v524_v16 }
  0x2a   : > { %v655_v21 = vpack.c.bf16 %v591_v15, %v587_v14  ;;  %v656_v25 = vpack.c.bf16 %v592_v19, %v588_v18  ;;  %v451_v26 = vunpack.c.0.s8 %v335_v1  ;;  %v455_v27 = vunpack.c.1.s8 %v335_v1  ;;  %v327_v18 = vld [vmem:[%s1256_s12 + $0xa0] sm:$0xff] }
  0x2b   : > { %666 = vmatpush.bf16.msra.mxu0 %v623_v20  ;;  %v515_v29 = vcvt.s32.f32 %v387_v22  ;;  %v519_v30 = vcvt.s32.f32 %v391_v23  ;;  %v388_v31 = vunpack.c.0.s8 %v320_v2  ;;  %v392_v32 = vunpack.c.1.s8 %v320_v2  ;;  %692 = vmatpush.bf16.msra.mxu2 %v624_v24  ;;  %v312_v23 = vld [vmem:[%s1256_s12 + $0x28] sm:$0xff] }
  0x2c   : > { %679 = vmatpush.bf16.msra.mxu1 %v655_v21  ;;  %705 = vmatpush.bf16.msra.mxu3 %v656_v25  ;;  %v579_v33 = vcvt.s32.f32 %v451_v26  ;;  %v583_v34 = vcvt.s32.f32 %v455_v27  ;;  %v452_v35 = vunpack.c.0.s8 %v336_v7  ;;  %v456_v36 = vunpack.c.1.s8 %v336_v7 }
  0x2d   : > { %v619_v38 = vpack.c.bf16 %v519_v30, %v515_v29  ;;  %v516_v39 = vcvt.s32.f32 %v388_v31  ;;  %v520_v40 = vcvt.s32.f32 %v392_v32  ;;  %v379_v41 = vunpack.c.2.s8 %v315_v28 }
  0x2e   : > { %v651_v43 = vpack.c.bf16 %v583_v34, %v579_v33  ;;  %v580_v44 = vcvt.s32.f32 %v452_v35  ;;  %v584_v45 = vcvt.s32.f32 %v456_v36  ;;  %v383_v46 = vunpack.c.3.s8 %v315_v28 }
  0x2f   : > { %667 = vmatpush.bf16.msra.mxu0 %v619_v38  ;;  %v620_v48 = vpack.c.bf16 %v520_v40, %v516_v39  ;;  %v507_v49 = vcvt.s32.f32 %v379_v41  ;;  %v443_v50 = vunpack.c.2.s8 %v331_v37  ;;  %v447_v51 = vunpack.c.3.s8 %v331_v37 }
  0x30   : > { %680 = vmatpush.bf16.msra.mxu1 %v651_v43  ;;  %v652_v52 = vpack.c.bf16 %v584_v45, %v580_v44  ;;  %v511_v53 = vcvt.s32.f32 %v383_v46  ;;  %v380_v54 = vunpack.c.2.s8 %v316_v42  ;;  %v384_v55 = vunpack.c.3.s8 %v316_v42 }
  0x31   : > { %693 = vmatpush.bf16.msra.mxu2 %v620_v48  ;;  %v571_v56 = vcvt.s32.f32 %v443_v50  ;;  %v575_v57 = vcvt.s32.f32 %v447_v51  ;;  %v444_v58 = vunpack.c.2.s8 %v332_v47  ;;  %v448_v59 = vunpack.c.3.s8 %v332_v47 }
  0x32   : > { %706 = vmatpush.bf16.msra.mxu3 %v652_v52  ;;  %v615_v60 = vpack.c.bf16 %v511_v53, %v507_v49  ;;  %v508_v61 = vcvt.s32.f32 %v380_v54  ;;  %v512_v62 = vcvt.s32.f32 %v384_v55  ;;  %v371_v63 = vunpack.c.0.s8 %v315_v28  ;;  %v307_v53 = vld [vmem:[%s1256_s12] sm:$0xff] }
  0x33   : > { %v647_v0 = vpack.c.bf16 %v575_v57, %v571_v56  ;;  %v572_v1 = vcvt.s32.f32 %v444_v58  ;;  %v576_v2 = vcvt.s32.f32 %v448_v59  ;;  %v375_v3 = vunpack.c.1.s8 %v315_v28  ;;  %v328_v28 = vld [vmem:[%s1256_s12 + $0xa8] sm:$0xff] }
  0x34   : > { %668 = vmatpush.bf16.msra.mxu0 %v615_v60  ;;  %v616_v4 = vpack.c.bf16 %v512_v62, %v508_v61  ;;  %v499_v5 = vcvt.s32.f32 %v371_v63  ;;  %v435_v6 = vunpack.c.0.s8 %v331_v37  ;;  %v439_v7 = vunpack.c.1.s8 %v331_v37  ;;  %v323_v62 = vld [vmem:[%s1256_s12 + $0x80] sm:$0xff] }
  0x35   : > { %681 = vmatpush.bf16.msra.mxu1 %v647_v0  ;;  %v648_v10 = vpack.c.bf16 %v576_v2, %v572_v1  ;;  %v503_v11 = vcvt.s32.f32 %v375_v3  ;;  %v372_v12 = vunpack.c.0.s8 %v316_v42  ;;  %v376_v13 = vunpack.c.1.s8 %v316_v42  ;;  %v308_v3 = vld [vmem:[%s1256_s12 + $0x8] sm:$0xff] }
  0x36   : > { %694 = vmatpush.bf16.msra.mxu2 %v616_v4  ;;  %v563_v14 = vcvt.s32.f32 %v435_v6  ;;  %v567_v15 = vcvt.s32.f32 %v439_v7  ;;  %v436_v16 = vunpack.c.0.s8 %v332_v47  ;;  %v440_v17 = vunpack.c.1.s8 %v332_v47 }
  0x37   : > { %707 = vmatpush.bf16.msra.mxu3 %v648_v10  ;;  %v611_v19 = vpack.c.bf16 %v503_v11, %v499_v5  ;;  %v500_v20 = vcvt.s32.f32 %v372_v12  ;;  %v504_v21 = vcvt.s32.f32 %v376_v13  ;;  %v363_v22 = vunpack.c.2.s8 %v311_v8 }
  0x38   : > { %v643_v24 = vpack.c.bf16 %v567_v15, %v563_v14  ;;  %v564_v25 = vcvt.s32.f32 %v436_v16  ;;  %v568_v26 = vcvt.s32.f32 %v440_v17  ;;  %v367_v27 = vunpack.c.3.s8 %v311_v8 }
  0x39   : > { %669 = vmatpush.bf16.msra.mxu0 %v611_v19  ;;  %v612_v29 = vpack.c.bf16 %v504_v21, %v500_v20  ;;  %v491_v30 = vcvt.s32.f32 %v363_v22  ;;  %v427_v31 = vunpack.c.2.s8 %v327_v18  ;;  %v431_v32 = vunpack.c.3.s8 %v327_v18 }
  0x3a   : > { %682 = vmatpush.bf16.msra.mxu1 %v643_v24  ;;  %v644_v33 = vpack.c.bf16 %v568_v26, %v564_v25  ;;  %v495_v34 = vcvt.s32.f32 %v367_v27  ;;  %v364_v35 = vunpack.c.2.s8 %v312_v23  ;;  %v368_v36 = vunpack.c.3.s8 %v312_v23 }
  0x3b   : > { %695 = vmatpush.bf16.msra.mxu2 %v612_v29  ;;  %v555_v37 = vcvt.s32.f32 %v427_v31  ;;  %v559_v38 = vcvt.s32.f32 %v431_v32  ;;  %v428_v39 = vunpack.c.2.s8 %v328_v28  ;;  %v432_v40 = vunpack.c.3.s8 %v328_v28 }
  0x3c   : > { %708 = vmatpush.bf16.msra.mxu3 %v644_v33  ;;  %v607_v41 = vpack.c.bf16 %v495_v34, %v491_v30  ;;  %v492_v42 = vcvt.s32.f32 %v364_v35  ;;  %v496_v43 = vcvt.s32.f32 %v368_v36  ;;  %v355_v44 = vunpack.c.0.s8 %v311_v8  ;;  %v321_v33 = vld [vmem:[%s1256_s12 + $0x70] sm:$0xff] }
  0x3d   : > { %v639_v45 = vpack.c.bf16 %v559_v38, %v555_v37  ;;  %v556_v46 = vcvt.s32.f32 %v428_v39  ;;  %v560_v47 = vcvt.s32.f32 %v432_v40  ;;  %v359_v48 = vunpack.c.1.s8 %v311_v8  ;;  %v324_v8 = vld [vmem:[%s1256_s12 + $0x88] sm:$0xff] }
  0x3e   : > { %670 = vmatpush.bf16.msra.mxu0 %v607_v41  ;;  %v608_v49 = vpack.c.bf16 %v496_v43, %v492_v42  ;;  %v483_v50 = vcvt.s32.f32 %v355_v44  ;;  %v419_v51 = vunpack.c.0.s8 %v327_v18  ;;  %v423_v52 = vunpack.c.1.s8 %v327_v18  ;;  %v337_v42 = vld [vmem:[%s1256_s12 + $0xf0] sm:$0xff] }
  0x3f   : > { %683 = vmatpush.bf16.msra.mxu1 %v639_v45  ;;  %v640_v54 = vpack.c.bf16 %v560_v47, %v556_v46  ;;  %v487_v55 = vcvt.s32.f32 %v359_v48  ;;  %v356_v56 = vunpack.c.0.s8 %v312_v23  ;;  %v360_v57 = vunpack.c.1.s8 %v312_v23  ;;  %v322_v47 = vld [vmem:[%s1256_s12 + $0x78] sm:$0xff] }
  0x40   : > { %696 = vmatpush.bf16.msra.mxu2 %v608_v49  ;;  %v547_v58 = vcvt.s32.f32 %v419_v51  ;;  %v551_v59 = vcvt.s32.f32 %v423_v52  ;;  %v420_v60 = vunpack.c.0.s8 %v328_v28  ;;  %v424_v61 = vunpack.c.1.s8 %v328_v28  ;;  %v338_v52 = vld [vmem:[%s1256_s12 + $0xf8] sm:$0xff] }
  0x41   : > { %709 = vmatpush.bf16.msra.mxu3 %v640_v54  ;;  %v603_v63 = vpack.c.bf16 %v487_v55, %v483_v50  ;;  %v484_v0 = vcvt.s32.f32 %v356_v56  ;;  %v488_v1 = vcvt.s32.f32 %v360_v57  ;;  %v347_v2 = vunpack.c.2.s8 %v307_v53 }
  0x42   : > { %v635_v4 = vpack.c.bf16 %v551_v59, %v547_v58  ;;  %v548_v5 = vcvt.s32.f32 %v420_v60  ;;  %v552_v6 = vcvt.s32.f32 %v424_v61  ;;  %v351_v7 = vunpack.c.3.s8 %v307_v53 }
  0x43   : > { %671 = vmatpush.bf16.msra.mxu0 %v603_v63  ;;  %v604_v9 = vpack.c.bf16 %v488_v1, %v484_v0  ;;  %v475_v10 = vcvt.s32.f32 %v347_v2  ;;  %v411_v11 = vunpack.c.2.s8 %v323_v62  ;;  %v415_v12 = vunpack.c.3.s8 %v323_v62  ;;  %v1291_v1 = vld [vmem:[#allocation1] sm:$0xff] }
  0x44   : > { %684 = vmatpush.bf16.msra.mxu1 %v635_v4  ;;  %v636_v13 = vpack.c.bf16 %v552_v6, %v548_v5  ;;  %v479_v14 = vcvt.s32.f32 %v351_v7  ;;  %v348_v15 = vunpack.c.2.s8 %v308_v3  ;;  %v352_v16 = vunpack.c.3.s8 %v308_v3  ;;  %v1293_v6 = vld [vmem:[#allocation1 + $0x9] sm:$0xff] }
  0x45   : > { %697 = vmatpush.bf16.msra.mxu2 %v604_v9  ;;  %v539_v17 = vcvt.s32.f32 %v411_v11  ;;  %v543_v18 = vcvt.s32.f32 %v415_v12  ;;  %v412_v19 = vunpack.c.2.s8 %v324_v8  ;;  %v416_v20 = vunpack.c.3.s8 %v324_v8 }
  0x46   : > { %710 = vmatpush.bf16.msra.mxu3 %v636_v13  ;;  %v599_v21 = vpack.c.bf16 %v479_v14, %v475_v10  ;;  %v476_v22 = vcvt.s32.f32 %v348_v15  ;;  %v480_v23 = vcvt.s32.f32 %v352_v16  ;;  %v339_v24 = vunpack.c.0.s8 %v307_v53  ;;  %v317_v15 = vld [vmem:[%s1256_s12 + $0x50] sm:$0xff] }
  0x47   : > { %v631_v25 = vpack.c.bf16 %v543_v18, %v539_v17  ;;  %v540_v26 = vcvt.s32.f32 %v412_v19  ;;  %v544_v27 = vcvt.s32.f32 %v416_v20  ;;  %v343_v28 = vunpack.c.1.s8 %v307_v53 }
  0x48   : > { %672 = vmatpush.bf16.msra.mxu0 %v599_v21  ;;  %v600_v29 = vpack.c.bf16 %v480_v23, %v476_v22  ;;  %v467_v30 = vcvt.s32.f32 %v339_v24  ;;  %v403_v31 = vunpack.c.0.s8 %v323_v62  ;;  %v407_v32 = vunpack.c.1.s8 %v323_v62  ;;  %v333_v24 = vld [vmem:[%s1256_s12 + $0xd0] sm:$0xff] }
  0x49   : > { %685 = vmatpush.bf16.msra.mxu1 %v631_v25  ;;  %v632_v34 = vpack.c.bf16 %v544_v27, %v540_v26  ;;  %v471_v35 = vcvt.s32.f32 %v343_v28  ;;  %v340_v36 = vunpack.c.0.s8 %v308_v3  ;;  %v344_v37 = vunpack.c.1.s8 %v308_v3 }
  0x4a   : > { %698 = vmatpush.bf16.msra.mxu2 %v600_v29  ;;  %v531_v38 = vcvt.s32.f32 %v403_v31  ;;  %v535_v39 = vcvt.s32.f32 %v407_v32  ;;  %v404_v40 = vunpack.c.0.s8 %v324_v8  ;;  %v408_v41 = vunpack.c.1.s8 %v324_v8  ;;  %v318_v29 = vld [vmem:[%s1256_s12 + $0x58] sm:$0xff] }
  0x4b   : > { %711 = vmatpush.bf16.msra.mxu3 %v632_v34  ;;  %v595_v43 = vpack.c.bf16 %v471_v35, %v467_v30  ;;  %v468_v44 = vcvt.s32.f32 %v340_v36  ;;  %v472_v45 = vcvt.s32.f32 %v344_v37  ;;  %v397_v46 = vunpack.c.2.s8 %v321_v33  ;;  %v334_v34 = vld [vmem:[%s1256_s12 + $0xd8] sm:$0xff] }
  0x4c   : > { %v627_v48 = vpack.c.bf16 %v535_v39, %v531_v38  ;;  %v532_v49 = vcvt.s32.f32 %v404_v40  ;;  %v536_v50 = vcvt.s32.f32 %v408_v41  ;;  %v401_v51 = vunpack.c.3.s8 %v321_v33 }
  0x4d   : > { %673 = vmatpush.bf16.msra.mxu0 %v595_v43  ;;  %v596_v53 = vpack.c.bf16 %v472_v45, %v468_v44  ;;  %v525_v54 = vcvt.s32.f32 %v397_v46  ;;  %v461_v55 = vunpack.c.2.s8 %v337_v42  ;;  %v465_v56 = vunpack.c.3.s8 %v337_v42 }
  0x4e   : > { %686 = vmatpush.bf16.msra.mxu1 %v627_v48  ;;  %v628_v57 = vpack.c.bf16 %v536_v50, %v532_v49  ;;  %v529_v58 = vcvt.s32.f32 %v401_v51  ;;  %v398_v59 = vunpack.c.2.s8 %v322_v47  ;;  %v402_v60 = vunpack.c.3.s8 %v322_v47 }
  0x4f   : > { %699 = vmatpush.bf16.msra.mxu2 %v596_v53  ;;  %v589_v61 = vcvt.s32.f32 %v461_v55  ;;  %v593_v62 = vcvt.s32.f32 %v465_v56  ;;  %v462_v63 = vunpack.c.2.s8 %v338_v52  ;;  %v466_v0 = vunpack.c.3.s8 %v338_v52 }
  0x50   : > { %712 = vmatpush.bf16.msra.mxu3 %v628_v57  ;;  %v625_v2 = vpack.c.bf16 %v529_v58, %v525_v54  ;;  %v526_v3 = vcvt.s32.f32 %v398_v59  ;;  %v530_v4 = vcvt.s32.f32 %v402_v60  ;;  %v389_v5 = vunpack.c.0.s8 %v321_v33  ;;  %674 = vmatmul.bf16.vlgmr.msra.gmra.mxu0 %v1291_v1  ;;  %v313_v59 = vld [vmem:[%s1256_s12 + $0x30] sm:$0xff] }
  0x51   : > { %v657_v7 = vpack.c.bf16 %v593_v62, %v589_v61  ;;  %v590_v8 = vcvt.s32.f32 %v462_v63  ;;  %v594_v9 = vcvt.s32.f32 %v466_v0  ;;  %v393_v10 = vunpack.c.1.s8 %v321_v33  ;;  %687 = vmatmul.bf16.vlgmr.msra.gmra.mxu1 %v1293_v6 }
  0x52   : > { %718 = vmatpush.bf16.msrb.mxu0 %v625_v2  ;;  %v626_v11 = vpack.c.bf16 %v530_v4, %v526_v3  ;;  %v517_v12 = vcvt.s32.f32 %v389_v5  ;;  %v453_v13 = vunpack.c.0.s8 %v337_v42  ;;  %v457_v14 = vunpack.c.1.s8 %v337_v42  ;;  %700 = vmatmul.bf16.vlgmr.msra.gmra.mxu2 %v1291_v1  ;;  %v329_v5 = vld [vmem:[%s1256_s12 + $0xb0] sm:$0xff] }
  0x53   : > { %731 = vmatpush.bf16.msrb.mxu1 %v657_v7  ;;  %v658_v16 = vpack.c.bf16 %v594_v9, %v590_v8  ;;  %v521_v17 = vcvt.s32.f32 %v393_v10  ;;  %v390_v18 = vunpack.c.0.s8 %v322_v47  ;;  %v394_v19 = vunpack.c.1.s8 %v322_v47  ;;  %713 = vmatmul.bf16.vlgmr.msra.gmra.mxu3 %v1293_v6 }
  0x54   : > { %744 = vmatpush.bf16.msrb.mxu2 %v626_v11  ;;  %v581_v20 = vcvt.s32.f32 %v453_v13  ;;  %v585_v21 = vcvt.s32.f32 %v457_v14  ;;  %v454_v22 = vunpack.c.0.s8 %v338_v52  ;;  %v458_v23 = vunpack.c.1.s8 %v338_v52  ;;  %v314_v11 = vld [vmem:[%s1256_s12 + $0x38] sm:$0xff] }
  0x55   : > { %757 = vmatpush.bf16.msrb.mxu3 %v658_v16  ;;  %v621_v25 = vpack.c.bf16 %v521_v17, %v517_v12  ;;  %v518_v26 = vcvt.s32.f32 %v390_v18  ;;  %v522_v27 = vcvt.s32.f32 %v394_v19  ;;  %v381_v28 = vunpack.c.2.s8 %v317_v15  ;;  %v330_v16 = vld [vmem:[%s1256_s12 + $0xb8] sm:$0xff] }
  0x56   : > { %v653_v30 = vpack.c.bf16 %v585_v21, %v581_v20  ;;  %v582_v31 = vcvt.s32.f32 %v454_v22  ;;  %v586_v32 = vcvt.s32.f32 %v458_v23  ;;  %v385_v33 = vunpack.c.3.s8 %v317_v15 }
  0x57   : > { %719 = vmatpush.bf16.msrb.mxu0 %v621_v25  ;;  %v622_v35 = vpack.c.bf16 %v522_v27, %v518_v26  ;;  %v509_v36 = vcvt.s32.f32 %v381_v28  ;;  %v445_v37 = vunpack.c.2.s8 %v333_v24  ;;  %v449_v38 = vunpack.c.3.s8 %v333_v24 }
  0x58   : > { %732 = vmatpush.bf16.msrb.mxu1 %v653_v30  ;;  %v654_v39 = vpack.c.bf16 %v586_v32, %v582_v31  ;;  %v513_v40 = vcvt.s32.f32 %v385_v33  ;;  %v382_v41 = vunpack.c.2.s8 %v318_v29  ;;  %v386_v42 = vunpack.c.3.s8 %v318_v29 }
  0x59   : > { %745 = vmatpush.bf16.msrb.mxu2 %v622_v35  ;;  %v573_v43 = vcvt.s32.f32 %v445_v37  ;;  %v577_v44 = vcvt.s32.f32 %v449_v38  ;;  %v446_v45 = vunpack.c.2.s8 %v334_v34  ;;  %v450_v46 = vunpack.c.3.s8 %v334_v34 }
  0x5a   : > { %758 = vmatpush.bf16.msrb.mxu3 %v654_v39  ;;  %v617_v47 = vpack.c.bf16 %v513_v40, %v509_v36  ;;  %v510_v48 = vcvt.s32.f32 %v382_v41  ;;  %v514_v49 = vcvt.s32.f32 %v386_v42  ;;  %v373_v50 = vunpack.c.0.s8 %v317_v15  ;;  %v309_v41 = vld [vmem:[%s1256_s12 + $0x10] sm:$0xff] }
  0x5b   : > { %v649_v51 = vpack.c.bf16 %v577_v44, %v573_v43  ;;  %v574_v52 = vcvt.s32.f32 %v446_v45  ;;  %v578_v53 = vcvt.s32.f32 %v450_v46  ;;  %v377_v54 = vunpack.c.1.s8 %v317_v15 }
  0x5c   : > { %720 = vmatpush.bf16.msrb.mxu0 %v617_v47  ;;  %v618_v55 = vpack.c.bf16 %v514_v49, %v510_v48  ;;  %v501_v56 = vcvt.s32.f32 %v373_v50  ;;  %v437_v57 = vunpack.c.0.s8 %v333_v24  ;;  %v441_v58 = vunpack.c.1.s8 %v333_v24  ;;  %v325_v50 = vld [vmem:[%s1256_s12 + $0x90] sm:$0xff] }
  0x5d   : > { %733 = vmatpush.bf16.msrb.mxu1 %v649_v51  ;;  %v650_v60 = vpack.c.bf16 %v578_v53, %v574_v52  ;;  %v505_v61 = vcvt.s32.f32 %v377_v54  ;;  %v374_v62 = vunpack.c.0.s8 %v318_v29  ;;  %v378_v63 = vunpack.c.1.s8 %v318_v29 }
  0x5e   : > { %746 = vmatpush.bf16.msrb.mxu2 %v618_v55  ;;  %v565_v0 = vcvt.s32.f32 %v437_v57  ;;  %v569_v2 = vcvt.s32.f32 %v441_v58  ;;  %v438_v3 = vunpack.c.0.s8 %v334_v34  ;;  %v442_v4 = vunpack.c.1.s8 %v334_v34  ;;  %v310_v55 = vld [vmem:[%s1256_s12 + $0x18] sm:$0xff] }
  0x5f   : > { %759 = vmatpush.bf16.msrb.mxu3 %v650_v60  ;;  %v613_v7 = vpack.c.bf16 %v505_v61, %v501_v56  ;;  %v502_v8 = vcvt.s32.f32 %v374_v62  ;;  %v506_v9 = vcvt.s32.f32 %v378_v63  ;;  %v365_v10 = vunpack.c.2.s8 %v313_v59  ;;  %v326_v60 = vld [vmem:[%s1256_s12 + $0x98] sm:$0xff] }
  0x60   : > { %v645_v12 = vpack.c.bf16 %v569_v2, %v565_v0  ;;  %v566_v13 = vcvt.s32.f32 %v438_v3  ;;  %v570_v14 = vcvt.s32.f32 %v442_v4  ;;  %v369_v15 = vunpack.c.3.s8 %v313_v59 }
  0x61   : > { %721 = vmatpush.bf16.msrb.mxu0 %v613_v7  ;;  %v614_v17 = vpack.c.bf16 %v506_v9, %v502_v8  ;;  %v493_v18 = vcvt.s32.f32 %v365_v10  ;;  %v429_v19 = vunpack.c.2.s8 %v329_v5  ;;  %v433_v20 = vunpack.c.3.s8 %v329_v5 }
  0x62   : > { %734 = vmatpush.bf16.msrb.mxu1 %v645_v12  ;;  %v646_v21 = vpack.c.bf16 %v570_v14, %v566_v13  ;;  %v497_v22 = vcvt.s32.f32 %v369_v15  ;;  %v366_v23 = vunpack.c.2.s8 %v314_v11  ;;  %v370_v24 = vunpack.c.3.s8 %v314_v11 }
  0x63   : > { %747 = vmatpush.bf16.msrb.mxu2 %v614_v17  ;;  %v557_v25 = vcvt.s32.f32 %v429_v19  ;;  %v561_v26 = vcvt.s32.f32 %v433_v20  ;;  %v430_v27 = vunpack.c.2.s8 %v330_v16  ;;  %v434_v28 = vunpack.c.3.s8 %v330_v16 }
  0x64   : > { %760 = vmatpush.bf16.msrb.mxu3 %v646_v21  ;;  %v609_v29 = vpack.c.bf16 %v497_v22, %v493_v18  ;;  %v494_v30 = vcvt.s32.f32 %v366_v23  ;;  %v498_v31 = vcvt.s32.f32 %v370_v24  ;;  %v357_v32 = vunpack.c.0.s8 %v313_v59 }
  0x65   : > { %v641_v33 = vpack.c.bf16 %v561_v26, %v557_v25  ;;  %v558_v34 = vcvt.s32.f32 %v430_v27  ;;  %v562_v35 = vcvt.s32.f32 %v434_v28  ;;  %v361_v36 = vunpack.c.1.s8 %v313_v59 }
  0x66   : > { %722 = vmatpush.bf16.msrb.mxu0 %v609_v29  ;;  %v610_v37 = vpack.c.bf16 %v498_v31, %v494_v30  ;;  %v485_v38 = vcvt.s32.f32 %v357_v32  ;;  %v421_v39 = vunpack.c.0.s8 %v329_v5  ;;  %v425_v40 = vunpack.c.1.s8 %v329_v5 }
  0x67   : > { %735 = vmatpush.bf16.msrb.mxu1 %v641_v33  ;;  %v642_v42 = vpack.c.bf16 %v562_v35, %v558_v34  ;;  %v489_v43 = vcvt.s32.f32 %v361_v36  ;;  %v358_v44 = vunpack.c.0.s8 %v314_v11  ;;  %v362_v45 = vunpack.c.1.s8 %v314_v11 }
  0x68   : > { %748 = vmatpush.bf16.msrb.mxu2 %v610_v37  ;;  %v549_v46 = vcvt.s32.f32 %v421_v39  ;;  %v553_v47 = vcvt.s32.f32 %v425_v40  ;;  %v422_v48 = vunpack.c.0.s8 %v330_v16  ;;  %v426_v49 = vunpack.c.1.s8 %v330_v16 }
  0x69   : > { %761 = vmatpush.bf16.msrb.mxu3 %v642_v42  ;;  %v605_v51 = vpack.c.bf16 %v489_v43, %v485_v38  ;;  %v486_v52 = vcvt.s32.f32 %v358_v44  ;;  %v490_v53 = vcvt.s32.f32 %v362_v45  ;;  %v349_v54 = vunpack.c.2.s8 %v309_v41 }
  0x6a   : > { %v637_v56 = vpack.c.bf16 %v553_v47, %v549_v46  ;;  %v550_v57 = vcvt.s32.f32 %v422_v48  ;;  %v554_v58 = vcvt.s32.f32 %v426_v49  ;;  %v353_v59 = vunpack.c.3.s8 %v309_v41 }
  0x6b   : > { %723 = vmatpush.bf16.msrb.mxu0 %v605_v51  ;;  %v606_v61 = vpack.c.bf16 %v490_v53, %v486_v52  ;;  %v477_v62 = vcvt.s32.f32 %v349_v54  ;;  %v413_v63 = vunpack.c.2.s8 %v325_v50  ;;  %v417_v0 = vunpack.c.3.s8 %v325_v50 }
  0x6c   : > { %736 = vmatpush.bf16.msrb.mxu1 %v637_v56  ;;  %v638_v2 = vpack.c.bf16 %v554_v58, %v550_v57  ;;  %v481_v3 = vcvt.s32.f32 %v353_v59  ;;  %v350_v4 = vunpack.c.2.s8 %v310_v55  ;;  %v354_v5 = vunpack.c.3.s8 %v310_v55 }
  0x6d   : > { %749 = vmatpush.bf16.msrb.mxu2 %v606_v61  ;;  %v541_v7 = vcvt.s32.f32 %v413_v63  ;;  %v545_v8 = vcvt.s32.f32 %v417_v0  ;;  %v414_v9 = vunpack.c.2.s8 %v326_v60  ;;  %v418_v10 = vunpack.c.3.s8 %v326_v60 }
  0x6e   : > { %762 = vmatpush.bf16.msrb.mxu3 %v638_v2  ;;  %v601_v11 = vpack.c.bf16 %v481_v3, %v477_v62  ;;  %v478_v12 = vcvt.s32.f32 %v350_v4  ;;  %v482_v13 = vcvt.s32.f32 %v354_v5  ;;  %v341_v14 = vunpack.c.0.s8 %v309_v41 }
  0x6f   : > { %v633_v15 = vpack.c.bf16 %v545_v8, %v541_v7  ;;  %v542_v16 = vcvt.s32.f32 %v414_v9  ;;  %v546_v17 = vcvt.s32.f32 %v418_v10  ;;  %v345_v18 = vunpack.c.1.s8 %v309_v41 }
  0x70   : > { %724 = vmatpush.bf16.msrb.mxu0 %v601_v11  ;;  %v602_v19 = vpack.c.bf16 %v482_v13, %v478_v12  ;;  %v469_v20 = vcvt.s32.f32 %v341_v14  ;;  %v405_v21 = vunpack.c.0.s8 %v325_v50  ;;  %v409_v22 = vunpack.c.1.s8 %v325_v50 }
  0x71   : > { %737 = vmatpush.bf16.msrb.mxu1 %v633_v15  ;;  %v634_v23 = vpack.c.bf16 %v546_v17, %v542_v16  ;;  %v473_v24 = vcvt.s32.f32 %v345_v18  ;;  %v342_v25 = vunpack.c.0.s8 %v310_v55  ;;  %v346_v26 = vunpack.c.1.s8 %v310_v55 }
  0x72   : > { %750 = vmatpush.bf16.msrb.mxu2 %v602_v19  ;;  %v533_v27 = vcvt.s32.f32 %v405_v21  ;;  %v537_v28 = vcvt.s32.f32 %v409_v22  ;;  %v406_v29 = vunpack.c.0.s8 %v326_v60  ;;  %v410_v30 = vunpack.c.1.s8 %v326_v60 }
  0x73   : > { %763 = vmatpush.bf16.msrb.mxu3 %v634_v23  ;;  %v597_v31 = vpack.c.bf16 %v473_v24, %v469_v20  ;;  %v470_v32 = vcvt.s32.f32 %v342_v25  ;;  %v474_v33 = vcvt.s32.f32 %v346_v26  ;;  %vm781_vm2 = vcmask 1043456  }
  0x74   : > { %v629_v34 = vpack.c.bf16 %v537_v28, %v533_v27  ;;  %v534_v35 = vcvt.s32.f32 %v406_v29  ;;  %v538_v36 = vcvt.s32.f32 %v410_v30  ;;  %vm836_vm3 = vcmask 1040384  }
  0x75   : > { %725 = vmatpush.bf16.msrb.mxu0 %v597_v31  ;;  %v598_v37 = vpack.c.bf16 %v474_v33, %v470_v32  ;;  %vm840_vm4 = vcmask 1042434  }
  0x76   : > { %738 = vmatpush.bf16.msrb.mxu1 %v629_v34  ;;  %v630_v38 = vpack.c.bf16 %v538_v36, %v534_v35 }
  0x77   : > { %751 = vmatpush.bf16.msrb.mxu2 %v598_v37 }
  0x78   : > { %764 = vmatpush.bf16.msrb.mxu3 %v630_v38  ;;  %726 = vmatmul.bf16.vlgmr.msrb.gmra.mxu0 %v1291_v1 }
  0x79   : > { %739 = vmatmul.bf16.vlgmr.msrb.gmra.mxu1 %v1293_v6 }
  0x7a   : > { %752 = vmatmul.bf16.vlgmr.msrb.gmra.mxu2 %v1291_v1  ;;  %v790_v1 = vld [vmem:[%s289_s25] sm:$0xf] }
  0x7b   : > { %765 = vmatmul.bf16.vlgmr.msrb.gmra.mxu3 %v1293_v6  ;;  %v804_v6 = vld [vmem:[%s1262_s15] sm:$0xf]  ;;  %v793_v49 = vperm.slane %v790_v1, 1  ;;  %v794_v50 = vperm.slane %v790_v1, 2  ;;  %v795_v51 = vperm.slane %v790_v1, 3  ;;  %v792_v56 = vperm.slane %v790_v1, 0 }
  0x7c   : > { %v807_v52 = vperm.slane %v804_v6, 1  ;;  %v808_v53 = vperm.slane %v804_v6, 2  ;;  %v809_v54 = vperm.slane %v804_v6, 3  ;;  %v806_v61 = vperm.slane %v804_v6, 0 }
  0x7d   : > { %v796_v58 = vrot.slane %v793_v49, 6  ;;  %v797_v59 = vrot.slane %v794_v50, 4  ;;  %v798_v60 = vrot.slane %v795_v51, 2 }
  0x7e   : > { %v810_v62 = vrot.slane %v807_v52, 6  ;;  %v811_v0 = vrot.slane %v808_v53, 4  ;;  %v812_v2 = vrot.slane %v809_v54, 2 }
  0x7f   : > { %v799_v11 = vsel %vm777_vm1, %v792_v56, %v796_v58  ;;  %v800_v12 = vsel %vm779_vm0, %v797_v59, %v798_v60 }
  0x80   : > { %v813_v13 = vsel %vm777_vm1, %v806_v61, %v810_v62  ;;  %v814_v15 = vsel %vm779_vm0, %v811_v0, %v812_v2  ;;  %v801_v16 = vsel %vm781_vm2, %v799_v11, %v800_v12 }
  0x81   : > { %v815_v20 = vsel %vm781_vm2, %v813_v13, %v814_v15 }
  0xcd   : > { %v675_v39 = vpop.f32.mrf.mxu0 }
  0xce   : > { %v688_v40 = vpop.f32.mrf.mxu1 }
  0xcf   : > { %v689_v4 = vadd.f32 %v688_v40, %v675_v39 }
  0xd5   : > { %v701_v41 = vpop.f32.mrf.mxu2  ;;  %v677_v42 = vpop.f32.mrf.mxu0 }
  0xd6   : > { %v714_v43 = vpop.f32.mrf.mxu3  ;;  %v690_v44 = vpop.f32.mrf.mxu1 }
  0xd7   : > { %v715_v55 = vadd.f32 %v714_v43, %v701_v41 }
  0xd9   : > { %v774_v5 = vrot.slane %v715_v55, 6 }
  0xdb   : > { %v778_v17 = vsel %vm777_vm1, %v689_v4, %v774_v5 }
  0xdd   : > { %v703_v45 = vpop.f32.mrf.mxu2 }
  0xde   : > { %v716_v46 = vpop.f32.mrf.mxu3 }
  0xf5   : > { %v727_v47 = vpop.f32.mrf.mxu0 }
  0xf6   : > { %v740_v48 = vpop.f32.mrf.mxu1 }
  0xf7   : > { %v741_v57 = vadd.f32 %v740_v48, %v727_v47 }
  0xf9   : > { %v775_v9 = vrot.slane %v741_v57, 4 }
  0xfd   : > { %v753_v63 = vpop.f32.mrf.mxu2  ;;  %v729_v3 = vpop.f32.mrf.mxu0 }
  0xfe   : > { %v766_v7 = vpop.f32.mrf.mxu3  ;;  %v742_v8 = vpop.f32.mrf.mxu1 }
  0xff   : > { %v767_v10 = vadd.f32 %v766_v7, %v753_v63 }
 0x101   : > { %v776_v14 = vrot.slane %v767_v10, 2 }
 0x103   : > { %v780_v18 = vsel %vm779_vm0, %v775_v9, %v776_v14 }
 0x104   : > { %v782_v19 = vsel %vm781_vm2, %v778_v17, %v780_v18 }
 0x105   : > { %v803_v21 = vmul.f32 %v801_v16, %v782_v19  ;;  %v755_v22 = vpop.f32.mrf.mxu2 }
 0x106   : > { %v768_v23 = vpop.f32.mrf.mxu3 }
 0x107   : > { %v817_v24 = vadd.f32 %v815_v20, %v803_v21 }
 0x109   : > { %v818_v25 = vmax.f32 %v817_v24, 0.0 }
 0x10b   : > { %820 = vst [vmem:[#allocation1] ss:$4 sm:$0xff] %v818_v25 }
 0x112   : > { %v821_v26 = vld.sshfl [vmem:[#allocation1] sm:$0xff pattern:$0x73625140]  ;;  %v822_v27 = vld.sshfl [vmem:[#allocation1 + $0x8] sm:$0xff pattern:$0x73625140] }
 0x113   : > { %v823_v28 = vld.sshfl [vmem:[#allocation1 + $0x10] sm:$0xff pattern:$0x73625140]  ;;  %v824_v29 = vld.sshfl [vmem:[#allocation1 + $0x18] sm:$0xff pattern:$0x73625140]  ;;  %v829_v30 = vpack.c.bf16 %v822_v27, %v821_v26 }
 0x114   : > { %v830_v31 = vpack.c.bf16 %v824_v29, %v823_v28 }
 0x115   : > { %v833_v32 = vrot.slane %v829_v30, 3 }
 0x116   : > { %v834_v33 = vrot.slane %v830_v31, 6  ;;  %v835_v34 = vrot.slane %v830_v31, 1 }
 0x117   : > { %v839_v35 = vsel %vm836_vm3, %v829_v30, %v833_v32 }
 0x118   : > { %v843_v36 = vsel %vm840_vm4, %v834_v33, %v835_v34 }
 0x119   : > { %v844_v37 = vsel %vm777_vm1, %v839_v35, %v843_v36 }
 0x11a   : > { %846 = vst [vmem:[%s295_s29] sm:$0xf] %v844_v37 }
 0x11b PF: > { %s20_s20 = sadd.s32 1, %s1147_s20   ;;  %s1360_s15 = smov %s1131_s16 }
 0x11c   : > { %p17_p0 = scmp.ge.s32.totalorder %s20_s20, 4   ;;  %s1361_s16 = smov %s1135_s17 }
 0x11d   : > { %s1362_s17 = smov %s1226_s27  ;;  %s1363_s18 = smov %s1143_s19 }
 0x11e   : > { %s1364_s19 = smov %s1366_s22  ;;  %19 = sbr.rel (!%p17_p0) target bundleno = 6 (0x6), region = 101 }
 0x123   :  { %867 = vsyncpa [#allocation4], 1 }
 0x124   :  { %869 = vsyncpa [#allocation4 + $0x1], 1 }
 0x125   :  { %870 = vsyncpa [#allocation6], 1 }
 0x126   :  { %872 = vsyncpa [#allocation6 + $0x1], 1 }

</bundles_post_ra>
